<compile_context>
chip_gen: v5e
topology: v5e:2x2
jax: 0.10.0
libtpu: 0.0.40
codegen_flags: <defaults>
</compile_context>

<pallas_src>
from functools import partial

import jax
import jax.numpy as jnp
from jax.experimental import pallas as pl
from jax.experimental.pallas import tpu as pltpu


# ---------------------------------------------------------------------------
# Kernel: fused  mn1 -> fc2 -> mn2 -> output -> logsoftmax   (dropouts = identity)
# ---------------------------------------------------------------------------
def maxnorm_mlp_kernel(x_ref,
                       w1_ref, b1_ref,
                       w2_ref, b2_ref,
                       w3_ref, b3_ref,
                       w4_ref, b4_ref,
                       o_ref):
    bf16 = jnp.bfloat16
    x = x_ref[...]                                                       # (tb, 784) bf16

    # mn1: Linear 784 -> 512 ; bf16 operands, f32 accumulate
    h = jnp.dot(x, w1_ref[...], preferred_element_type=jnp.float32) + b1_ref[...]

    # fc2: Linear 512 -> 512
    h = jnp.dot(h.astype(bf16), w2_ref[...],
                preferred_element_type=jnp.float32) + b2_ref[...]

    # mn2: Linear 512 -> 256
    h = jnp.dot(h.astype(bf16), w3_ref[...],
                preferred_element_type=jnp.float32) + b3_ref[...]

    # output: Linear 256 -> 128 (classes padded to lane width; padded bias = -1e30)
    logits = jnp.dot(h.astype(bf16), w4_ref[...],
                     preferred_element_type=jnp.float32) + b4_ref[...]

    # LogSoftmax over classes, numerically stable, f32 throughout.
    m = jnp.max(logits, axis=1, keepdims=True)
    shifted = logits - m
    lse = jnp.log(jnp.sum(jnp.exp(shifted), axis=1, keepdims=True))
    o_ref[...] = (shifted - lse).astype(o_ref.dtype)


# ---------------------------------------------------------------------------
# Helpers
# ---------------------------------------------------------------------------
def _pad_up(n, mult):
    return ((n + mult - 1) // mult) * mult


def _pick_tb(B):
    # Largest batch tile that still yields >= 4 grid steps (>= 2 per v7x TensorCore when
    # the "parallel" batch axis is megacore-sharded, keeping prefetch/compute overlap).
    # Falls back to a single 8-row-aligned step for tiny batches.  Cap 1024 keeps the
    # double-buffered VMEM footprint at ~10 MB, safe on v7x's 64 MiB/TC.
    for cand in (1024, 512, 256, 128, 64, 32, 16, 8):
        if B >= 4 * cand:
            return cand
    return min(_pad_up(max(B, 8), 8), 1024)


def prepare_params(params):
    """One-time (outside the hot path) weight prep: pad the output layer's class dim to a
    lane-dense multiple of 128 and cast all weights to bf16 (MXU input format).  Biases
    stay f32; padded logit columns get a -1e30 bias so log_softmax ignores them.
    Returns (prepared_param_tuple, num_classes)."""
    w1, b1, w2, b2, w3, b3, w4, b4 = params
    nc = int(w4.shape[1])
    nc_pad = _pad_up(max(nc, 128), 128)

    w4_p = jnp.zeros((w4.shape[0], nc_pad), jnp.float32).at[:, :nc].set(w4)
    b4_p = jnp.full((1, nc_pad), -1e30, jnp.float32).at[:, :nc].set(b4)

    prepared = (w1.astype(jnp.bfloat16), b1.astype(jnp.float32),
                w2.astype(jnp.bfloat16), b2.astype(jnp.float32),
                w3.astype(jnp.bfloat16), b3.astype(jnp.float32),
                w4_p.astype(jnp.bfloat16), b4_p)
    return prepared, nc


# ---------------------------------------------------------------------------
# Forward wrapper (params are pre-padded / pre-cast; no per-call weight traffic)
# ---------------------------------------------------------------------------
@partial(jax.jit, static_argnames=("num_classes",))
def maxnorm_mlp_forward(x_nchw, prepared, num_classes):
    w1, b1, w2, b2, w3, b3, w4, b4 = prepared
    B = x_nchw.shape[0]
    in_dim = w1.shape[0]                      # 784
    d1, d2, d3 = w1.shape[1], w2.shape[1], w3.shape[1]
    nc_pad = w4.shape[1]

    tb = _pick_tb(B)
    Bp = pl.cdiv(B, tb) * tb                  # padded batch (no dropped remainder rows)

    # Fused input prep: flatten (row-major, same as nn.Flatten), one bf16 cast, one pad.
    x = x_nchw.reshape(B, -1).astype(jnp.bfloat16)
    assert x.shape[1] == in_dim
    if Bp != B:
        x = jnp.pad(x, ((0, Bp - B), (0, 0)))

    grid = (Bp // tb,)
    full = lambda shape: pl.BlockSpec(shape, lambda i: (0, 0))

    out = pl.pallas_call(
        maxnorm_mlp_kernel,
        out_shape=jax.ShapeDtypeStruct((Bp, nc_pad), jnp.float32),
        grid_spec=pltpu.PrefetchScalarGridSpec(
            num_scalar_prefetch=0,
            grid=grid,
            in_specs=[
                # x: batch-tiled; full-extent (784) last dim -> no column padding needed.
                pl.BlockSpec((tb, in_dim), lambda i: (i, 0)),
                full((in_dim, d1)), full((1, d1)),              # mn1
                full((d1, d2)),     full((1, d2)),              # fc2
                full((d2, d3)),     full((1, d3)),              # mn2
                full((d3, nc_pad)), full((1, nc_pad)),          # output (padded classes)
            ],
            out_specs=pl.BlockSpec((tb, nc_pad), lambda i: (i, 0)),
        ),
        compiler_params=pltpu.CompilerParams(
            dimension_semantics=("parallel",),
            vmem_limit_bytes=32 << 20,
        ),
    )(x, w1, b1, w2, b2, w3, b3, w4, b4)

    # Strip batch padding and class padding.
    return out[:B, :num_classes]


# ---------------------------------------------------------------------------
# Deterministic parameter init (PyTorch nn.Linear default: U(-1/sqrt(fan_in), 1/sqrt(fan_in)))
# Weights are stored already transposed to (in, out) for the kernel.
# ---------------------------------------------------------------------------
def init_params(key, num_classes=10):
    dims = [(784, 512), (512, 512), (512, 256), (256, num_classes)]
    params = []
    for (fan_in, fan_out) in dims:
        key, kw, kb = jax.random.split(key, 3)
        bound = 1.0 / jnp.sqrt(fan_in)
        w = jax.random.uniform(kw, (fan_in, fan_out), jnp.float32, -bound, bound)
        b = jax.random.uniform(kb, (1, fan_out), jnp.float32, -bound, bound)
        params += [w, b]
    return tuple(params)


def reference_forward(x_nchw, params):
    # Pure-JAX reference using the same bf16-operand / f32-accumulate matmul recipe.
    bf16 = jnp.bfloat16
    x = x_nchw.reshape(x_nchw.shape[0], -1).astype(jnp.float32)
    w1, b1, w2, b2, w3, b3, w4, b4 = params
    h = jnp.dot(x.astype(bf16), w1.astype(bf16), preferred_element_type=jnp.float32) + b1
    h = jnp.dot(h.astype(bf16), w2.astype(bf16), preferred_element_type=jnp.float32) + b2
    h = jnp.dot(h.astype(bf16), w3.astype(bf16), preferred_element_type=jnp.float32) + b3
    logits = jnp.dot(h.astype(bf16), w4.astype(bf16), preferred_element_type=jnp.float32) + b4
    return jax.nn.log_softmax(logits, axis=1)


if __name__ == "__main__":
    key = jax.random.PRNGKey(0)
    kx1, kx2, kp = jax.random.split(key, 3)

    num_classes = 10
    raw_params = init_params(kp, num_classes=num_classes)
    prepared, nc = prepare_params(raw_params)       # one-time pad + bf16 cast

    # Case 1: batch that tiles evenly (tb=16, 4 grid steps -> 2 per v7x TensorCore).
    B1 = 64
    x1 = jax.random.normal(kx1, (B1, 1, 28, 28), jnp.float32)
    out1 = jax.block_until_ready(maxnorm_mlp_forward(x1, prepared, num_classes=nc))
    ref1 = reference_forward(x1, raw_params)
    assert out1.shape == (B1, num_classes)
    assert jnp.allclose(out1, ref1, atol=2e-3, rtol=2e-3), "mismatch vs reference (B=64)"

    # Case 2: ragged batch (exercises remainder-row padding).
    B2 = 37
    x2 = jax.random.normal(kx2, (B2, 1, 28, 28), jnp.float32)
    out2 = jax.block_until_ready(maxnorm_mlp_forward(x2, prepared, num_classes=nc))
    ref2 = reference_forward(x2, raw_params)
    assert out2.shape == (B2, num_classes)
    assert jnp.allclose(out2, ref2, atol=2e-3, rtol=2e-3), "mismatch vs reference (B=37)"

    print("KERNEL_OK")
</pallas_src>

<mosaic_0001>
module attributes {stable_mosaic.version = 11 : i64} {
  func.func @maxnorm_mlp_kernel(%arg0: i32, %arg1: memref<16x784xbf16, #tpu.memory_space<vmem>>, %arg2: memref<784x512xbf16, #tpu.memory_space<vmem>>, %arg3: memref<1x512xf32, #tpu.memory_space<vmem>>, %arg4: memref<512x512xbf16, #tpu.memory_space<vmem>>, %arg5: memref<1x512xf32, #tpu.memory_space<vmem>>, %arg6: memref<512x256xbf16, #tpu.memory_space<vmem>>, %arg7: memref<1x256xf32, #tpu.memory_space<vmem>>, %arg8: memref<256x128xbf16, #tpu.memory_space<vmem>>, %arg9: memref<1x128xf32, #tpu.memory_space<vmem>>, %arg10: memref<16x128xf32, #tpu.memory_space<vmem>>) attributes {dimension_semantics = [#tpu.dimension_semantics<parallel>], iteration_bounds = array<i64: 4>, scalar_prefetch = 0 : i64, scratch_operands = 0 : i64, tpu.core_type = #tpu.core_type<tc>, window_params = [{transform_indices = @transform_0, window_bounds = array<i64: 16, 784>}, {pipeline_mode = #tpu.pipeline_mode<synchronous>, transform_indices = @transform_1, window_bounds = array<i64: 784, 512>}, {pipeline_mode = #tpu.pipeline_mode<synchronous>, transform_indices = @transform_2, window_bounds = array<i64: 1, 512>}, {pipeline_mode = #tpu.pipeline_mode<synchronous>, transform_indices = @transform_3, window_bounds = array<i64: 512, 512>}, {pipeline_mode = #tpu.pipeline_mode<synchronous>, transform_indices = @transform_4, window_bounds = array<i64: 1, 512>}, {pipeline_mode = #tpu.pipeline_mode<synchronous>, transform_indices = @transform_5, window_bounds = array<i64: 512, 256>}, {pipeline_mode = #tpu.pipeline_mode<synchronous>, transform_indices = @transform_6, window_bounds = array<i64: 1, 256>}, {pipeline_mode = #tpu.pipeline_mode<synchronous>, transform_indices = @transform_7, window_bounds = array<i64: 256, 128>}, {pipeline_mode = #tpu.pipeline_mode<synchronous>, transform_indices = @transform_8, window_bounds = array<i64: 1, 128>}, {transform_indices = @transform_9, window_bounds = array<i64: 16, 128>}]} {
    %c0 = arith.constant 0 : index
    %c0_0 = arith.constant 0 : index
    %0 = vector.load %arg1[%c0, %c0_0] : memref<16x784xbf16, #tpu.memory_space<vmem>>, vector<16x784xbf16>
    %c0_1 = arith.constant 0 : index
    %c0_2 = arith.constant 0 : index
    %1 = vector.load %arg2[%c0_1, %c0_2] : memref<784x512xbf16, #tpu.memory_space<vmem>>, vector<784x512xbf16>
    %cst = arith.constant dense<0.000000e+00> : vector<16x512xf32>
    %2 = tpu.matmul %0, %1, %cst {dimension_numbers = #tpu.dot_dimension_numbers<[1], [0], [0], [1], [0, 0, 1, 1], [], []>} : vector<16x784xbf16>, vector<784x512xbf16>, vector<16x512xf32> -> vector<16x512xf32>
    %c0_3 = arith.constant 0 : index
    %c0_4 = arith.constant 0 : index
    %3 = vector.load %arg3[%c0_3, %c0_4] : memref<1x512xf32, #tpu.memory_space<vmem>>, vector<1x512xf32>
    %4 = vector.broadcast %3 : vector<1x512xf32> to vector<16x512xf32>
    %5 = arith.addf %2, %4 : vector<16x512xf32>
    %6 = arith.truncf %5 : vector<16x512xf32> to vector<16x512xbf16>
    %c0_5 = arith.constant 0 : index
    %c0_6 = arith.constant 0 : index
    %7 = vector.load %arg4[%c0_5, %c0_6] : memref<512x512xbf16, #tpu.memory_space<vmem>>, vector<512x512xbf16>
    %cst_7 = arith.constant dense<0.000000e+00> : vector<16x512xf32>
    %8 = tpu.matmul %6, %7, %cst_7 {dimension_numbers = #tpu.dot_dimension_numbers<[1], [0], [0], [1], [0, 0, 1, 1], [], []>} : vector<16x512xbf16>, vector<512x512xbf16>, vector<16x512xf32> -> vector<16x512xf32>
    %c0_8 = arith.constant 0 : index
    %c0_9 = arith.constant 0 : index
    %9 = vector.load %arg5[%c0_8, %c0_9] : memref<1x512xf32, #tpu.memory_space<vmem>>, vector<1x512xf32>
    %10 = vector.broadcast %9 : vector<1x512xf32> to vector<16x512xf32>
    %11 = arith.addf %8, %10 : vector<16x512xf32>
    %12 = arith.truncf %11 : vector<16x512xf32> to vector<16x512xbf16>
    %c0_10 = arith.constant 0 : index
    %c0_11 = arith.constant 0 : index
    %13 = vector.load %arg6[%c0_10, %c0_11] : memref<512x256xbf16, #tpu.memory_space<vmem>>, vector<512x256xbf16>
    %cst_12 = arith.constant dense<0.000000e+00> : vector<16x256xf32>
    %14 = tpu.matmul %12, %13, %cst_12 {dimension_numbers = #tpu.dot_dimension_numbers<[1], [0], [0], [1], [0, 0, 1, 1], [], []>} : vector<16x512xbf16>, vector<512x256xbf16>, vector<16x256xf32> -> vector<16x256xf32>
    %c0_13 = arith.constant 0 : index
    %c0_14 = arith.constant 0 : index
    %15 = vector.load %arg7[%c0_13, %c0_14] : memref<1x256xf32, #tpu.memory_space<vmem>>, vector<1x256xf32>
    %16 = vector.broadcast %15 : vector<1x256xf32> to vector<16x256xf32>
    %17 = arith.addf %14, %16 : vector<16x256xf32>
    %18 = arith.truncf %17 : vector<16x256xf32> to vector<16x256xbf16>
    %c0_15 = arith.constant 0 : index
    %c0_16 = arith.constant 0 : index
    %19 = vector.load %arg8[%c0_15, %c0_16] : memref<256x128xbf16, #tpu.memory_space<vmem>>, vector<256x128xbf16>
    %cst_17 = arith.constant dense<0.000000e+00> : vector<16x128xf32>
    %20 = tpu.matmul %18, %19, %cst_17 {dimension_numbers = #tpu.dot_dimension_numbers<[1], [0], [0], [1], [0, 0, 1, 1], [], []>} : vector<16x256xbf16>, vector<256x128xbf16>, vector<16x128xf32> -> vector<16x128xf32>
    %c0_18 = arith.constant 0 : index
    %c0_19 = arith.constant 0 : index
    %21 = vector.load %arg9[%c0_18, %c0_19] : memref<1x128xf32, #tpu.memory_space<vmem>>, vector<1x128xf32>
    %22 = vector.broadcast %21 : vector<1x128xf32> to vector<16x128xf32>
    %23 = arith.addf %20, %22 : vector<16x128xf32>
    %cst_20 = arith.constant dense<0xFF800000> : vector<16xf32>
    %24 = vector.multi_reduction <maximumf>, %23, %cst_20 [1] : vector<16x128xf32> to vector<16xf32>
    %25 = vector.shape_cast %24 : vector<16xf32> to vector<16x1xf32>
    %26 = vector.broadcast %25 : vector<16x1xf32> to vector<16x128xf32>
    %27 = arith.subf %23, %26 : vector<16x128xf32>
    %28 = math.exp %27 : vector<16x128xf32>
    %cst_21 = arith.constant dense<0.000000e+00> : vector<16xf32>
    %29 = vector.multi_reduction <add>, %28, %cst_21 [1] : vector<16x128xf32> to vector<16xf32>
    %30 = vector.shape_cast %29 : vector<16xf32> to vector<16x1xf32>
    %31 = math.log %30 : vector<16x1xf32>
    %32 = vector.broadcast %31 : vector<16x1xf32> to vector<16x128xf32>
    %33 = arith.subf %27, %32 : vector<16x128xf32>
    %c0_22 = arith.constant 0 : index
    %c0_23 = arith.constant 0 : index
    %34 = vector.load %arg10[%c0_22, %c0_23] : memref<16x128xf32, #tpu.memory_space<vmem>>, vector<16x128xf32>
    tpu.vector_store %arg10[%c0_22, %c0_23], %33 {strides = array<i32>} : memref<16x128xf32, #tpu.memory_space<vmem>>, vector<16x128xf32>,
    return
  }
  func.func @transform_0(%arg0: i32) -> (i32, i32) {
    %c0_i32 = arith.constant 0 : i32
    %c0_i32_0 = arith.constant 0 : i32
    return %arg0, %c0_i32 : i32, i32
  }
  func.func @transform_1(%arg0: i32) -> (i32, i32) {
    %c0_i32 = arith.constant 0 : i32
    %c0_i32_0 = arith.constant 0 : i32
    %c0_i32_1 = arith.constant 0 : i32
    return %c0_i32, %c0_i32_0 : i32, i32
  }
  func.func @transform_2(%arg0: i32) -> (i32, i32) {
    %c0_i32 = arith.constant 0 : i32
    %c0_i32_0 = arith.constant 0 : i32
    %c0_i32_1 = arith.constant 0 : i32
    return %c0_i32, %c0_i32_0 : i32, i32
  }
  func.func @transform_3(%arg0: i32) -> (i32, i32) {
    %c0_i32 = arith.constant 0 : i32
    %c0_i32_0 = arith.constant 0 : i32
    %c0_i32_1 = arith.constant 0 : i32
    return %c0_i32, %c0_i32_0 : i32, i32
  }
  func.func @transform_4(%arg0: i32) -> (i32, i32) {
    %c0_i32 = arith.constant 0 : i32
    %c0_i32_0 = arith.constant 0 : i32
    %c0_i32_1 = arith.constant 0 : i32
    return %c0_i32, %c0_i32_0 : i32, i32
  }
  func.func @transform_5(%arg0: i32) -> (i32, i32) {
    %c0_i32 = arith.constant 0 : i32
    %c0_i32_0 = arith.constant 0 : i32
    %c0_i32_1 = arith.constant 0 : i32
    return %c0_i32, %c0_i32_0 : i32, i32
  }
  func.func @transform_6(%arg0: i32) -> (i32, i32) {
    %c0_i32 = arith.constant 0 : i32
    %c0_i32_0 = arith.constant 0 : i32
    %c0_i32_1 = arith.constant 0 : i32
    return %c0_i32, %c0_i32_0 : i32, i32
  }
  func.func @transform_7(%arg0: i32) -> (i32, i32) {
    %c0_i32 = arith.constant 0 : i32
    %c0_i32_0 = arith.constant 0 : i32
    %c0_i32_1 = arith.constant 0 : i32
    return %c0_i32, %c0_i32_0 : i32, i32
  }
  func.func @transform_8(%arg0: i32) -> (i32, i32) {
    %c0_i32 = arith.constant 0 : i32
    %c0_i32_0 = arith.constant 0 : i32
    %c0_i32_1 = arith.constant 0 : i32
    return %c0_i32, %c0_i32_0 : i32, i32
  }
  func.func @transform_9(%arg0: i32) -> (i32, i32) {
    %c0_i32 = arith.constant 0 : i32
    %c0_i32_0 = arith.constant 0 : i32
    return %arg0, %c0_i32 : i32, i32
  }
}

</mosaic_0001>

<bundles_post_ra>
// kernel: maxnorm_mlp_forward.1
= control target key start
LH: loop header
LB: loop body
LE: loop exit
PB: predicated region body
PF: predicated region fallthrough
CT: control target
= control target key end

     0   :  { %14 = vsyncpa [#allocation3], 0  ;;  %s8155_s0 = inlined_call_operand.vmem [shape: bf16[64,784], index: 0, kind: input, shape index: {}]   ;;  %s8156_s1 = inlined_call_operand.vmem [shape: bf16[784,512], index: 1, kind: input, shape index: {}]   ;;  %s8157_s2 = inlined_call_operand.vmem [shape: f32[1,512], index: 2, kind: input, shape index: {}]   ;;  %s8158_s3 = inlined_call_operand.vmem [shape: bf16[512,512], index: 3, kind: input, shape index: {}]   ;;  %s8159_s4 = inlined_call_operand.vmem [shape: f32[1,512], index: 4, kind: input, shape index: {}]   ;;  %s8160_s5 = inlined_call_operand.hbm [shape: bf16[512,256], index: 5, kind: input, shape index: {}]   ;;  %s8161_s6 = inlined_call_operand.vmem [shape: f32[1,256], index: 6, kind: input, shape index: {}]   ;;  %s8162_s7 = inlined_call_operand.hbm [shape: bf16[256,128], index: 7, kind: input, shape index: {}]   ;;  %s8163_s8 = inlined_call_operand.vmem [shape: f32[1,128], index: 8, kind: input, shape index: {}]   ;;  %s8164_s9 = inlined_call_operand.vmem [shape: f32[64,128], index: 9, kind: output, shape index: {}]  }
   0x1   :  { %15 = vsyncpa [#allocation5], 0  ;;  %s6023_s30 = smov 0  }
   0x2 LB: > { %s269_s12 = sshll.u32 %s8160_s5, 4  ;;  %s3773_s13 = sadd.s32 4294967295, %s5965_s30   ;;  %s5965_s30 = sphi %s6023_s30, %s21_s30   ;;  %s270_s12 = int_to_ptr.hbm [resolvable:$true] %s269_s12 }
   0x3   : > { %p3775_p0 = scmp.ge.s32.totalorder %s5965_s30, 1  ;;  %p246_p1 = scmp.lt.s32.totalorder %s5965_s30, 5 }
   0x4   : > { %p6034_p2 = scmp.eq.s32.totalorder %s3773_s13, 0  ;;  %s5967_s16 = smov [#allocation2]  }
   0x5   : > { %p6038_p3 = pnand %p3775_p0, %p246_p1  ;;  %s271_s17 = sshll.u32 %s5967_s16, 4  ;;  %s272_s17 = int_to_ptr.vmem [resolvable:$true] %s271_s17 }
   0x6   : > { %s286_s20 = sshll.u32 %s8162_s7, 4  ;;  %s5968_s21 = smov [#allocation4]   ;;  %s287_s20 = int_to_ptr.hbm [resolvable:$true] %s286_s20 }
   0x7   : > { %p5856_p4 = pneg %p6038_p3  ;;  %s288_s22 = sshll.u32 %s5968_s21, 4  ;;  %s289_s22 = int_to_ptr.vmem [resolvable:$true] %s288_s22 }
   0x8   : > { %s5969_s23 = smov 128   ;;  %s5970_s24 = smov 8  }
   0x9   : > { %p5857_p5 = pnand %p6034_p2, %p5856_p4  ;;  %s5971_s25 = smov 64  }
   0xa   : > { %s5972_s26 = smov 4   ;;  %317 = sbr.rel (%p6038_p3) target bundleno = 1126 (0x466), region = 56 }
   0xb   : > { %5859 = dma.hbm_to_vmem [thread:$0]  (!%p5857_p5), %s270_s12, 8192, %s272_s17, [#allocation3], %s5969_s23, %s5969_s23, %s5970_s24  }
   0xc   : > { %5862 = dma.hbm_to_vmem [thread:$0]  (!%p5857_p5), %s287_s20, 2048, %s289_s22, [#allocation5], %s5971_s25, %s5971_s25, %s5972_s26  }
   0xf   : > { %5956 = dma.done.wait (%p6034_p2), [#allocation3], 8192  }
  0x10   : > { %5958 = vsyncadd (%p6034_p2), [#allocation3], 4294959104 }
  0x11   : > { %5960 = dma.done.wait (%p6034_p2), [#allocation5], 2048  }
  0x12   : > { %5962 = vsyncadd (%p6034_p2), [#allocation5], 4294965248  ;;  %s6059_s27 = sshll.u32 %s3773_s13, 1  ;;  %v3928_v0 = vld [vmem:[%s8156_s1 + $0xe0] sm:$0xf]  ;;  %vm1603_vm0 = vcmask 130048  }
  0x13   : > { %v5473_v1 = vld [vmem:[%s8156_s1 + $0xec] sm:$0xf0]  ;;  %v4056_v2 = vld [vmem:[%s8156_s1 + $0x1e0] sm:$0xf]  ;;  %p361_p6 = scmp.lt.s32.totalorder %s6059_s27, 7 }
  0x14   : > { %v3929_v3 = vor.u32 %v5473_v1, %v3928_v0  ;;  %v5505_v4 = vld [vmem:[%s8156_s1 + $0x1ec] sm:$0xf0]  ;;  %v4184_v5 = vld [vmem:[%s8156_s1 + $0x2e0] sm:$0xf] }
  0x15   : > { %v5537_v6 = vld [vmem:[%s8156_s1 + $0x2ec] sm:$0xf0]  ;;  %v4057_v7 = vor.u32 %v5505_v4, %v4056_v2  ;;  %v4312_v9 = vld [vmem:[%s8156_s1 + $0x3e0] sm:$0xf]  ;;  %s8168_s27 = smov (!%p361_p6, %s6059_s27), 7 }
  0x16   : > { %v4185_v8 = vor.u32 %v5537_v6, %v4184_v5  ;;  %v5569_v10 = vld [vmem:[%s8156_s1 + $0x3ec] sm:$0xf0]  ;;  %v3912_v11 = vld [vmem:[%s8156_s1 + $0xc0] sm:$0xf]  ;;  %1607 = vmatpush.bf16.msra.mxu0 %v3929_v3  ;;  %s5847_s11 = smul.u32 28, %s8168_s27 }
  0x17   : > { %v4313_v12 = vor.u32 %v5569_v10, %v4312_v9  ;;  %v5469_v13 = vld [vmem:[%s8156_s1 + $0xcc] sm:$0xf0]  ;;  %v4040_v14 = vld [vmem:[%s8156_s1 + $0x1c0] sm:$0xf]  ;;  %1621 = vmatpush.bf16.msra.mxu1 %v4057_v7 }
  0x18   : > { %v5501_v15 = vld [vmem:[%s8156_s1 + $0x1cc] sm:$0xf0]  ;;  %1635 = vmatpush.bf16.msra.mxu2 %v4185_v8  ;;  %v3913_v16 = vor.u32 %v5469_v13, %v3912_v11  ;;  %v4168_v18 = vld [vmem:[%s8156_s1 + $0x2c0] sm:$0xf]  ;;  %s6257_s22 = scalar_lea.vmem %s8155_s0, %s5847_s11 }
  0x19   : > { %v4041_v17 = vor.u32 %v5501_v15, %v4040_v14  ;;  %v5533_v19 = vld [vmem:[%s8156_s1 + $0x2cc] sm:$0xf0]  ;;  %v4296_v20 = vld [vmem:[%s8156_s1 + $0x3c0] sm:$0xf]  ;;  %1649 = vmatpush.bf16.msra.mxu3 %v4313_v12 }
  0x1a   : > { %v4169_v21 = vor.u32 %v5533_v19, %v4168_v18  ;;  %v5565_v22 = vld [vmem:[%s8156_s1 + $0x3cc] sm:$0xf0]  ;;  %v3896_v23 = vld [vmem:[%s8156_s1 + $0xa0] sm:$0xf]  ;;  %1608 = vmatpush.bf16.msra.mxu0 %v3913_v16 }
  0x1b   : > { %v5465_v24 = vld [vmem:[%s8156_s1 + $0xac] sm:$0xf0]  ;;  %v4297_v25 = vor.u32 %v5565_v22, %v4296_v20  ;;  %v4024_v26 = vld [vmem:[%s8156_s1 + $0x1a0] sm:$0xf]  ;;  %1622 = vmatpush.bf16.msra.mxu1 %v4041_v17 }
  0x1c   : > { %v5497_v27 = vld [vmem:[%s8156_s1 + $0x1ac] sm:$0xf0]  ;;  %v4152_v28 = vld [vmem:[%s8156_s1 + $0x2a0] sm:$0xf]  ;;  %v3897_v29 = vor.u32 %v5465_v24, %v3896_v23  ;;  %1636 = vmatpush.bf16.msra.mxu2 %v4169_v21 }
  0x1d   : > { %v5529_v30 = vld [vmem:[%s8156_s1 + $0x2ac] sm:$0xf0]  ;;  %v4280_v31 = vld [vmem:[%s8156_s1 + $0x3a0] sm:$0xf]  ;;  %v4025_v33 = vor.u32 %v5497_v27, %v4024_v26  ;;  %1650 = vmatpush.bf16.msra.mxu3 %v4297_v25 }
  0x1e   : > { %v5561_v32 = vld [vmem:[%s8156_s1 + $0x3ac] sm:$0xf0]  ;;  %v4153_v34 = vor.u32 %v5529_v30, %v4152_v28  ;;  %v3880_v35 = vld [vmem:[%s8156_s1 + $0x80] sm:$0xf]  ;;  %1609 = vmatpush.bf16.msra.mxu0 %v3897_v29 }
  0x1f   : > { %v5461_v36 = vld [vmem:[%s8156_s1 + $0x8c] sm:$0xf0]  ;;  %v4008_v37 = vld [vmem:[%s8156_s1 + $0x180] sm:$0xf]  ;;  %v4281_v38 = vor.u32 %v5561_v32, %v4280_v31  ;;  %1623 = vmatpush.bf16.msra.mxu1 %v4025_v33  ;;  %v5471_v32 = vld [vmem:[%s8156_s1 + $0xe4] sm:$0xf] }
  0x20   : > { %v5493_v39 = vld [vmem:[%s8156_s1 + $0x18c] sm:$0xf0]  ;;  %v4136_v40 = vld [vmem:[%s8156_s1 + $0x280] sm:$0xf]  ;;  %v3881_v44 = vor.u32 %v5461_v36, %v3880_v35  ;;  %1637 = vmatpush.bf16.msra.mxu2 %v4153_v34  ;;  %v3930_v33 = vld [vmem:[%s8156_s1 + $0xf0] sm:$0xf0] }
  0x21   : > { %v5525_v41 = vld [vmem:[%s8156_s1 + $0x28c] sm:$0xf0]  ;;  %v4264_v42 = vld [vmem:[%s8156_s1 + $0x380] sm:$0xf]  ;;  %v4009_v45 = vor.u32 %v5493_v39, %v4008_v37  ;;  %1651 = vmatpush.bf16.msra.mxu3 %v4281_v38  ;;  %v3796_v34 = vld [vmem:[%s6257_s22 + $0x8] sm:$0xf] }
  0x22   : > { %v5557_v43 = vld [vmem:[%s8156_s1 + $0x38c] sm:$0xf0]  ;;  %v4137_v46 = vor.u32 %v5525_v41, %v4136_v40  ;;  %v3864_v47 = vld [vmem:[%s8156_s1 + $0x60] sm:$0xf]  ;;  %1610 = vmatpush.bf16.msra.mxu0 %v3881_v44  ;;  %v5440_v36 = vld [vmem:[%s6257_s22 + $0x20] sm:$0xf0] }
  0x23   : > { %v5457_v48 = vld [vmem:[%s8156_s1 + $0x6c] sm:$0xf0]  ;;  %v3992_v49 = vld [vmem:[%s8156_s1 + $0x160] sm:$0xf]  ;;  %v4265_v50 = vor.u32 %v5557_v43, %v4264_v42  ;;  %1624 = vmatpush.bf16.msra.mxu1 %v4009_v45  ;;  %v5503_v41 = vld [vmem:[%s8156_s1 + $0x1e4] sm:$0xf] }
  0x24   : > { %v5489_v51 = vld [vmem:[%s8156_s1 + $0x16c] sm:$0xf0]  ;;  %v4120_v52 = vld [vmem:[%s8156_s1 + $0x260] sm:$0xf]  ;;  %v3865_v56 = vor.u32 %v5457_v48, %v3864_v47  ;;  %1638 = vmatpush.bf16.msra.mxu2 %v4137_v46  ;;  %v5439_v43 = vld [vmem:[%s6257_s22 + $0x18] sm:$0xf0] }
  0x25   : > { %v5521_v53 = vld [vmem:[%s8156_s1 + $0x26c] sm:$0xf0]  ;;  %v4248_v54 = vld [vmem:[%s8156_s1 + $0x360] sm:$0xf]  ;;  %v3993_v57 = vor.u32 %v5489_v51, %v3992_v49  ;;  %1652 = vmatpush.bf16.msra.mxu3 %v4265_v50  ;;  %v4058_v46 = vld [vmem:[%s8156_s1 + $0x1f0] sm:$0xf0]  ;;  %v3933_v50 = vor.u32 %v5471_v32, %v3930_v33 }
  0x26   : > { %v5553_v55 = vld [vmem:[%s8156_s1 + $0x36c] sm:$0xf0]  ;;  %v4121_v58 = vor.u32 %v5521_v53, %v4120_v52  ;;  %v3848_v59 = vld [vmem:[%s8156_s1 + $0x40] sm:$0xf]  ;;  %1611 = vmatpush.bf16.msra.mxu0 %v3865_v56  ;;  %v5437_v47 = vld [vmem:[%s6257_s22 + $0xc] sm:$0xf] }
  0x27   : > { %v5453_v60 = vld [vmem:[%s8156_s1 + $0x4c] sm:$0xf0]  ;;  %v3976_v61 = vld [vmem:[%s8156_s1 + $0x140] sm:$0xf]  ;;  %v4249_v62 = vor.u32 %v5553_v55, %v4248_v54  ;;  %1625 = vmatpush.bf16.msra.mxu1 %v3993_v57  ;;  %v3798_v48 = vld [vmem:[%s6257_s22 + $0x24] sm:$0xf0]  ;;  %v6310_v54 = vor.u32 %v5440_v36, %v3796_v34 }
  0x28   : > { %v5485_v63 = vld [vmem:[%s8156_s1 + $0x14c] sm:$0xf0]  ;;  %v4104_v0 = vld [vmem:[%s8156_s1 + $0x240] sm:$0xf]  ;;  %v3849_v4 = vor.u32 %v5453_v60, %v3848_v59  ;;  %1639 = vmatpush.bf16.msra.mxu2 %v4121_v58  ;;  %v5467_v57 = vld [vmem:[%s8156_s1 + $0xc4] sm:$0xf]  ;;  %v6323_v60 = vor.u32 %v5437_v47, %v3798_v48 }
  0x29   : > { %v5517_v1 = vld [vmem:[%s8156_s1 + $0x24c] sm:$0xf0]  ;;  %v4232_v2 = vld [vmem:[%s8156_s1 + $0x340] sm:$0xf]  ;;  %v3977_v6 = vor.u32 %v5485_v63, %v3976_v61  ;;  %1653 = vmatpush.bf16.msra.mxu3 %v4249_v62  ;;  %v3914_v58 = vld [vmem:[%s8156_s1 + $0xd0] sm:$0xf0]  ;;  %v4061_v63 = vor.u32 %v5503_v41, %v4058_v46 }
  0x2a   : > { %v5549_v3 = vld [vmem:[%s8156_s1 + $0x34c] sm:$0xf0]  ;;  %v3832_v5 = vld [vmem:[%s8156_s1 + $0x20] sm:$0xf]  ;;  %v4105_v7 = vor.u32 %v5517_v1, %v4104_v0  ;;  %1612 = vmatpush.bf16.msra.mxu0 %v3849_v4  ;;  %v5436_v61 = vld [vmem:[%s6257_s22 + $0x4] sm:$0xf]  ;;  %v3917_v4 = vor.u32 %v5467_v57, %v3914_v58 }
  0x2b   : > { %v5449_v8 = vld [vmem:[%s8156_s1 + $0x2c] sm:$0xf0]  ;;  %v3960_v9 = vld [vmem:[%s8156_s1 + $0x120] sm:$0xf]  ;;  %v4233_v11 = vor.u32 %v5549_v3, %v4232_v2  ;;  %1626 = vmatpush.bf16.msra.mxu1 %v3977_v6  ;;  %v5499_v1 = vld [vmem:[%s8156_s1 + $0x1c4] sm:$0xf] }
  0x2c   : > { %v5481_v10 = vld [vmem:[%s8156_s1 + $0x12c] sm:$0xf0]  ;;  %v4088_v12 = vld [vmem:[%s8156_s1 + $0x220] sm:$0xf]  ;;  %v3833_v18 = vor.u32 %v5449_v8, %v3832_v5  ;;  %1640 = vmatpush.bf16.msra.mxu2 %v4105_v7  ;;  %v4042_v2 = vld [vmem:[%s8156_s1 + $0x1d0] sm:$0xf0] }
  0x2d   : > { %v5513_v13 = vld [vmem:[%s8156_s1 + $0x22c] sm:$0xf0]  ;;  %v4216_v14 = vld [vmem:[%s8156_s1 + $0x320] sm:$0xf]  ;;  %v3961_v23 = vor.u32 %v5481_v10, %v3960_v9  ;;  %1654 = vmatpush.bf16.msra.mxu3 %v4233_v11  ;;  %v5463_v10 = vld [vmem:[%s8156_s1 + $0xa4] sm:$0xf] }
  0x2e   : > { %v5545_v15 = vld [vmem:[%s8156_s1 + $0x32c] sm:$0xf0]  ;;  %v3816_v16 = vld [vmem:[%s8156_s1] sm:$0xf]  ;;  %v4089_v24 = vor.u32 %v5513_v13, %v4088_v12  ;;  %1613 = vmatpush.bf16.msra.mxu0 %v3833_v18  ;;  %v3898_v11 = vld [vmem:[%s8156_s1 + $0xb0] sm:$0xf0]  ;;  %v4045_v12 = vor.u32 %v5499_v1, %v4042_v2 }
  0x2f   : > { %v5445_v17 = vld [vmem:[%s8156_s1 + $0xc] sm:$0xf0]  ;;  %v3944_v19 = vld [vmem:[%s8156_s1 + $0x100] sm:$0xf]  ;;  %v4217_v28 = vor.u32 %v5545_v15, %v4216_v14  ;;  %1627 = vmatpush.bf16.msra.mxu1 %v3961_v23  ;;  %v5495_v14 = vld [vmem:[%s8156_s1 + $0x1a4] sm:$0xf] }
  0x30   : > { %v5477_v20 = vld [vmem:[%s8156_s1 + $0x10c] sm:$0xf0]  ;;  %v4072_v21 = vld [vmem:[%s8156_s1 + $0x200] sm:$0xf]  ;;  %v3817_v35 = vor.u32 %v5445_v17, %v3816_v16  ;;  %1641 = vmatpush.bf16.msra.mxu2 %v4089_v24  ;;  %v4026_v15 = vld [vmem:[%s8156_s1 + $0x1b0] sm:$0xf0]  ;;  %v3901_v17 = vor.u32 %v5463_v10, %v3898_v11 }
  0x31   : > { %v5509_v22 = vld [vmem:[%s8156_s1 + $0x20c] sm:$0xf0]  ;;  %v4200_v25 = vld [vmem:[%s8156_s1 + $0x300] sm:$0xf]  ;;  %v3945_v39 = vor.u32 %v5477_v20, %v3944_v19  ;;  %1655 = vmatpush.bf16.msra.mxu3 %v4217_v28  ;;  %v3882_v23 = vld [vmem:[%s8156_s1 + $0x90] sm:$0xf0]  ;;  %v4029_v24 = vor.u32 %v5495_v14, %v4026_v15 }
  0x32   : > { %v5541_v26 = vld [vmem:[%s8156_s1 + $0x30c] sm:$0xf0]  ;;  %v4440_v27 = vld [vmem:[%s8156_s1 + $0x4e0] sm:$0xf]  ;;  %v4073_v40 = vor.u32 %v5509_v22, %v4072_v21  ;;  %1614 = vmatpush.bf16.msra.mxu0 %v3817_v35  ;;  %v5459_v22 = vld [vmem:[%s8156_s1 + $0x84] sm:$0xf] }
  0x33   : > { %v5601_v29 = vld [vmem:[%s8156_s1 + $0x4ec] sm:$0xf0]  ;;  %v4568_v30 = vld [vmem:[%s8156_s1 + $0x5e0] sm:$0xf]  ;;  %v4201_v44 = vor.u32 %v5541_v26, %v4200_v25  ;;  %1628 = vmatpush.bf16.msra.mxu1 %v3945_v39  ;;  %v5491_v26 = vld [vmem:[%s8156_s1 + $0x184] sm:$0xf] }
  0x34   : > { %v5633_v31 = vld [vmem:[%s8156_s1 + $0x5ec] sm:$0xf0]  ;;  %v4584_v37 = vld [vmem:[%s8156_s1 + $0x600] sm:$0xf]  ;;  %v4441_v45 = vor.u32 %v5601_v29, %v4440_v27  ;;  %1642 = vmatpush.bf16.msra.mxu2 %v4073_v40  ;;  %v4010_v27 = vld [vmem:[%s8156_s1 + $0x190] sm:$0xf0]  ;;  %v3885_v29 = vor.u32 %v5459_v22, %v3882_v23 }
  0x35   : > { %v5637_v38 = vld [vmem:[%s8156_s1 + $0x60c] sm:$0xf0]  ;;  %v3788_v42 = vld [vmem:[%s6257_s22] sm:$0xf]  ;;  %v4569_v49 = vor.u32 %v5633_v31, %v4568_v30  ;;  %1656 = vmatpush.bf16.msra.mxu3 %v4201_v44  ;;  %v5455_v34 = vld [vmem:[%s8156_s1 + $0x64] sm:$0xf] }
  0x36   : > { %v4424_v51 = vld [vmem:[%s8156_s1 + $0x4c0] sm:$0xf]  ;;  %v5597_v52 = vld [vmem:[%s8156_s1 + $0x4cc] sm:$0xf0]  ;;  %v6312_v55 = vor.u32 %v5439_v43, %v3788_v42  ;;  %v4585_v59 = vor.u32 %v5637_v38, %v4584_v37  ;;  %1663 = vmatpush.bf16.msrb.mxu0 %v4441_v45  ;;  %v3866_v35 = vld [vmem:[%s8156_s1 + $0x70] sm:$0xf0]  ;;  %v4013_v38 = vor.u32 %v5491_v26, %v4010_v27 }
  0x37   : > { %v4552_v53 = vld [vmem:[%s8156_s1 + $0x5c0] sm:$0xf]  ;;  %v5629_v56 = vld [vmem:[%s8156_s1 + $0x5cc] sm:$0xf0]  ;;  %v4425_v0 = vor.u32 %v5597_v52, %v4424_v51  ;;  %1677 = vmatpush.bf16.msrb.mxu1 %v4569_v49  ;;  %1643 = vmatmul.bf16.vlgmr.msra.gmra.mxu2 %v6310_v54  ;;  %v3812_v36 = vld [vmem:[%s6257_s22 + $0x18] sm:$0xf]  ;;  %v3869_v43 = vor.u32 %v5455_v34, %v3866_v35 }
  0x38   : > { %v3790_v62 = vld [vmem:[%s6257_s22 + $0x1c] sm:$0xf0]  ;;  %v4553_v3 = vor.u32 %v5629_v56, %v4552_v53  ;;  %v5593_v6 = vld [vmem:[%s8156_s1 + $0x4ac] sm:$0xf0]  ;;  %1615 = vmatmul.bf16.vlgmr.msra.gmra.mxu0 %v6312_v55  ;;  %1698 = vmatpush.bf16.msrb.mxu2 %v4585_v59  ;;  %v5442_v37 = vld [vmem:[%s6257_s22 + $0x30] sm:$0xf0] }
  0x39   : > { %1705 = vmatpush.bf16.msrb.mxu3 %v3933_v50  ;;  %v4408_v5 = vld [vmem:[%s8156_s1 + $0x4a0] sm:$0xf]  ;;  %v6344_v8 = vor.u32 %v5436_v61, %v3790_v62  ;;  %v5625_v9 = vld [vmem:[%s8156_s1 + $0x5ac] sm:$0xf0]  ;;  %v5487_v40 = vld [vmem:[%s8156_s1 + $0x164] sm:$0xf]  ;;  %v6431_v50 = vor.u32 %v5442_v37, %v3812_v36 }
  0x3a   : > { %v4536_v7 = vld [vmem:[%s8156_s1 + $0x5a0] sm:$0xf]  ;;  %1657 = vmatmul.bf16.vlgmr.msra.gmra.mxu3 %v6323_v60  ;;  %1664 = vmatpush.bf16.msrb.mxu0 %v4425_v0  ;;  %v4409_v13 = vor.u32 %v5593_v6, %v4408_v5  ;;  %v5589_v19 = vld [vmem:[%s8156_s1 + $0x48c] sm:$0xf0]  ;;  %v3994_v41 = vld [vmem:[%s8156_s1 + $0x170] sm:$0xf0] }
  0x3b   : > { %1678 = vmatpush.bf16.msrb.mxu1 %v4553_v3  ;;  %v4537_v16 = vor.u32 %v5625_v9, %v4536_v7  ;;  %v4392_v18 = vld [vmem:[%s8156_s1 + $0x480] sm:$0xf]  ;;  %v5621_v21 = vld [vmem:[%s8156_s1 + $0x58c] sm:$0xf0]  ;;  %v5451_v48 = vld [vmem:[%s8156_s1 + $0x44] sm:$0xf]  ;;  %v3997_v51 = vor.u32 %v5487_v40, %v3994_v41 }
  0x3c   : > { %1719 = vmatpush.bf16.msra.mxu2 %v4061_v63  ;;  %v4520_v20 = vld [vmem:[%s8156_s1 + $0x580] sm:$0xf]  ;;  %1629 = vmatmul.bf16.vlgmr.msra.gmra.mxu1 %v6344_v8  ;;  %v4393_v25 = vor.u32 %v5589_v19, %v4392_v18  ;;  %v5585_v31 = vld [vmem:[%s8156_s1 + $0x46c] sm:$0xf0]  ;;  %v3850_v49 = vld [vmem:[%s8156_s1 + $0x50] sm:$0xf0] }
  0x3d   : > { %1706 = vmatpush.bf16.msrb.mxu3 %v3917_v4  ;;  %v4521_v28 = vor.u32 %v5621_v21, %v4520_v20  ;;  %v4376_v30 = vld [vmem:[%s8156_s1 + $0x460] sm:$0xf]  ;;  %v5617_v33 = vld [vmem:[%s8156_s1 + $0x56c] sm:$0xf0]  ;;  %v5483_v53 = vld [vmem:[%s8156_s1 + $0x144] sm:$0xf]  ;;  %v3853_v58 = vor.u32 %v5451_v48, %v3850_v49 }
  0x3e   : > { %1665 = vmatpush.bf16.msrb.mxu0 %v4409_v13  ;;  %v4504_v32 = vld [vmem:[%s8156_s1 + $0x560] sm:$0xf]  ;;  %v4377_v39 = vor.u32 %v5585_v31, %v4376_v30  ;;  %v5581_v45 = vld [vmem:[%s8156_s1 + $0x44c] sm:$0xf0]  ;;  %v3978_v56 = vld [vmem:[%s8156_s1 + $0x150] sm:$0xf0] }
  0x3f   : > { %1679 = vmatpush.bf16.msrb.mxu1 %v4537_v16  ;;  %v4505_v42 = vor.u32 %v5617_v33, %v4504_v32  ;;  %v4360_v44 = vld [vmem:[%s8156_s1 + $0x440] sm:$0xf]  ;;  %v5613_v47 = vld [vmem:[%s8156_s1 + $0x54c] sm:$0xf0]  ;;  %v5447_v0 = vld [vmem:[%s8156_s1 + $0x24] sm:$0xf]  ;;  %v3981_v4 = vor.u32 %v5483_v53, %v3978_v56 }
  0x40   : > { %1720 = vmatpush.bf16.msra.mxu2 %v4045_v12  ;;  %v4488_v46 = vld [vmem:[%s8156_s1 + $0x540] sm:$0xf]  ;;  %v4361_v52 = vor.u32 %v5581_v45, %v4360_v44  ;;  %v5577_v61 = vld [vmem:[%s8156_s1 + $0x42c] sm:$0xf0]  ;;  %v3834_v1 = vld [vmem:[%s8156_s1 + $0x30] sm:$0xf0] }
  0x41   : > { %1707 = vmatpush.bf16.msrb.mxu3 %v3901_v17  ;;  %v4489_v57 = vor.u32 %v5613_v47, %v4488_v46  ;;  %v4344_v59 = vld [vmem:[%s8156_s1 + $0x420] sm:$0xf]  ;;  %v5609_v63 = vld [vmem:[%s8156_s1 + $0x52c] sm:$0xf0]  ;;  %v5479_v2 = vld [vmem:[%s8156_s1 + $0x124] sm:$0xf]  ;;  %v3837_v11 = vor.u32 %v5447_v0, %v3834_v1 }
  0x42   : > { %1666 = vmatpush.bf16.msrb.mxu0 %v4393_v25  ;;  %v4472_v62 = vld [vmem:[%s8156_s1 + $0x520] sm:$0xf]  ;;  %v3962_v3 = vld [vmem:[%s8156_s1 + $0x130] sm:$0xf0]  ;;  %v4345_v5 = vor.u32 %v5577_v61, %v4344_v59  ;;  %v5573_v7 = vld [vmem:[%s8156_s1 + $0x40c] sm:$0xf0] }
  0x43   : > { %1680 = vmatpush.bf16.msrb.mxu1 %v4521_v28  ;;  %v4328_v6 = vld [vmem:[%s8156_s1 + $0x400] sm:$0xf]  ;;  %v4473_v10 = vor.u32 %v5609_v63, %v4472_v62  ;;  %v5605_v12 = vld [vmem:[%s8156_s1 + $0x50c] sm:$0xf0]  ;;  %v5443_v13 = vld [vmem:[%s8156_s1 + $0x4] sm:$0xf]  ;;  %v3965_v21 = vor.u32 %v5479_v2, %v3962_v3 }
  0x44   : > { %1721 = vmatpush.bf16.msra.mxu2 %v4029_v24  ;;  %v4456_v9 = vld [vmem:[%s8156_s1 + $0x500] sm:$0xf]  ;;  %v3818_v14 = vld [vmem:[%s8156_s1 + $0x10] sm:$0xf0]  ;;  %v5535_v15 = vld [vmem:[%s8156_s1 + $0x2e4] sm:$0xf]  ;;  %v4329_v22 = vor.u32 %v5573_v7, %v4328_v6 }
  0x45   : > { %1708 = vmatpush.bf16.msrb.mxu3 %v3885_v29  ;;  %v4186_v16 = vld [vmem:[%s8156_s1 + $0x2f0] sm:$0xf0]  ;;  %v5567_v17 = vld [vmem:[%s8156_s1 + $0x3e4] sm:$0xf]  ;;  %v3804_v23 = vld [vmem:[%s6257_s22 + $0x10] sm:$0xf]  ;;  %v4457_v26 = vor.u32 %v5605_v12, %v4456_v9  ;;  %v3821_v27 = vor.u32 %v5443_v13, %v3818_v14 }
  0x46   : > { %1667 = vmatpush.bf16.msrb.mxu0 %v4377_v39  ;;  %v4314_v18 = vld [vmem:[%s8156_s1 + $0x3f0] sm:$0xf0]  ;;  %v5599_v19 = vld [vmem:[%s8156_s1 + $0x4e4] sm:$0xf]  ;;  %v5441_v24 = vld [vmem:[%s6257_s22 + $0x28] sm:$0xf0]  ;;  %v4189_v31 = vor.u32 %v5535_v15, %v4186_v16 }
  0x47   : > { %1681 = vmatpush.bf16.msrb.mxu1 %v4505_v42  ;;  %4598 = vmatmul.msk.bf16.vlgmr.msrb.gmra.mxu2 %vm1603_vm0, %v6431_v50  ;;  %v4442_v20 = vld [vmem:[%s8156_s1 + $0x4f0] sm:$0xf0]  ;;  %v5475_v25 = vld [vmem:[%s8156_s1 + $0x104] sm:$0xf]  ;;  %v3806_v30 = vld [vmem:[%s6257_s22 + $0x2c] sm:$0xf0]  ;;  %v4317_v32 = vor.u32 %v5567_v17, %v4314_v18  ;;  %v6520_v37 = vor.u32 %v5441_v24, %v3804_v23 }
  0x48   : > { %1722 = vmatpush.bf16.msra.mxu2 %v4013_v38  ;;  %v3946_v28 = vld [vmem:[%s8156_s1 + $0x110] sm:$0xf0]  ;;  %v5631_v33 = vld [vmem:[%s8156_s1 + $0x5e4] sm:$0xf]  ;;  %v4445_v36 = vor.u32 %v5599_v19, %v4442_v20 }
  0x49   : > { %1709 = vmatpush.bf16.msrb.mxu3 %v3869_v43  ;;  %v5438_v29 = vld [vmem:[%s6257_s22 + $0x14] sm:$0xf]  ;;  %v5531_v35 = vld [vmem:[%s8156_s1 + $0x2c4] sm:$0xf]  ;;  %v3949_v41 = vor.u32 %v5475_v25, %v3946_v28  ;;  %s3785_s22 = sshll.u32 %s8168_s27, 3 }
  0x4a   : > { %1668 = vmatpush.bf16.msrb.mxu0 %v4361_v52  ;;  %v4570_v34 = vld [vmem:[%s8156_s1 + $0x5f0] sm:$0xf0]  ;;  %v5563_v39 = vld [vmem:[%s8156_s1 + $0x3c4] sm:$0xf]  ;;  %v6531_v42 = vor.u32 %v5438_v29, %v3806_v30  ;;  %s371_s18 = scalar_lea.vmem %s8164_s9, %s3785_s22 }
  0x4b   : > { %1682 = vmatpush.bf16.msrb.mxu1 %v4489_v57  ;;  %v4170_v38 = vld [vmem:[%s8156_s1 + $0x2d0] sm:$0xf0]  ;;  %v5595_v43 = vld [vmem:[%s8156_s1 + $0x4c4] sm:$0xf]  ;;  %v4573_v45 = vor.u32 %v5631_v33, %v4570_v34 }
  0x4c   : > { %1723 = vmatpush.bf16.msra.mxu2 %v3997_v51  ;;  %v4298_v40 = vld [vmem:[%s8156_s1 + $0x3d0] sm:$0xf0]  ;;  %v4173_v46 = vor.u32 %v5531_v35, %v4170_v38  ;;  %v5627_v48 = vld [vmem:[%s8156_s1 + $0x5c4] sm:$0xf] }
  0x4d   : > { %1710 = vmatpush.bf16.msrb.mxu3 %v3853_v58  ;;  %v4426_v44 = vld [vmem:[%s8156_s1 + $0x4d0] sm:$0xf0]  ;;  %v4301_v47 = vor.u32 %v5563_v39, %v4298_v40  ;;  %v5527_v51 = vld [vmem:[%s8156_s1 + $0x2a4] sm:$0xf] }
  0x4e   : > { %1669 = vmatpush.bf16.msrb.mxu0 %v4345_v5  ;;  %v4554_v49 = vld [vmem:[%s8156_s1 + $0x5d0] sm:$0xf0]  ;;  %v4429_v52 = vor.u32 %v5595_v43, %v4426_v44  ;;  %v5559_v56 = vld [vmem:[%s8156_s1 + $0x3a4] sm:$0xf] }
  0x4f   : > { %1683 = vmatpush.bf16.msrb.mxu1 %v4473_v10  ;;  %v4154_v53 = vld [vmem:[%s8156_s1 + $0x2b0] sm:$0xf0]  ;;  %v5591_v58 = vld [vmem:[%s8156_s1 + $0x4a4] sm:$0xf]  ;;  %v4557_v61 = vor.u32 %v5627_v48, %v4554_v49 }
  0x50   : > { %1724 = vmatpush.bf16.msra.mxu2 %v3981_v4  ;;  %v4282_v57 = vld [vmem:[%s8156_s1 + $0x3b0] sm:$0xf0]  ;;  %v4157_v62 = vor.u32 %v5527_v51, %v4154_v53  ;;  %v5623_v0 = vld [vmem:[%s8156_s1 + $0x5a4] sm:$0xf] }
  0x51   : > { %1711 = vmatpush.bf16.msrb.mxu3 %v3837_v11  ;;  %v4410_v59 = vld [vmem:[%s8156_s1 + $0x4b0] sm:$0xf0]  ;;  %v4285_v63 = vor.u32 %v5559_v56, %v4282_v57  ;;  %v5523_v2 = vld [vmem:[%s8156_s1 + $0x284] sm:$0xf] }
  0x52   : > { %1670 = vmatpush.bf16.msrb.mxu0 %v4329_v22  ;;  %v4538_v1 = vld [vmem:[%s8156_s1 + $0x5b0] sm:$0xf0]  ;;  %v4413_v3 = vor.u32 %v5591_v58, %v4410_v59  ;;  %v5555_v5 = vld [vmem:[%s8156_s1 + $0x384] sm:$0xf] }
  0x53   : > { %1684 = vmatpush.bf16.msrb.mxu1 %v4457_v26  ;;  %v4138_v4 = vld [vmem:[%s8156_s1 + $0x290] sm:$0xf0]  ;;  %v5587_v7 = vld [vmem:[%s8156_s1 + $0x484] sm:$0xf]  ;;  %v4541_v10 = vor.u32 %v5623_v0, %v4538_v1  ;;  %v3936_v0 = vld [vmem:[%s8156_s1 + $0xe8] sm:$0xf] }
  0x54   : > { %1725 = vmatpush.bf16.msra.mxu2 %v3965_v21  ;;  %v4266_v6 = vld [vmem:[%s8156_s1 + $0x390] sm:$0xf0]  ;;  %v4141_v11 = vor.u32 %v5523_v2, %v4138_v4  ;;  %v5619_v13 = vld [vmem:[%s8156_s1 + $0x584] sm:$0xf]  ;;  %v5474_v1 = vld [vmem:[%s8156_s1 + $0xf4] sm:$0xf0] }
  0x55   : > { %1712 = vmatpush.bf16.msrb.mxu3 %v3821_v27  ;;  %1671 = vmatmul.bf16.vlgmr.msrb.gmra.mxu0 %v6520_v37  ;;  %v4394_v9 = vld [vmem:[%s8156_s1 + $0x490] sm:$0xf0]  ;;  %v4269_v12 = vor.u32 %v5555_v5, %v4266_v6  ;;  %v5519_v15 = vld [vmem:[%s8156_s1 + $0x264] sm:$0xf]  ;;  %v4064_v2 = vld [vmem:[%s8156_s1 + $0x1e8] sm:$0xf] }
  0x56   : > { %1733 = vmatpush.bf16.msra.mxu0 %v4189_v31  ;;  %1685 = vmatmul.bf16.vlgmr.msrb.gmra.mxu1 %v6531_v42  ;;  %v4522_v14 = vld [vmem:[%s8156_s1 + $0x590] sm:$0xf0]  ;;  %v4397_v16 = vor.u32 %v5587_v7, %v4394_v9  ;;  %v5551_v18 = vld [vmem:[%s8156_s1 + $0x364] sm:$0xf]  ;;  %v5506_v4 = vld [vmem:[%s8156_s1 + $0x1f4] sm:$0xf0] }
  0x57   : > { %1747 = vmatpush.bf16.msra.mxu1 %v4317_v32  ;;  %v4122_v17 = vld [vmem:[%s8156_s1 + $0x270] sm:$0xf0]  ;;  %v5583_v20 = vld [vmem:[%s8156_s1 + $0x464] sm:$0xf]  ;;  %v4525_v22 = vor.u32 %v5619_v13, %v4522_v14  ;;  %v3937_v13 = vor.u32 %v5474_v1, %v3936_v0  ;;  %v4320_v14 = vld [vmem:[%s8156_s1 + $0x3e8] sm:$0xf] }
  0x58   : > { %1726 = vmatpush.bf16.msra.mxu2 %v3949_v41  ;;  %1713 = vmatmul.bf16.vlgmr.msrb.gmra.mxu3 %v6312_v55  ;;  %v4250_v19 = vld [vmem:[%s8156_s1 + $0x370] sm:$0xf0]  ;;  %v4125_v23 = vor.u32 %v5519_v15, %v4122_v17  ;;  %v5615_v25 = vld [vmem:[%s8156_s1 + $0x564] sm:$0xf]  ;;  %v5570_v15 = vld [vmem:[%s8156_s1 + $0x3f4] sm:$0xf0]  ;;  %v4065_v17 = vor.u32 %v5506_v4, %v4064_v2 }
  0x59   : > { %1761 = vmatpush.bf16.msra.mxu3 %v4445_v36  ;;  %v4378_v21 = vld [vmem:[%s8156_s1 + $0x470] sm:$0xf0]  ;;  %v4253_v24 = vor.u32 %v5551_v18, %v4250_v19  ;;  %v5515_v27 = vld [vmem:[%s8156_s1 + $0x244] sm:$0xf]  ;;  %v5470_v18 = vld [vmem:[%s8156_s1 + $0xd4] sm:$0xf0] }
  0x5a   : > { %1734 = vmatpush.bf16.msra.mxu0 %v4173_v46  ;;  %v4506_v26 = vld [vmem:[%s8156_s1 + $0x570] sm:$0xf0]  ;;  %v4381_v28 = vor.u32 %v5583_v20, %v4378_v21  ;;  %v5547_v30 = vld [vmem:[%s8156_s1 + $0x344] sm:$0xf]  ;;  %v4192_v20 = vld [vmem:[%s8156_s1 + $0x2e8] sm:$0xf] }
  0x5b   : > { %1748 = vmatpush.bf16.msra.mxu1 %v4301_v47  ;;  %1727 = vmatmul.bf16.vlgmr.msra.gmra.mxu2 %v6344_v8  ;;  %v4106_v29 = vld [vmem:[%s8156_s1 + $0x250] sm:$0xf0]  ;;  %v5579_v32 = vld [vmem:[%s8156_s1 + $0x444] sm:$0xf]  ;;  %v4509_v34 = vor.u32 %v5615_v25, %v4506_v26  ;;  %v5538_v21 = vld [vmem:[%s8156_s1 + $0x2f4] sm:$0xf0]  ;;  %v4321_v25 = vor.u32 %v5570_v15, %v4320_v14 }
  0x5c   : > { %1775 = vmatpush.bf16.msrb.mxu2 %v4573_v45  ;;  %v4234_v31 = vld [vmem:[%s8156_s1 + $0x350] sm:$0xf0]  ;;  %v4109_v35 = vor.u32 %v5515_v27, %v4106_v29  ;;  %v5611_v38 = vld [vmem:[%s8156_s1 + $0x544] sm:$0xf]  ;;  %v4304_v27 = vld [vmem:[%s8156_s1 + $0x3c8] sm:$0xf] }
  0x5d   : > { %1762 = vmatpush.bf16.msra.mxu3 %v4429_v52  ;;  %v4362_v33 = vld [vmem:[%s8156_s1 + $0x450] sm:$0xf0]  ;;  %v4237_v36 = vor.u32 %v5547_v30, %v4234_v31  ;;  %v5511_v40 = vld [vmem:[%s8156_s1 + $0x224] sm:$0xf]  ;;  %v3904_v29 = vld [vmem:[%s8156_s1 + $0xa8] sm:$0xf]  ;;  %v4193_v30 = vor.u32 %v5538_v21, %v4192_v20 }
  0x5e   : > { %1735 = vmatpush.bf16.msra.mxu0 %v4157_v62  ;;  %v4490_v39 = vld [vmem:[%s8156_s1 + $0x550] sm:$0xf0]  ;;  %v4365_v41 = vor.u32 %v5579_v32, %v4362_v33  ;;  %v5543_v44 = vld [vmem:[%s8156_s1 + $0x324] sm:$0xf]  ;;  %v5466_v32 = vld [vmem:[%s8156_s1 + $0xb4] sm:$0xf0] }
  0x5f   : > { %1749 = vmatpush.bf16.msra.mxu1 %v4285_v63  ;;  %v4090_v43 = vld [vmem:[%s8156_s1 + $0x230] sm:$0xf0]  ;;  %v5575_v46 = vld [vmem:[%s8156_s1 + $0x424] sm:$0xf]  ;;  %v4493_v48 = vor.u32 %v5611_v38, %v4490_v39  ;;  %v4176_v33 = vld [vmem:[%s8156_s1 + $0x2c8] sm:$0xf] }
  0x60   : > { %1776 = vmatpush.bf16.msrb.mxu2 %v4557_v61  ;;  %v4218_v45 = vld [vmem:[%s8156_s1 + $0x330] sm:$0xf0]  ;;  %v5607_v49 = vld [vmem:[%s8156_s1 + $0x524] sm:$0xf]  ;;  %v4093_v52 = vor.u32 %v5511_v40, %v4090_v43  ;;  %v4288_v39 = vld [vmem:[%s8156_s1 + $0x3a8] sm:$0xf]  ;;  %v3905_v40 = vor.u32 %v5466_v32, %v3904_v29 }
  0x61   : > { %1763 = vmatpush.bf16.msra.mxu3 %v4413_v3  ;;  %v4346_v47 = vld [vmem:[%s8156_s1 + $0x430] sm:$0xf0]  ;;  %v4221_v53 = vor.u32 %v5543_v44, %v4218_v45  ;;  %v5507_v56 = vld [vmem:[%s8156_s1 + $0x204] sm:$0xf]  ;;  %v3888_v43 = vld [vmem:[%s8156_s1 + $0x88] sm:$0xf] }
  0x62   : > { %1736 = vmatpush.bf16.msra.mxu0 %v4141_v11  ;;  %v4474_v51 = vld [vmem:[%s8156_s1 + $0x530] sm:$0xf0]  ;;  %v5539_v58 = vld [vmem:[%s8156_s1 + $0x304] sm:$0xf]  ;;  %v4349_v59 = vor.u32 %v5575_v46, %v4346_v47  ;;  %v5462_v44 = vld [vmem:[%s8156_s1 + $0x94] sm:$0xf0] }
  0x63   : > { %1750 = vmatpush.bf16.msra.mxu1 %v4269_v12  ;;  %v4074_v57 = vld [vmem:[%s8156_s1 + $0x210] sm:$0xf0]  ;;  %v5571_v62 = vld [vmem:[%s8156_s1 + $0x404] sm:$0xf]  ;;  %v4477_v3 = vor.u32 %v5607_v49, %v4474_v51  ;;  %v4160_v47 = vld [vmem:[%s8156_s1 + $0x2a8] sm:$0xf] }
  0x64   : > { %1777 = vmatpush.bf16.msrb.mxu2 %v4541_v10  ;;  %v4202_v61 = vld [vmem:[%s8156_s1 + $0x310] sm:$0xf0]  ;;  %v5635_v5 = vld [vmem:[%s8156_s1 + $0x604] sm:$0xf]  ;;  %v4077_v7 = vor.u32 %v5507_v56, %v4074_v57  ;;  %v4016_v49 = vld [vmem:[%s8156_s1 + $0x188] sm:$0xf] }
  0x65   : > { %1764 = vmatpush.bf16.msra.mxu3 %v4397_v16  ;;  %v4330_v63 = vld [vmem:[%s8156_s1 + $0x410] sm:$0xf0]  ;;  %v4205_v9 = vor.u32 %v5539_v58, %v4202_v61  ;;  %v5603_v10 = vld [vmem:[%s8156_s1 + $0x504] sm:$0xf]  ;;  %v3920_v16 = vld [vmem:[%s8156_s1 + $0xc8] sm:$0xf] }
  0x66   : > { %1737 = vmatpush.bf16.msra.mxu0 %v4125_v23  ;;  %v4586_v6 = vld [vmem:[%s8156_s1 + $0x610] sm:$0xf0]  ;;  %v4333_v12 = vor.u32 %v5571_v62, %v4330_v63  ;;  %v4048_v23 = vld [vmem:[%s8156_s1 + $0x1c8] sm:$0xf]  ;;  %v3921_v26 = vor.u32 %v5470_v18, %v3920_v16  ;;  %v5494_v51 = vld [vmem:[%s8156_s1 + $0x194] sm:$0xf0] }
  0x67   : > { %1751 = vmatpush.bf16.msra.mxu1 %v4253_v24  ;;  %v4458_v11 = vld [vmem:[%s8156_s1 + $0x510] sm:$0xf0]  ;;  %v4589_v19 = vor.u32 %v5635_v5, %v4586_v6  ;;  %v5502_v24 = vld [vmem:[%s8156_s1 + $0x1d4] sm:$0xf0]  ;;  %v4272_v56 = vld [vmem:[%s8156_s1 + $0x388] sm:$0xf]  ;;  %v4017_v61 = vor.u32 %v5494_v51, %v4016_v49 }
  0x68   : > { %1778 = vmatpush.bf16.msrb.mxu2 %v4525_v22  ;;  %v4461_v22 = vor.u32 %v5603_v10, %v4458_v11  ;;  %v4049_v31 = vor.u32 %v5502_v24, %v4048_v23  ;;  %v5558_v57 = vld [vmem:[%s8156_s1 + $0x394] sm:$0xf0]  ;;  %v3872_v58 = vld [vmem:[%s8156_s1 + $0x68] sm:$0xf] }
  0x69   : > { %1765 = vmatpush.bf16.msra.mxu3 %v4381_v28  ;;  %v5566_v28 = vld [vmem:[%s8156_s1 + $0x3d4] sm:$0xf0]  ;;  %v4144_v63 = vld [vmem:[%s8156_s1 + $0x288] sm:$0xf] }
  0x6a   : > { %1738 = vmatpush.bf16.msra.mxu0 %v4109_v35  ;;  %v4032_v35 = vld [vmem:[%s8156_s1 + $0x1a8] sm:$0xf]  ;;  %v4305_v38 = vor.u32 %v5566_v28, %v4304_v27  ;;  %v5458_v62 = vld [vmem:[%s8156_s1 + $0x74] sm:$0xf0] }
  0x6b   : > { %1752 = vmatpush.bf16.msra.mxu1 %v4237_v36  ;;  %v5498_v36 = vld [vmem:[%s8156_s1 + $0x1b4] sm:$0xf0]  ;;  %v4000_v1 = vld [vmem:[%s8156_s1 + $0x168] sm:$0xf]  ;;  %v3873_v4 = vor.u32 %v5458_v62, %v3872_v58 }
  0x6c   : > { %1779 = vmatpush.bf16.msrb.mxu2 %v4509_v34  ;;  %v5534_v34 = vld [vmem:[%s8156_s1 + $0x2d4] sm:$0xf0]  ;;  %v4033_v46 = vor.u32 %v5498_v36, %v4032_v35  ;;  %v4256_v5 = vld [vmem:[%s8156_s1 + $0x368] sm:$0xf] }
  0x6d   : > { %1766 = vmatpush.bf16.msra.mxu3 %v4365_v41  ;;  %v5562_v41 = vld [vmem:[%s8156_s1 + $0x3b4] sm:$0xf0]  ;;  %v4177_v45 = vor.u32 %v5534_v34, %v4176_v33  ;;  %v3984_v14 = vld [vmem:[%s8156_s1 + $0x148] sm:$0xf] }
  0x6e   : > { %1739 = vmatpush.bf16.msra.mxu0 %v4093_v52  ;;  %v4289_v52 = vor.u32 %v5562_v41, %v4288_v39  ;;  %v5526_v0 = vld [vmem:[%s8156_s1 + $0x294] sm:$0xf0]  ;;  %v4240_v18 = vld [vmem:[%s8156_s1 + $0x348] sm:$0xf] }
  0x6f   : > { %1753 = vmatpush.bf16.msra.mxu1 %v4221_v53  ;;  %v3889_v53 = vor.u32 %v5462_v44, %v3888_v43  ;;  %v5490_v2 = vld [vmem:[%s8156_s1 + $0x174] sm:$0xf0]  ;;  %v3840_v20 = vld [vmem:[%s8156_s1 + $0x28] sm:$0xf] }
  0x70   : > { %1780 = vmatpush.bf16.msrb.mxu2 %v4493_v48  ;;  %v5530_v48 = vld [vmem:[%s8156_s1 + $0x2b4] sm:$0xf0]  ;;  %v4001_v10 = vor.u32 %v5490_v2, %v4000_v1  ;;  %v4112_v24 = vld [vmem:[%s8156_s1 + $0x248] sm:$0xf] }
  0x71   : > { %1767 = vmatpush.bf16.msra.mxu3 %v4349_v59  ;;  %v4161_v59 = vor.u32 %v5530_v48, %v4160_v47  ;;  %v5554_v6 = vld [vmem:[%s8156_s1 + $0x374] sm:$0xf0]  ;;  %v4224_v29 = vld [vmem:[%s8156_s1 + $0x328] sm:$0xf] }
  0x72   : > { %1740 = vmatpush.bf16.msra.mxu0 %v4077_v7  ;;  %v3856_v7 = vld [vmem:[%s8156_s1 + $0x48] sm:$0xf]  ;;  %v5454_v11 = vld [vmem:[%s8156_s1 + $0x54] sm:$0xf0]  ;;  %v4257_v16 = vor.u32 %v5554_v6, %v4256_v5 }
  0x73   : > { %1754 = vmatpush.bf16.msra.mxu1 %v4205_v9  ;;  %v4145_v9 = vor.u32 %v5526_v0, %v4144_v63  ;;  %v5486_v15 = vld [vmem:[%s8156_s1 + $0x154] sm:$0xf0]  ;;  %v3824_v32 = vld [vmem:[%s8156_s1 + $0x8] sm:$0xf] }
  0x74   : > { %1781 = vmatpush.bf16.msrb.mxu2 %v4477_v3  ;;  %v4273_v3 = vor.u32 %v5558_v57, %v4272_v56  ;;  %v5450_v23 = vld [vmem:[%s8156_s1 + $0x34] sm:$0xf0]  ;;  %v3952_v36 = vld [vmem:[%s8156_s1 + $0x108] sm:$0xf]  ;;  %v3938_v57 = vld [vmem:[%s8156_s1 + $0xf8] sm:$0xf0] }
  0x75   : > { %1768 = vmatpush.bf16.msra.mxu3 %v4333_v12  ;;  %1741 = vmatmul.bf16.vlgmr.msra.gmra.mxu0 %v6310_v54  ;;  %v4128_v12 = vld [vmem:[%s8156_s1 + $0x268] sm:$0xf]  ;;  %v5482_v27 = vld [vmem:[%s8156_s1 + $0x134] sm:$0xf0] }
  0x76   : > { %1796 = vmatpush.bf16.msrb.mxu0 %v4589_v19  ;;  %1755 = vmatmul.bf16.vlgmr.msra.gmra.mxu1 %v6323_v60  ;;  %v5550_v19 = vld [vmem:[%s8156_s1 + $0x354] sm:$0xf0]  ;;  %v4448_v41 = vld [vmem:[%s8156_s1 + $0x4e8] sm:$0xf] }
  0x77   : > { %1803 = vmatpush.bf16.msrb.mxu1 %v3937_v13  ;;  %v5522_v13 = vld [vmem:[%s8156_s1 + $0x274] sm:$0xf0]  ;;  %v4241_v28 = vor.u32 %v5550_v19, %v4240_v18  ;;  %v4208_v48 = vld [vmem:[%s8156_s1 + $0x308] sm:$0xf] }
  0x78   : > { %1782 = vmatpush.bf16.msrb.mxu2 %v4461_v22  ;;  %1769 = vmatmul.bf16.vlgmr.msra.gmra.mxu3 %v6520_v37  ;;  %v4129_v21 = vor.u32 %v5522_v13, %v4128_v12  ;;  %v3985_v22 = vor.u32 %v5486_v15, %v3984_v14  ;;  %v5446_v33 = vld [vmem:[%s8156_s1 + $0x14] sm:$0xf0]  ;;  %v4432_v58 = vld [vmem:[%s8156_s1 + $0x4c8] sm:$0xf]  ;;  %v5504_v15 = vld [vmem:[%s8156_s1 + $0x1ec] sm:$0xf] }
  0x79   : > { %1817 = vmatpush.bf16.msrb.mxu3 %v4065_v17  ;;  %v3857_v17 = vor.u32 %v5454_v11, %v3856_v7  ;;  %v5514_v39 = vld [vmem:[%s8156_s1 + $0x234] sm:$0xf0]  ;;  %v3825_v47 = vor.u32 %v5446_v33, %v3824_v32  ;;  %v4560_v62 = vld [vmem:[%s8156_s1 + $0x5c8] sm:$0xf]  ;;  %v5460_v33 = vld [vmem:[%s8156_s1 + $0x8c] sm:$0xf] }
  0x7a   : > { %1831 = vmatpush.bf16.msra.mxu0 %v4193_v30  ;;  %v3841_v30 = vor.u32 %v5450_v23, %v3840_v20  ;;  %v5602_v43 = vld [vmem:[%s8156_s1 + $0x4f4] sm:$0xf0]  ;;  %v4080_v63 = vld [vmem:[%s8156_s1 + $0x208] sm:$0xf] }
  0x7b   : > { %1804 = vmatpush.bf16.msrb.mxu1 %v3921_v26  ;;  %1783 = vmatmul.bf16.vlgmr.msrb.gmra.mxu2 %v6531_v42  ;;  %v3968_v26 = vld [vmem:[%s8156_s1 + $0x128] sm:$0xf]  ;;  %v5542_v49 = vld [vmem:[%s8156_s1 + $0x314] sm:$0xf0]  ;;  %v4449_v56 = vor.u32 %v5602_v43, %v4448_v41  ;;  %v4034_v41 = vld [vmem:[%s8156_s1 + $0x1b8] sm:$0xf0] }
  0x7c   : > { %1845 = vmatpush.bf16.msra.mxu2 %v4321_v25  ;;  %v5518_v25 = vld [vmem:[%s8156_s1 + $0x254] sm:$0xf0]  ;;  %v3969_v35 = vor.u32 %v5482_v27, %v3968_v26  ;;  %v4209_v1 = vor.u32 %v5542_v49, %v4208_v48  ;;  %v4416_v11 = vld [vmem:[%s8156_s1 + $0x4a8] sm:$0xf]  ;;  %v5500_v27 = vld [vmem:[%s8156_s1 + $0x1cc] sm:$0xf] }
  0x7d   : > { %1818 = vmatpush.bf16.msrb.mxu3 %v4049_v31  ;;  %v5546_v31 = vld [vmem:[%s8156_s1 + $0x334] sm:$0xf0]  ;;  %v4113_v34 = vor.u32 %v5518_v25, %v4112_v24  ;;  %v4400_v24 = vld [vmem:[%s8156_s1 + $0x488] sm:$0xf]  ;;  %v3874_v48 = vld [vmem:[%s8156_s1 + $0x78] sm:$0xf0] }
  0x7e   : > { %1832 = vmatpush.bf16.msra.mxu0 %v4177_v45  ;;  %v4225_v44 = vor.u32 %v5546_v31, %v4224_v29  ;;  %v4576_v45 = vld [vmem:[%s8156_s1 + $0x5e8] sm:$0xf]  ;;  %v5510_v0 = vld [vmem:[%s8156_s1 + $0x214] sm:$0xf0] }
  0x7f   : > { %1805 = vmatpush.bf16.msrb.mxu1 %v3905_v40  ;;  %v5478_v40 = vld [vmem:[%s8156_s1 + $0x114] sm:$0xf0]  ;;  %v4081_v7 = vor.u32 %v5510_v0, %v4080_v63  ;;  %v4528_v29 = vld [vmem:[%s8156_s1 + $0x588] sm:$0xf]  ;;  %v5452_v63 = vld [vmem:[%s8156_s1 + $0x4c] sm:$0xf] }
  0x80   : > { %1846 = vmatpush.bf16.msra.mxu2 %v4305_v38  ;;  %v4096_v38 = vld [vmem:[%s8156_s1 + $0x228] sm:$0xf]  ;;  %v5630_v2 = vld [vmem:[%s8156_s1 + $0x5d4] sm:$0xf0]  ;;  %v3858_v0 = vld [vmem:[%s8156_s1 + $0x58] sm:$0xf0] }
  0x81   : > { %1819 = vmatpush.bf16.msrb.mxu3 %v4033_v46  ;;  %v5634_v46 = vld [vmem:[%s8156_s1 + $0x5f4] sm:$0xf0]  ;;  %v4097_v51 = vor.u32 %v5514_v39, %v4096_v38  ;;  %v4561_v12 = vor.u32 %v5630_v2, %v4560_v62  ;;  %v4512_v43 = vld [vmem:[%s8156_s1 + $0x568] sm:$0xf] }
  0x82   : > { %1833 = vmatpush.bf16.msra.mxu0 %v4161_v59  ;;  %v5598_v59 = vld [vmem:[%s8156_s1 + $0x4d4] sm:$0xf0]  ;;  %v4352_v2 = vld [vmem:[%s8156_s1 + $0x428] sm:$0xf] }
  0x83   : > { %1806 = vmatpush.bf16.msrb.mxu1 %v3889_v53  ;;  %v3953_v53 = vor.u32 %v5478_v40, %v3952_v36  ;;  %v4433_v6 = vor.u32 %v5598_v59, %v4432_v58  ;;  %v5594_v13 = vld [vmem:[%s8156_s1 + $0x4b4] sm:$0xf0]  ;;  %v4384_v36 = vld [vmem:[%s8156_s1 + $0x468] sm:$0xf]  ;;  %v5496_v40 = vld [vmem:[%s8156_s1 + $0x1ac] sm:$0xf] }
  0x84   : > { %1847 = vmatpush.bf16.msra.mxu2 %v4289_v52  ;;  %v5472_v52 = vld [vmem:[%s8156_s1 + $0xec] sm:$0xf]  ;;  %v5626_v18 = vld [vmem:[%s8156_s1 + $0x5b4] sm:$0xf0]  ;;  %v4417_v20 = vor.u32 %v5594_v13, %v4416_v11  ;;  %v4037_v49 = vor.u32 %v5496_v40, %v4034_v41  ;;  %v4496_v58 = vld [vmem:[%s8156_s1 + $0x548] sm:$0xf] }
  0x85   : > { %1820 = vmatpush.bf16.msrb.mxu3 %v4017_v61  ;;  %4599 = vmatmul.msk.bf16.vlgmr.msrb.gmra.mxu0 %vm1603_vm0, %v6431_v50  ;;  %v4577_v61 = vor.u32 %v5634_v46, %v4576_v45  ;;  %v3941_v5 = vor.u32 %v5472_v52, %v3938_v57  ;;  %v5590_v26 = vld [vmem:[%s8156_s1 + $0x494] sm:$0xf0]  ;;  %v4018_v57 = vld [vmem:[%s8156_s1 + $0x198] sm:$0xf0]  ;;  %v5448_v11 = vld [vmem:[%s8156_s1 + $0x2c] sm:$0xf] }
  0x86   : > { %1834 = vmatpush.bf16.msra.mxu0 %v4145_v9  ;;  %v5468_v9 = vld [vmem:[%s8156_s1 + $0xcc] sm:$0xf]  ;;  %v4401_v32 = vor.u32 %v5590_v26, %v4400_v24  ;;  %v5586_v39 = vld [vmem:[%s8156_s1 + $0x474] sm:$0xf0]  ;;  %v3842_v13 = vld [vmem:[%s8156_s1 + $0x38] sm:$0xf0] }
  0x87   : > { %1807 = vmatpush.bf16.msrb.mxu1 %v3873_v4  ;;  %v5638_v4 = vld [vmem:[%s8156_s1 + $0x614] sm:$0xf0]  ;;  %v4385_v46 = vor.u32 %v5586_v39, %v4384_v36  ;;  %v3845_v24 = vor.u32 %v5448_v11, %v3842_v13  ;;  %v4322_v26 = vld [vmem:[%s8156_s1 + $0x3f8] sm:$0xf0]  ;;  %v5480_v39 = vld [vmem:[%s8156_s1 + $0x12c] sm:$0xf] }
  0x88   : > { %1848 = vmatpush.bf16.msra.mxu2 %v4273_v3  ;;  %v4592_v3 = vld [vmem:[%s8156_s1 + $0x608] sm:$0xf]  ;;  %v5614_v59 = vld [vmem:[%s8156_s1 + $0x554] sm:$0xf0]  ;;  %v3970_v40 = vld [vmem:[%s8156_s1 + $0x138] sm:$0xf0] }
  0x89   : > { %1821 = vmatpush.bf16.msrb.mxu3 %v4001_v10  ;;  %v3922_v10 = vld [vmem:[%s8156_s1 + $0xd8] sm:$0xf0]  ;;  %v4593_v14 = vor.u32 %v5638_v4, %v4592_v3  ;;  %v4497_v3 = vor.u32 %v5614_v59, %v4496_v58  ;;  %v5578_v4 = vld [vmem:[%s8156_s1 + $0x434] sm:$0xf0] }
  0x8a   : > { %1835 = vmatpush.bf16.msra.mxu0 %v4129_v21  ;;  %v3925_v19 = vor.u32 %v5468_v9, %v3922_v10  ;;  %v5464_v21 = vld [vmem:[%s8156_s1 + $0xac] sm:$0xf]  ;;  %v5610_v9 = vld [vmem:[%s8156_s1 + $0x534] sm:$0xf0]  ;;  %v3861_v10 = vor.u32 %v5452_v63, %v3858_v0  ;;  %v3954_v58 = vld [vmem:[%s8156_s1 + $0x118] sm:$0xf0] }
  0x8b   : > { %1808 = vmatpush.bf16.msrb.mxu1 %v3857_v17  ;;  %v4544_v17 = vld [vmem:[%s8156_s1 + $0x5a8] sm:$0xf]  ;;  %v4290_v59 = vld [vmem:[%s8156_s1 + $0x3b8] sm:$0xf0] }
  0x8c   : > { %1849 = vmatpush.bf16.msra.mxu2 %v4257_v16  ;;  %v4066_v16 = vld [vmem:[%s8156_s1 + $0x1f8] sm:$0xf0]  ;;  %v4545_v25 = vor.u32 %v5626_v18, %v4544_v17  ;;  %v4464_v18 = vld [vmem:[%s8156_s1 + $0x508] sm:$0xf] }
  0x8d   : > { %1822 = vmatpush.bf16.msrb.mxu3 %v3985_v22  ;;  %v3906_v22 = vld [vmem:[%s8156_s1 + $0xb8] sm:$0xf0]  ;;  %v4069_v23 = vor.u32 %v5504_v15, %v4066_v16  ;;  %v4336_v15 = vld [vmem:[%s8156_s1 + $0x408] sm:$0xf]  ;;  %v5574_v16 = vld [vmem:[%s8156_s1 + $0x414] sm:$0xf0] }
  0x8e   : > { %1836 = vmatpush.bf16.msra.mxu0 %v4113_v34  ;;  %v3909_v31 = vor.u32 %v5464_v21, %v3906_v22  ;;  %v3890_v34 = vld [vmem:[%s8156_s1 + $0x98] sm:$0xf0]  ;;  %v5606_v21 = vld [vmem:[%s8156_s1 + $0x514] sm:$0xf0]  ;;  %v5536_v22 = vld [vmem:[%s8156_s1 + $0x2ec] sm:$0xf] }
  0x8f   : > { %1809 = vmatpush.bf16.msrb.mxu1 %v3841_v30  ;;  %v5622_v30 = vld [vmem:[%s8156_s1 + $0x594] sm:$0xf0]  ;;  %v3893_v45 = vor.u32 %v5460_v33, %v3890_v34  ;;  %v5600_v33 = vld [vmem:[%s8156_s1 + $0x4ec] sm:$0xf]  ;;  %v4450_v34 = vld [vmem:[%s8156_s1 + $0x4f8] sm:$0xf0] }
  0x90   : > { %1850 = vmatpush.bf16.msra.mxu2 %v4241_v28  ;;  %v4050_v28 = vld [vmem:[%s8156_s1 + $0x1d8] sm:$0xf0]  ;;  %v4529_v38 = vor.u32 %v5622_v30, %v4528_v29 }
  0x91   : > { %1823 = vmatpush.bf16.msrb.mxu3 %v3969_v35  ;;  %v4053_v35 = vor.u32 %v5500_v27, %v4050_v28  ;;  %v4337_v27 = vor.u32 %v5574_v16, %v4336_v15  ;;  %v5444_v28 = vld [vmem:[%s8156_s1 + $0xc] sm:$0xf]  ;;  %v3826_v29 = vld [vmem:[%s8156_s1 + $0x18] sm:$0xf0] }
  0x92   : > { %1837 = vmatpush.bf16.msra.mxu0 %v4097_v51  ;;  %v4368_v51 = vld [vmem:[%s8156_s1 + $0x448] sm:$0xf]  ;;  %v3829_v41 = vor.u32 %v5444_v28, %v3826_v29  ;;  %v4562_v11 = vld [vmem:[%s8156_s1 + $0x5d8] sm:$0xf0] }
  0x93   : > { %1810 = vmatpush.bf16.msrb.mxu1 %v3825_v47  ;;  %v5456_v47 = vld [vmem:[%s8156_s1 + $0x6c] sm:$0xf]  ;;  %v4402_v15 = vld [vmem:[%s8156_s1 + $0x498] sm:$0xf0] }
  0x94   : > { %1851 = vmatpush.bf16.msra.mxu2 %v4225_v44  ;;  %v5618_v44 = vld [vmem:[%s8156_s1 + $0x574] sm:$0xf0] }
  0x95   : > { %1824 = vmatpush.bf16.msrb.mxu3 %v3953_v53  ;;  %v4513_v52 = vor.u32 %v5618_v44, %v4512_v43  ;;  %v5582_v53 = vld [vmem:[%s8156_s1 + $0x454] sm:$0xf0]  ;;  %v5564_v43 = vld [vmem:[%s8156_s1 + $0x3cc] sm:$0xf]  ;;  %v4306_v44 = vld [vmem:[%s8156_s1 + $0x3d8] sm:$0xf0] }
  0x96   : > { %1811 = vmatmul.bf16.vlgmr.msrb.gmra.mxu1 %v6312_v55  ;;  %1838 = vmatpush.bf16.msra.mxu0 %v4081_v7  ;;  %v4369_v62 = vor.u32 %v5582_v53, %v4368_v51  ;;  %v4480_v7 = vld [vmem:[%s8156_s1 + $0x528] sm:$0xf]  ;;  %v5528_v51 = vld [vmem:[%s8156_s1 + $0x2ac] sm:$0xf]  ;;  %v4309_v53 = vor.u32 %v5564_v43, %v4306_v44  ;;  %v4098_v44 = vld [vmem:[%s8156_s1 + $0x238] sm:$0xf0] }
  0x97   : > { %1859 = vmatpush.bf16.msra.mxu1 %v4449_v56  ;;  %v5492_v56 = vld [vmem:[%s8156_s1 + $0x18c] sm:$0xf]  ;;  %v4481_v17 = vor.u32 %v5610_v9, %v4480_v7  ;;  %v4146_v7 = vld [vmem:[%s8156_s1 + $0x298] sm:$0xf0] }
  0x98   : > { %1852 = vmatpush.bf16.msra.mxu2 %v4209_v1  ;;  %1825 = vmatmul.bf16.vlgmr.msrb.gmra.mxu3 %v6344_v8  ;;  %v4021_v1 = vor.u32 %v5492_v56, %v4018_v57  ;;  %v5560_v56 = vld [vmem:[%s8156_s1 + $0x3ac] sm:$0xf] }
  0x99   : > { %1873 = vmatpush.bf16.msra.mxu3 %v4577_v61  ;;  %1839 = vmatmul.bf16.vlgmr.msra.gmra.mxu0 %v6310_v54  ;;  %v3877_v61 = vor.u32 %v5456_v47, %v3874_v48  ;;  %v3973_v48 = vor.u32 %v5480_v39, %v3970_v40  ;;  %v5476_v57 = vld [vmem:[%s8156_s1 + $0x10c] sm:$0xf]  ;;  %v4370_v39 = vld [vmem:[%s8156_s1 + $0x458] sm:$0xf0] }
  0x9a   : > { %1894 = vmatpush.bf16.msrb.mxu0 %v4593_v14  ;;  %v5556_v9 = vld [vmem:[%s8156_s1 + $0x38c] sm:$0xf] }
  0x9b   : > { %1860 = vmatpush.bf16.msra.mxu1 %v4433_v6  ;;  %1853 = vmatmul.bf16.vlgmr.msra.gmra.mxu2 %v6323_v60  ;;  %v4002_v6 = vld [vmem:[%s8156_s1 + $0x178] sm:$0xf0]  ;;  %v5512_v43 = vld [vmem:[%s8156_s1 + $0x22c] sm:$0xf] }
  0x9c   : > { %1901 = vmatpush.bf16.msrb.mxu2 %v3941_v5  ;;  %v5488_v5 = vld [vmem:[%s8156_s1 + $0x16c] sm:$0xf] }
  0x9d   : > { %1874 = vmatpush.bf16.msra.mxu3 %v4561_v12  ;;  %v4353_v12 = vor.u32 %v5578_v4, %v4352_v2  ;;  %v4005_v14 = vor.u32 %v5488_v5, %v4002_v6  ;;  %v5592_v2 = vld [vmem:[%s8156_s1 + $0x4ac] sm:$0xf]  ;;  %v4293_v4 = vor.u32 %v5560_v56, %v4290_v59 }
  0x9e   : > { %1915 = vmatpush.bf16.msra.mxu0 %v4069_v23  ;;  %v4194_v23 = vld [vmem:[%s8156_s1 + $0x2f8] sm:$0xf0]  ;;  %v5524_v6 = vld [vmem:[%s8156_s1 + $0x28c] sm:$0xf] }
  0x9f   : > { %1861 = vmatpush.bf16.msra.mxu1 %v4417_v20  ;;  %v3986_v20 = vld [vmem:[%s8156_s1 + $0x158] sm:$0xf0]  ;;  %v4149_v13 = vor.u32 %v5524_v6, %v4146_v7  ;;  %v5508_v56 = vld [vmem:[%s8156_s1 + $0x20c] sm:$0xf]  ;;  %v5669_v6 = vld [vmem:[%s8158_s3 + $0xec] sm:$0xf0] }
  0xa0   : > { %1902 = vmatpush.bf16.msrb.mxu2 %v3925_v19  ;;  %v5484_v19 = vld [vmem:[%s8156_s1 + $0x14c] sm:$0xf]  ;;  %v4844_v7 = vld [vmem:[%s8158_s3 + $0x1e0] sm:$0xf] }
  0xa1   : > { %1875 = vmatpush.bf16.msra.mxu3 %v4545_v25  ;;  %v5568_v25 = vld [vmem:[%s8156_s1 + $0x3ec] sm:$0xf]  ;;  %v3989_v30 = vor.u32 %v5484_v19, %v3986_v20  ;;  %v4130_v19 = vld [vmem:[%s8156_s1 + $0x278] sm:$0xf0] }
  0xa2   : > { %1916 = vmatpush.bf16.msra.mxu0 %v4053_v35  ;;  %v5532_v35 = vld [vmem:[%s8156_s1 + $0x2cc] sm:$0xf]  ;;  %v4325_v36 = vor.u32 %v5568_v25, %v4322_v26 }
  0xa3   : > { %1862 = vmatpush.bf16.msra.mxu1 %v4401_v32  ;;  %v4197_v32 = vor.u32 %v5536_v22, %v4194_v23  ;;  %v5552_v20 = vld [vmem:[%s8156_s1 + $0x36c] sm:$0xf]  ;;  %v4546_v23 = vld [vmem:[%s8156_s1 + $0x5b8] sm:$0xf0] }
  0xa4   : > { %1903 = vmatpush.bf16.msrb.mxu2 %v3909_v31  ;;  %v4465_v31 = vor.u32 %v5606_v21, %v4464_v18  ;;  %v5520_v18 = vld [vmem:[%s8156_s1 + $0x26c] sm:$0xf]  ;;  %v4258_v21 = vld [vmem:[%s8156_s1 + $0x378] sm:$0xf0] }
  0xa5   : > { %1876 = vmatpush.bf16.msra.mxu3 %v4529_v38  ;;  %v4178_v38 = vld [vmem:[%s8156_s1 + $0x2d8] sm:$0xf0]  ;;  %v5624_v22 = vld [vmem:[%s8156_s1 + $0x5ac] sm:$0xf]  ;;  %v4133_v25 = vor.u32 %v5520_v18, %v4130_v19  ;;  %v4261_v28 = vor.u32 %v5552_v20, %v4258_v21  ;;  %v4700_v21 = vld [vmem:[%s8158_s3 + $0xc0] sm:$0xf] }
  0xa6   : > { %1917 = vmatpush.bf16.msra.mxu0 %v4037_v49  ;;  %v4181_v47 = vor.u32 %v5532_v35, %v4178_v38  ;;  %v4434_v49 = vld [vmem:[%s8156_s1 + $0x4d8] sm:$0xf0]  ;;  %v5584_v26 = vld [vmem:[%s8156_s1 + $0x46c] sm:$0xf]  ;;  %v4549_v29 = vor.u32 %v5624_v22, %v4546_v23  ;;  %v5665_v22 = vld [vmem:[%s8158_s3 + $0xcc] sm:$0xf0] }
  0xa7   : > { %1863 = vmatpush.bf16.msra.mxu1 %v4385_v46  ;;  %v5596_v46 = vld [vmem:[%s8156_s1 + $0x4cc] sm:$0xf]  ;;  %v4482_v18 = vld [vmem:[%s8156_s1 + $0x538] sm:$0xf0]  ;;  %v7324_v23 = vld [vmem:[%s8157_s2] sm:$0xf] }
  0xa8   : > { %1904 = vmatpush.bf16.msrb.mxu2 %v3893_v45  ;;  %v4453_v45 = vor.u32 %v5600_v33, %v4450_v34  ;;  %v4437_v63 = vor.u32 %v5596_v46, %v4434_v49  ;;  %v5620_v33 = vld [vmem:[%s8156_s1 + $0x58c] sm:$0xf]  ;;  %v4530_v34 = vld [vmem:[%s8156_s1 + $0x598] sm:$0xf0] }
  0xa9   : > { %1877 = vmatpush.bf16.msra.mxu3 %v4513_v52  ;;  %4600 = vmatmul.msk.bf16.vlgmr.msrb.gmra.mxu0 %vm1603_vm0, %v6431_v50  ;;  %v4162_v52 = vld [vmem:[%s8156_s1 + $0x2b8] sm:$0xf0]  ;;  %v5580_v38 = vld [vmem:[%s8156_s1 + $0x44c] sm:$0xf] }
  0xaa   : > { %1918 = vmatpush.bf16.msra.mxu0 %v4021_v1  ;;  %v4165_v0 = vor.u32 %v5528_v51, %v4162_v52  ;;  %v3957_v1 = vor.u32 %v5476_v57, %v3954_v58  ;;  %v4226_v46 = vld [vmem:[%s8156_s1 + $0x338] sm:$0xf0]  ;;  %v4373_v49 = vor.u32 %v5580_v38, %v4370_v39  ;;  %v4101_v51 = vor.u32 %v5512_v43, %v4098_v44  ;;  %v5576_v52 = vld [vmem:[%s8156_s1 + $0x42c] sm:$0xf]  ;;  %v4668_v44 = vld [vmem:[%s8158_s3 + $0x80] sm:$0xf] }
  0xab   : > { %1864 = vmatpush.bf16.msra.mxu1 %v4369_v62  ;;  %v4578_v62 = vld [vmem:[%s8156_s1 + $0x5f8] sm:$0xf0] }
  0xac   : > { %1905 = vmatpush.bf16.msrb.mxu2 %v3877_v61  ;;  %v5632_v61 = vld [vmem:[%s8156_s1 + $0x5ec] sm:$0xf] }
  0xad   : > { %1878 = vmatpush.bf16.msra.mxu3 %v4497_v3  ;;  %v4418_v3 = vld [vmem:[%s8156_s1 + $0x4b8] sm:$0xf0]  ;;  %v4581_v5 = vor.u32 %v5632_v61, %v4578_v62  ;;  %v5540_v62 = vld [vmem:[%s8156_s1 + $0x30c] sm:$0xf] }
  0xae   : > { %1919 = vmatpush.bf16.msra.mxu0 %v4005_v14  ;;  %v5588_v14 = vld [vmem:[%s8156_s1 + $0x48c] sm:$0xf]  ;;  %v4082_v61 = vld [vmem:[%s8156_s1 + $0x218] sm:$0xf0] }
  0xaf   : > { %1865 = vmatpush.bf16.msra.mxu1 %v4353_v12  ;;  %v4421_v12 = vor.u32 %v5592_v2, %v4418_v3  ;;  %v5612_v2 = vld [vmem:[%s8156_s1 + $0x54c] sm:$0xf]  ;;  %v4498_v3 = vld [vmem:[%s8156_s1 + $0x558] sm:$0xf0] }
  0xb0   : > { %1906 = vmatpush.bf16.msrb.mxu2 %v3861_v10  ;;  %v4274_v10 = vld [vmem:[%s8156_s1 + $0x398] sm:$0xf0] }
  0xb1   : > { %1879 = vmatpush.bf16.msra.mxu3 %v4481_v17  ;;  %v4277_v16 = vor.u32 %v5556_v9, %v4274_v10  ;;  %v5701_v9 = vld [vmem:[%s8158_s3 + $0x1ec] sm:$0xf0]  ;;  %v4085_v10 = vor.u32 %v5508_v56, %v4082_v61 }
  0xb2   : > { %1920 = vmatpush.bf16.msra.mxu0 %v3989_v30  ;;  %v5516_v30 = vld [vmem:[%s8156_s1 + $0x24c] sm:$0xf]  ;;  %v4845_v19 = vor.u32 %v5701_v9, %v4844_v7  ;;  %v5653_v56 = vld [vmem:[%s8158_s3 + $0x6c] sm:$0xf0] }
  0xb3   : > { %1866 = vmatpush.bf16.msra.mxu1 %v4337_v27  ;;  %v4386_v27 = vld [vmem:[%s8156_s1 + $0x478] sm:$0xf0]  ;;  %v5685_v61 = vld [vmem:[%s8158_s3 + $0x16c] sm:$0xf0] }
  0xb4   : > { %1907 = vmatpush.bf16.msrb.mxu2 %v3845_v24  ;;  %v4405_v24 = vor.u32 %v5588_v14, %v4402_v15  ;;  %v4389_v35 = vor.u32 %v5584_v26, %v4386_v27  ;;  %v5636_v14 = vld [vmem:[%s8156_s1 + $0x60c] sm:$0xf]  ;;  %v4594_v15 = vld [vmem:[%s8156_s1 + $0x618] sm:$0xf0]  ;;  %v5681_v7 = vld [vmem:[%s8158_s3 + $0x14c] sm:$0xf0] }
  0xb5   : > { %1880 = vmatpush.bf16.msra.mxu3 %v4465_v31  ;;  %v5548_v31 = vld [vmem:[%s8156_s1 + $0x34c] sm:$0xf]  ;;  %v7264_v57 = vpop.f32.mrf.mxu0  ;;  %v4597_v26 = vor.u32 %v5636_v14, %v4594_v15 }
  0xb6   : > { %1867 = vmatmul.bf16.vlgmr.msra.gmra.mxu1 %v6520_v37  ;;  %1921 = vmatpush.bf16.msra.mxu0 %v3973_v48  ;;  %v4514_v48 = vld [vmem:[%s8156_s1 + $0x578] sm:$0xf0] }
  0xb7   : > { %1929 = vmatpush.bf16.msrb.mxu1 %v4197_v32  ;;  %v4242_v32 = vld [vmem:[%s8156_s1 + $0x358] sm:$0xf0] }
  0xb8   : > { %1908 = vmatpush.bf16.msrb.mxu2 %v3829_v41  ;;  %1881 = vmatmul.bf16.vlgmr.msra.gmra.mxu3 %v6531_v42  ;;  %v4245_v40 = vor.u32 %v5548_v31, %v4242_v32  ;;  %v4533_v41 = vor.u32 %v5620_v33, %v4530_v34  ;;  %v4684_v32 = vld [vmem:[%s8158_s3 + $0xa0] sm:$0xf]  ;;  %v5661_v33 = vld [vmem:[%s8158_s3 + $0xac] sm:$0xf0] }
  0xb9   : > { %1943 = vmatpush.bf16.msrb.mxu3 %v4325_v36  ;;  %v4685_v43 = vor.u32 %v5661_v33, %v4684_v32 }
  0xba   : > { %1922 = vmatpush.bf16.msra.mxu0 %v3957_v1  ;;  %v4716_v1 = vld [vmem:[%s8158_s3 + $0xe0] sm:$0xf] }
  0xbb   : > { %1930 = vmatpush.bf16.msrb.mxu1 %v4181_v47  ;;  %1909 = vmatmul.bf16.vlgmr.msrb.gmra.mxu2 %v6312_v55  ;;  %v5628_v55 = vld [vmem:[%s8156_s1 + $0x5cc] sm:$0xf] }
  0xbc   : > { %1957 = vmatpush.bf16.msra.mxu2 %v4453_v45  ;;  %v4565_v17 = vor.u32 %v5628_v55, %v4562_v11  ;;  %v5544_v45 = vld [vmem:[%s8156_s1 + $0x32c] sm:$0xf]  ;;  %v4338_v11 = vld [vmem:[%s8156_s1 + $0x418] sm:$0xf0] }
  0xbd   : > { %1944 = vmatpush.bf16.msrb.mxu3 %v4309_v53  ;;  %1923 = vmatmul.bf16.vlgmr.msra.gmra.mxu0 %v6344_v8  ;;  %v4114_v8 = vld [vmem:[%s8156_s1 + $0x258] sm:$0xf0]  ;;  %v5616_v47 = vld [vmem:[%s8156_s1 + $0x56c] sm:$0xf]  ;;  %v4229_v58 = vor.u32 %v5544_v45, %v4226_v46  ;;  %v1618_v31 = vpop.f32.mrf.mxu0  ;;  %v1658_v38 = vpop.f32.mrf.mxu3  ;;  %v5657_v45 = vld [vmem:[%s8158_s3 + $0x8c] sm:$0xf0] }
  0xbe   : > { %1971 = vmatpush.bf16.msrb.mxu0 %v4581_v5  ;;  %v4117_v36 = vor.u32 %v5516_v30, %v4114_v8  ;;  %v4354_v53 = vld [vmem:[%s8156_s1 + $0x438] sm:$0xf0]  ;;  %v4517_v59 = vor.u32 %v5616_v47, %v4514_v48  ;;  %v5572_v55 = vld [vmem:[%s8156_s1 + $0x40c] sm:$0xf]  ;;  %v580_v8 = vperm.slane %v7324_v23, 0 }
  0xbf   : > { %1931 = vmatpush.bf16.msrb.mxu1 %v4165_v0  ;;  %v7275_v0 = vpop.f32.mrf.mxu1  ;;  %v4357_v5 = vor.u32 %v5576_v52, %v4354_v53  ;;  %v4341_v20 = vor.u32 %v5572_v55, %v4338_v11  ;;  %v4466_v30 = vld [vmem:[%s8156_s1 + $0x518] sm:$0xf0]  ;;  %v4796_v47 = vld [vmem:[%s8158_s3 + $0x180] sm:$0xf] }
  0xc0   : > { %1958 = vmatpush.bf16.msra.mxu2 %v4437_v63  ;;  %v4210_v63 = vld [vmem:[%s8156_s1 + $0x318] sm:$0xf0]  ;;  %v4652_v53 = vld [vmem:[%s8158_s3 + $0x60] sm:$0xf] }
  0xc1   : > { %1945 = vmatpush.bf16.msrb.mxu3 %v4293_v4  ;;  %v7286_v4 = vpop.f32.mrf.mxu2  ;;  %v4620_v11 = vld [vmem:[%s8158_s3 + $0x20] sm:$0xf] }
  0xc2   : > { %1972 = vmatpush.bf16.msrb.mxu0 %v4565_v17  ;;  %v5608_v17 = vld [vmem:[%s8156_s1 + $0x52c] sm:$0xf] }
  0xc3   : > { %1932 = vmatpush.bf16.msrb.mxu1 %v4149_v13  ;;  %v4501_v13 = vor.u32 %v5612_v2, %v4498_v3  ;;  %v4485_v27 = vor.u32 %v5608_v17, %v4482_v18  ;;  %v4636_v3 = vld [vmem:[%s8158_s3 + $0x40] sm:$0xf]  ;;  %v5677_v17 = vld [vmem:[%s8158_s3 + $0x12c] sm:$0xf0] }
  0xc4   : > { %1959 = vmatpush.bf16.msra.mxu2 %v4421_v12  ;;  %v4213_v12 = vor.u32 %v5540_v62, %v4210_v63 }
  0xc5   : > { %1946 = vmatpush.bf16.msrb.mxu3 %v4277_v16  ;;  %v4717_v16 = vor.u32 %v5669_v6, %v4716_v1  ;;  %v1660_v2 = vpop.f32.mrf.mxu3  ;;  %v4764_v6 = vld [vmem:[%s8158_s3 + $0x140] sm:$0xf] }
  0xc6   : > { %1973 = vmatpush.bf16.msrb.mxu0 %v4549_v29  ;;  %v5604_v29 = vld [vmem:[%s8156_s1 + $0x50c] sm:$0xf] }
  0xc7   : > { %1933 = vmatpush.bf16.msrb.mxu1 %v4133_v25  ;;  %v5697_v25 = vld [vmem:[%s8158_s3 + $0x1cc] sm:$0xf0] }
  0xc8   : > { %1960 = vmatpush.bf16.msra.mxu2 %v4405_v24  ;;  %v4828_v24 = vld [vmem:[%s8158_s3 + $0x1c0] sm:$0xf] }
  0xc9   : > { %1947 = vmatpush.bf16.msrb.mxu3 %v4261_v28  ;;  %v4701_v28 = vor.u32 %v5665_v22, %v4700_v21  ;;  %v4829_v34 = vor.u32 %v5697_v25, %v4828_v24  ;;  %v1646_v39 = vpop.f32.mrf.mxu2  ;;  %v4604_v22 = vld [vmem:[%s8158_s3] sm:$0xf]  ;;  %v5641_v24 = vld [vmem:[%s8158_s3 + $0xc] sm:$0xf0]  ;;  %v5667_v25 = vld [vmem:[%s8158_s3 + $0xe4] sm:$0xf] }
  0xca   : > { %1974 = vmatpush.bf16.msrb.mxu0 %v4533_v41  ;;  %v1619_v41 = vadd.f32 %v1618_v31, %v580_v8  ;;  %v4605_v31 = vor.u32 %v5641_v24, %v4604_v22  ;;  %v4908_v24 = vld [vmem:[%s8158_s3 + $0x260] sm:$0xf] }
  0xcb   : > { %1934 = vmatpush.bf16.msrb.mxu1 %v4117_v36  ;;  %v4812_v36 = vld [vmem:[%s8158_s3 + $0x1a0] sm:$0xf] }
  0xcc   : > { %1961 = vmatpush.bf16.msra.mxu2 %v4389_v35  ;;  %v1632_v35 = vpop.f32.mrf.mxu1 }
  0xcd   : > { %1948 = vmatpush.bf16.msrb.mxu3 %v4245_v40  ;;  %v4469_v40 = vor.u32 %v5604_v29, %v4466_v30  ;;  %v1633_v48 = vadd.f32 %v1632_v35, %v1619_v41  ;;  %v5699_v30 = vld [vmem:[%s8158_s3 + $0x1e4] sm:$0xf] }
  0xce   : > { %1975 = vmatpush.bf16.msrb.mxu0 %v4517_v59  ;;  %v4780_v59 = vld [vmem:[%s8158_s3 + $0x160] sm:$0xf] }
  0xcf   : > { %1935 = vmatpush.bf16.msrb.mxu1 %v4101_v51  ;;  %v1647_v63 = vadd.f32 %v1646_v39, %v1633_v48  ;;  %v4972_v39 = vld [vmem:[%s8158_s3 + $0x2e0] sm:$0xf]  ;;  %v4686_v48 = vld [vmem:[%s8158_s3 + $0xb0] sm:$0xf0] }
  0xd0   : > { %1962 = vmatpush.bf16.msra.mxu2 %v4373_v49  ;;  %v4669_v49 = vor.u32 %v5657_v45, %v4668_v44 }
  0xd1   : > { %1949 = vmatpush.bf16.msrb.mxu3 %v4229_v58  ;;  %v1700_v62 = vpop.f32.mrf.mxu2 }
  0xd2   : > { %1976 = vmatpush.bf16.msrb.mxu0 %v4501_v13  ;;  %v1672_v52 = vpop.f32.mrf.mxu0  ;;  %v4765_v13 = vor.u32 %v5681_v7, %v4764_v6  ;;  %v5651_v7 = vld [vmem:[%s8158_s3 + $0x64] sm:$0xf] }
  0xd3   : > { %1936 = vmatpush.bf16.msrb.mxu1 %v4085_v10 }
  0xd4   : > { %1963 = vmatpush.bf16.msra.mxu2 %v4357_v5  ;;  %v1686_v58 = vpop.f32.mrf.mxu1  ;;  %v4781_v5 = vor.u32 %v5685_v61, %v4780_v59  ;;  %v5655_v59 = vld [vmem:[%s8158_s3 + $0x84] sm:$0xf]  ;;  %v4670_v61 = vld [vmem:[%s8158_s3 + $0x90] sm:$0xf0] }
  0xd5   : > { %1950 = vmatpush.bf16.msrb.mxu3 %v4213_v12  ;;  %v5645_v12 = vld [vmem:[%s8158_s3 + $0x2c] sm:$0xf0]  ;;  %v4673_v6 = vor.u32 %v5655_v59, %v4670_v61 }
  0xd6   : > { %1937 = vmatmul.bf16.vlgmr.msrb.gmra.mxu1 %v6310_v54  ;;  %v5693_v54 = vld [vmem:[%s8158_s3 + $0x1ac] sm:$0xf0]  ;;  %1977 = vmatpush.bf16.msrb.mxu0 %v4485_v27  ;;  %v4732_v27 = vld [vmem:[%s8158_s3 + $0x100] sm:$0xf] }
  0xd7   : > { %2795 = vmatpush.bf16.msra.mxu1 %v4845_v19  ;;  %v4813_v46 = vor.u32 %v5693_v54, %v4812_v36  ;;  %v4621_v19 = vor.u32 %v5645_v12, %v4620_v11  ;;  %v4702_v54 = vld [vmem:[%s8158_s3 + $0xd0] sm:$0xf0] }
  0xd8   : > { %1964 = vmatpush.bf16.msra.mxu2 %v4341_v20  ;;  %1951 = vmatmul.bf16.vlgmr.msrb.gmra.mxu3 %v6323_v60  ;;  %v1617_v60 = vadd.f32 %v7264_v57, %v580_v8  ;;  %v4846_v8 = vld [vmem:[%s8158_s3 + $0x1f0] sm:$0xf0] }
  0xd9   : > { %2781 = vmatpush.bf16.msra.mxu3 %v4717_v16  ;;  %v4748_v16 = vld [vmem:[%s8158_s3 + $0x120] sm:$0xf]  ;;  %v1702_v20 = vpop.f32.mrf.mxu2 }
  0xda   : > { %1978 = vmatpush.bf16.msrb.mxu0 %v4469_v40  ;;  %v1631_v51 = vadd.f32 %v7275_v0, %v1617_v60  ;;  %v4653_v0 = vor.u32 %v5653_v56, %v4652_v53  ;;  %v1674_v55 = vpop.f32.mrf.mxu0  ;;  %v5733_v40 = vld [vmem:[%s8158_s3 + $0x2ec] sm:$0xf0]  ;;  %v4830_v60 = vld [vmem:[%s8158_s3 + $0x1d0] sm:$0xf0]  ;;  %v5691_v53 = vld [vmem:[%s8158_s3 + $0x1a4] sm:$0xf] }
  0xdb   : > { %1965 = vmatmul.bf16.vlgmr.msra.gmra.mxu2 %v6520_v37  ;;  %2796 = vmatpush.bf16.msra.mxu1 %v4829_v34  ;;  %v5689_v37 = vld [vmem:[%s8158_s3 + $0x18c] sm:$0xf0]  ;;  %v5663_v34 = vld [vmem:[%s8158_s3 + $0xc4] sm:$0xf]  ;;  %v1714_v36 = vpop.f32.mrf.mxu3  ;;  %v4973_v44 = vor.u32 %v5733_v40, %v4972_v39  ;;  %v4814_v56 = vld [vmem:[%s8158_s3 + $0x1b0] sm:$0xf0] }
  0xdc   : > { %1992 = vmatpush.bf16.msrb.mxu2 %v4597_v26  ;;  %v4797_v57 = vor.u32 %v5689_v37, %v4796_v47  ;;  %v1645_v1 = vadd.f32 %v7286_v4, %v1631_v51  ;;  %v1661_v4 = vadd.f32 %v1660_v2, %v1647_v63  ;;  %v1688_v15 = vpop.f32.mrf.mxu1  ;;  %v4749_v26 = vor.u32 %v5677_v17, %v4748_v16  ;;  %v5659_v37 = vld [vmem:[%s8158_s3 + $0xa4] sm:$0xf]  ;;  %v4956_v51 = vld [vmem:[%s8158_s3 + $0x2c0] sm:$0xf]  ;;  %v4798_v2 = vld [vmem:[%s8158_s3 + $0x190] sm:$0xf0] }
  0xdd   : > { %2782 = vmatpush.bf16.msra.mxu3 %v4701_v28  ;;  %1979 = vmatmul.bf16.vlgmr.msrb.gmra.mxu0 %v6531_v42  ;;  %v5649_v42 = vld [vmem:[%s8158_s3 + $0x4c] sm:$0xf0]  ;;  %v4705_v47 = vor.u32 %v5663_v34, %v4702_v54  ;;  %v4940_v63 = vld [vmem:[%s8158_s3 + $0x2a0] sm:$0xf]  ;;  %v5675_v54 = vld [vmem:[%s8158_s3 + $0x124] sm:$0xf] }
  0xde   : > { %v4637_v9 = vor.u32 %v5649_v42, %v4636_v3  ;;  %v1659_v10 = vadd.f32 %v1658_v38, %v1645_v1  ;;  %v1675_v14 = vadd.f32 %v1674_v55, %v1661_v4  ;;  %v5673_v28 = vld [vmem:[%s8158_s3 + $0x10c] sm:$0xf0]  ;;  %v4849_v38 = vor.u32 %v5699_v30, %v4846_v8  ;;  %v5687_v1 = vld [vmem:[%s8158_s3 + $0x184] sm:$0xf]  ;;  %v4654_v4 = vld [vmem:[%s8158_s3 + $0x70] sm:$0xf0] }
  0xdf   : > { %2797 = vmatpush.bf16.msra.mxu1 %v4813_v46  ;;  %v4733_v35 = vor.u32 %v5673_v28, %v4732_v27  ;;  %v581_v42 = vperm.slane %v7324_v23, 1  ;;  %v5721_v55 = vld [vmem:[%s8158_s3 + $0x28c] sm:$0xf0]  ;;  %v4657_v17 = vor.u32 %v5651_v7, %v4654_v4  ;;  %v5643_v30 = vld [vmem:[%s8158_s3 + $0x24] sm:$0xf] }
  0xe0   : > { %v1673_v18 = vadd.f32 %v1672_v52, %v1659_v10  ;;  %v1689_v21 = vadd.f32 %v1688_v15, %v1675_v14  ;;  %2809 = vmatpush.bf16.msra.mxu2 %v4973_v44  ;;  %v5729_v52 = vld [vmem:[%s8158_s3 + $0x2cc] sm:$0xf0]  ;;  %v4924_v10 = vld [vmem:[%s8158_s3 + $0x280] sm:$0xf]  ;;  %v4782_v14 = vld [vmem:[%s8158_s3 + $0x170] sm:$0xf0] }
  0xe1   : > { %2783 = vmatpush.bf16.msra.mxu3 %v4685_v43  ;;  %v5695_v43 = vld [vmem:[%s8158_s3 + $0x1c4] sm:$0xf]  ;;  %v1728_v46 = vpop.f32.mrf.mxu2  ;;  %v4925_v15 = vor.u32 %v5721_v55, %v4924_v10  ;;  %v1715_v16 = vadd.f32 %v1714_v36, %v581_v42  ;;  %v4892_v34 = vld [vmem:[%s8158_s3 + $0x240] sm:$0xf]  ;;  %v4606_v44 = vld [vmem:[%s8158_s3 + $0x10] sm:$0xf0] }
  0xe2   : > { %v1687_v29 = vadd.f32 %v1686_v58, %v1673_v18  ;;  %v1703_v32 = vadd.f32 %v1702_v20, %v1689_v21  ;;  %v4689_v58 = vor.u32 %v5659_v37, %v4686_v48  ;;  %v5647_v18 = vld [vmem:[%s8158_s3 + $0x44] sm:$0xf]  ;;  %v4638_v21 = vld [vmem:[%s8158_s3 + $0x50] sm:$0xf0]  ;;  %v4876_v48 = vld [vmem:[%s8158_s3 + $0x220] sm:$0xf] }
  0xe3   : > { %2798 = vmatpush.bf16.msra.mxu1 %v4797_v57  ;;  %v4957_v57 = vor.u32 %v5729_v52, %v4956_v51  ;;  %v1729_v28 = vadd.f32 %v1728_v46, %v1715_v16  ;;  %v5670_v52 = vld [vmem:[%s8158_s3 + $0xf4] sm:$0xf0]  ;;  %v5731_v7 = vld [vmem:[%s8158_s3 + $0x2e4] sm:$0xf]  ;;  %v4974_v4 = vld [vmem:[%s8158_s3 + $0x2f0] sm:$0xf0] }
  0xe4   : > { %v1701_v41 = vadd.f32 %v1700_v62, %v1687_v29  ;;  %v4817_v62 = vor.u32 %v5691_v53, %v4814_v56  ;;  %v4641_v29 = vor.u32 %v5647_v18, %v4638_v21  ;;  %v5671_v53 = vld [vmem:[%s8158_s3 + $0x104] sm:$0xf]  ;;  %v4734_v56 = vld [vmem:[%s8158_s3 + $0x110] sm:$0xf0]  ;;  %v4977_v10 = vor.u32 %v5731_v7, %v4974_v4  ;;  %v4852_v21 = vld [vmem:[%s8158_s3 + $0x1e8] sm:$0xf] }
  0xe5   : > { %2784 = vmatpush.bf16.msra.mxu3 %v4669_v49  ;;  %v4833_v49 = vor.u32 %v5695_v43, %v4830_v60  ;;  %2810 = vmatpush.bf16.msra.mxu2 %v4957_v57  ;;  %v5639_v60 = vld [vmem:[%s8158_s3 + $0x4] sm:$0xf]  ;;  %v4958_v16 = vld [vmem:[%s8158_s3 + $0x2d0] sm:$0xf0]  ;;  %v5686_v7 = vld [vmem:[%s8158_s3 + $0x174] sm:$0xf0] }
  0xe6   : > { %v7450_v45 = vpack.c.bf16 %v1703_v32, %v1701_v41  ;;  %v4622_v32 = vld [vmem:[%s8158_s3 + $0x30] sm:$0xf0]  ;;  %v4609_v59 = vor.u32 %v5639_v60, %v4606_v44  ;;  %v5694_v60 = vld [vmem:[%s8158_s3 + $0x1b4] sm:$0xf0]  ;;  %v4644_v44 = vld [vmem:[%s8158_s3 + $0x48] sm:$0xf] }
  0xe7   : > { %2799 = vmatpush.bf16.msra.mxu1 %v4781_v5  ;;  %v1716_v5 = vpop.f32.mrf.mxu3  ;;  %v4625_v43 = vor.u32 %v5643_v30, %v4622_v32  ;;  %v4612_v4 = vld [vmem:[%s8158_s3 + $0x8] sm:$0xf] }
  0xe9   : > { %2785 = vmatpush.bf16.msra.mxu3 %v4653_v0  ;;  %v5725_v0 = vld [vmem:[%s8158_s3 + $0x2ac] sm:$0xf0]  ;;  %v1730_v12 = vpop.f32.mrf.mxu2 }
  0xea   : > { %v4941_v3 = vor.u32 %v5725_v0, %v4940_v63  ;;  %v4708_v63 = vld [vmem:[%s8158_s3 + $0xc8] sm:$0xf]  ;;  %v4737_v0 = vor.u32 %v5671_v53, %v4734_v56 }
  0xeb   : > { %4601 = vmatmul.msk.bf16.vlgmr.msrb.gmra.mxu2 %vm1603_vm0, %v6431_v50  ;;  %2800 = vmatpush.bf16.msra.mxu1 %v4765_v13  ;;  %v4718_v50 = vld [vmem:[%s8158_s3 + $0xf0] sm:$0xf0]  ;;  %v5683_v13 = vld [vmem:[%s8158_s3 + $0x164] sm:$0xf] }
  0xec   : > { %v4721_v33 = vor.u32 %v5667_v25, %v4718_v50  ;;  %2811 = vmatpush.bf16.msra.mxu2 %v4941_v3  ;;  %v4785_v22 = vor.u32 %v5683_v13, %v4782_v14  ;;  %v5717_v25 = vld [vmem:[%s8158_s3 + $0x26c] sm:$0xf0]  ;;  %v4766_v50 = vld [vmem:[%s8158_s3 + $0x150] sm:$0xf0]  ;;  %v5662_v14 = vld [vmem:[%s8158_s3 + $0xb4] sm:$0xf0] }
  0xed   : > { %2786 = vmatpush.bf16.msra.mxu3 %v4637_v9  ;;  %v4801_v9 = vor.u32 %v5687_v1, %v4798_v2  ;;  %v4909_v27 = vor.u32 %v5717_v25, %v4908_v24  ;;  %v4860_v1 = vld [vmem:[%s8158_s3 + $0x200] sm:$0xf]  ;;  %v5705_v2 = vld [vmem:[%s8158_s3 + $0x20c] sm:$0xf0]  ;;  %v4676_v24 = vld [vmem:[%s8158_s3 + $0x88] sm:$0xf] }
  0xef   : > { %2801 = vmatpush.bf16.msra.mxu1 %v4749_v26  ;;  %v5679_v26 = vld [vmem:[%s8158_s3 + $0x144] sm:$0xf] }
  0xf0   : > { %2812 = vmatpush.bf16.msra.mxu2 %v4925_v15  ;;  %v5727_v15 = vld [vmem:[%s8158_s3 + $0x2c4] sm:$0xf] }
  0xf1   : > { %2787 = vmatpush.bf16.msra.mxu3 %v4621_v19  ;;  %v1717_v19 = vadd.f32 %v1716_v5, %v581_v42  ;;  %v5666_v5 = vld [vmem:[%s8158_s3 + $0xd4] sm:$0xf0]  ;;  %v4961_v18 = vor.u32 %v5727_v15, %v4958_v16  ;;  %v5068_v15 = vld [vmem:[%s8158_s3 + $0x3a0] sm:$0xf]  ;;  %v5757_v16 = vld [vmem:[%s8158_s3 + $0x3ac] sm:$0xf0] }
  0xf2   : > { %v1742_v11 = vpop.f32.mrf.mxu0 }
  0xf3   : > { %2802 = vmatpush.bf16.msra.mxu1 %v4733_v35  ;;  %v1756_v20 = vpop.f32.mrf.mxu1  ;;  %v1731_v8 = vadd.f32 %v1730_v12, %v1717_v19  ;;  %v5713_v35 = vld [vmem:[%s8158_s3 + $0x24c] sm:$0xf0]  ;;  %v1743_v40 = vadd.f32 %v1742_v11, %v1729_v28  ;;  %v4709_v11 = vor.u32 %v5666_v5, %v4708_v63  ;;  %v4692_v12 = vld [vmem:[%s8158_s3 + $0xa8] sm:$0xf]  ;;  %v4894_v63 = vld [vmem:[%s8158_s3 + $0x250] sm:$0xf0] }
  0xf4   : > { %2813 = vmatpush.bf16.msra.mxu2 %v4909_v27  ;;  %v4893_v39 = vor.u32 %v5713_v35, %v4892_v34  ;;  %v4942_v27 = vld [vmem:[%s8158_s3 + $0x2b0] sm:$0xf0]  ;;  %v5698_v34 = vld [vmem:[%s8158_s3 + $0x1d4] sm:$0xf0]  ;;  %v4660_v35 = vld [vmem:[%s8158_s3 + $0x68] sm:$0xf] }
  0xf5   : > { %2788 = vmatpush.bf16.msra.mxu3 %v4605_v31 }
  0xf7   : > { %2851 = vmatpush.bf16.msrb.mxu1 %v4849_v38  ;;  %v4750_v38 = vld [vmem:[%s8158_s3 + $0x130] sm:$0xf0] }
  0xf8   : > { %2789 = vmatmul.bf16.vlgmr.msra.gmra.mxu3 %v7450_v45  ;;  %v4753_v37 = vor.u32 %v5675_v54, %v4750_v38  ;;  %2814 = vmatpush.bf16.msra.mxu2 %v4893_v39  ;;  %v5719_v54 = vld [vmem:[%s8158_s3 + $0x284] sm:$0xf]  ;;  %v4926_v38 = vld [vmem:[%s8158_s3 + $0x290] sm:$0xf0] }
  0xf9   : > { %2837 = vmatpush.bf16.msrb.mxu3 %v4721_v33  ;;  %v4769_v33 = vor.u32 %v5679_v26, %v4766_v50  ;;  %v5658_v26 = vld [vmem:[%s8158_s3 + $0x94] sm:$0xf0]  ;;  %v5723_v50 = vld [vmem:[%s8158_s3 + $0x2a4] sm:$0xf]  ;;  %v4929_v39 = vor.u32 %v5719_v54, %v4926_v38  ;;  %v5660_v54 = vld [vmem:[%s8158_s3 + $0xac] sm:$0xf] }
  0xfa   : > { %v1744_v36 = vpop.f32.mrf.mxu0  ;;  %v4945_v30 = vor.u32 %v5723_v50, %v4942_v27  ;;  %v4677_v32 = vor.u32 %v5658_v26, %v4676_v24  ;;  %v5664_v24 = vld [vmem:[%s8158_s3 + $0xcc] sm:$0xf]  ;;  %v4862_v26 = vld [vmem:[%s8158_s3 + $0x210] sm:$0xf0]  ;;  %v4710_v27 = vld [vmem:[%s8158_s3 + $0xd8] sm:$0xf0] }
  0xfb   : > { %2852 = vmatpush.bf16.msrb.mxu1 %v4833_v49  ;;  %v1770_v31 = vpop.f32.mrf.mxu3  ;;  %v1745_v46 = vadd.f32 %v1744_v36, %v1731_v8  ;;  %v5709_v49 = vld [vmem:[%s8158_s3 + $0x22c] sm:$0xf0]  ;;  %v1758_v51 = vpop.f32.mrf.mxu1  ;;  %v5654_v36 = vld [vmem:[%s8158_s3 + $0x74] sm:$0xf0]  ;;  %v4694_v38 = vld [vmem:[%s8158_s3 + $0xb8] sm:$0xf0] }
  0xfc   : > { %v4877_v57 = vor.u32 %v5709_v49, %v4876_v48  ;;  %v5100_v49 = vld [vmem:[%s8158_s3 + $0x3e0] sm:$0xf] }
  0xfd   : > { %2838 = vmatpush.bf16.msrb.mxu3 %v4705_v47  ;;  %v4724_v47 = vld [vmem:[%s8158_s3 + $0xe8] sm:$0xf]  ;;  %v1759_v61 = vadd.f32 %v1758_v51, %v1745_v46  ;;  %v5650_v46 = vld [vmem:[%s8158_s3 + $0x54] sm:$0xf0]  ;;  %v5765_v51 = vld [vmem:[%s8158_s3 + $0x3ec] sm:$0xf0] }
  0xfe   : > { %v1784_v41 = vpop.f32.mrf.mxu2  ;;  %2815 = vmatpush.bf16.msra.mxu2 %v4877_v57  ;;  %v5101_v53 = vor.u32 %v5765_v51, %v5100_v49  ;;  %v4645_v56 = vor.u32 %v5650_v46, %v4644_v44  ;;  %v4804_v57 = vld [vmem:[%s8158_s3 + $0x188] sm:$0xf]  ;;  %v5674_v44 = vld [vmem:[%s8158_s3 + $0x114] sm:$0xf0]  ;;  %v4854_v49 = vld [vmem:[%s8158_s3 + $0x1f8] sm:$0xf0] }
  0xff   : > { %2853 = vmatpush.bf16.msrb.mxu1 %v4817_v62  ;;  %v4725_v62 = vor.u32 %v5670_v52, %v4724_v47  ;;  %v5715_v47 = vld [vmem:[%s8158_s3 + $0x264] sm:$0xf]  ;;  %v5656_v51 = vld [vmem:[%s8158_s3 + $0x8c] sm:$0xf] }
 0x100   : > { %2823 = vmatpush.bf16.msra.mxu0 %v5101_v53  ;;  %v5020_v53 = vld [vmem:[%s8158_s3 + $0x340] sm:$0xf] }
 0x101   : > { %2839 = vmatpush.bf16.msrb.mxu3 %v4689_v58  ;;  %v1757_v58 = vadd.f32 %v1756_v20, %v1743_v40  ;;  %v4693_v20 = vor.u32 %v5662_v14, %v4692_v12 }
 0x102   : > { %v1798_v42 = vpop.f32.mrf.mxu0 }
 0x103   : > { %2854 = vmatpush.bf16.msrb.mxu1 %v4801_v9  ;;  %v1772_v3 = vpop.f32.mrf.mxu3  ;;  %v1771_v9 = vadd.f32 %v1770_v31, %v1757_v58  ;;  %v5690_v58 = vld [vmem:[%s8158_s3 + $0x194] sm:$0xf0] }
 0x104   : > { %v1773_v55 = vadd.f32 %v1772_v3, %v1759_v61  ;;  %v5646_v61 = vld [vmem:[%s8158_s3 + $0x34] sm:$0xf0]  ;;  %v4805_v3 = vor.u32 %v5690_v58, %v4804_v57 }
 0x105   : > { %2840 = vmatpush.bf16.msrb.mxu3 %v4673_v6  ;;  %v4861_v6 = vor.u32 %v5705_v2, %v4860_v1  ;;  %v5084_v1 = vld [vmem:[%s8158_s3 + $0x3c0] sm:$0xf]  ;;  %v5761_v2 = vld [vmem:[%s8158_s3 + $0x3cc] sm:$0xf0] }
 0x106   : > { %v1786_v13 = vpop.f32.mrf.mxu2  ;;  %v5085_v5 = vor.u32 %v5761_v2, %v5084_v1 }
 0x107   : > { %2855 = vmatpush.bf16.msrb.mxu1 %v4785_v22  ;;  %2816 = vmatpush.bf16.msra.mxu2 %v4861_v6  ;;  %v1787_v19 = vadd.f32 %v1786_v13, %v1773_v55  ;;  %v5702_v22 = vld [vmem:[%s8158_s3 + $0x1f4] sm:$0xf0]  ;;  %v5707_v55 = vld [vmem:[%s8158_s3 + $0x224] sm:$0xf]  ;;  %v4726_v13 = vld [vmem:[%s8158_s3 + $0xf8] sm:$0xf0] }
 0x108   : > { %v4853_v8 = vor.u32 %v5702_v22, %v4852_v21  ;;  %2824 = vmatpush.bf16.msra.mxu0 %v5085_v5  ;;  %v5682_v21 = vld [vmem:[%s8158_s3 + $0x154] sm:$0xf0] }
 0x109   : > { %2841 = vmatpush.bf16.msrb.mxu3 %v4657_v17  ;;  %v1785_v17 = vadd.f32 %v1784_v41, %v1771_v9  ;;  %v4661_v41 = vor.u32 %v5654_v36, %v4660_v35  ;;  %v5642_v9 = vld [vmem:[%s8158_s3 + $0x14] sm:$0xf0]  ;;  %v4713_v36 = vor.u32 %v5664_v24, %v4710_v27  ;;  %v4806_v27 = vld [vmem:[%s8158_s3 + $0x198] sm:$0xf0] }
 0x10a   : > { %v1800_v25 = vpop.f32.mrf.mxu0  ;;  %v5678_v35 = vld [vmem:[%s8158_s3 + $0x134] sm:$0xf0] }
 0x10b   : > { %2856 = vmatpush.bf16.msrb.mxu1 %v4769_v33  ;;  %2865 = vmatpush.bf16.msrb.mxu2 %v4977_v10  ;;  %v1799_v28 = vadd.f32 %v1798_v42, %v1785_v17  ;;  %v4836_v33 = vld [vmem:[%s8158_s3 + $0x1c8] sm:$0xf]  ;;  %v5668_v10 = vld [vmem:[%s8158_s3 + $0xec] sm:$0xf] }
 0x10c   : > { %v4837_v40 = vor.u32 %v5698_v34, %v4836_v33  ;;  %v4788_v42 = vld [vmem:[%s8158_s3 + $0x168] sm:$0xf]  ;;  %v4729_v22 = vor.u32 %v5668_v10, %v4726_v13  ;;  %v4822_v13 = vld [vmem:[%s8158_s3 + $0x1b8] sm:$0xf0] }
 0x10d   : > { %2842 = vmatpush.bf16.msrb.mxu3 %v4641_v29  ;;  %v1801_v29 = vadd.f32 %v1800_v25, %v1787_v19  ;;  %v4789_v17 = vor.u32 %v5686_v7, %v4788_v42  ;;  %v4613_v19 = vor.u32 %v5642_v9, %v4612_v4  ;;  %v5703_v25 = vld [vmem:[%s8158_s3 + $0x204] sm:$0xf]  ;;  %v4756_v34 = vld [vmem:[%s8158_s3 + $0x128] sm:$0xf]  ;;  %v4662_v42 = vld [vmem:[%s8158_s3 + $0x78] sm:$0xf0] }
 0x10e   : > { %v5741_v7 = vld [vmem:[%s8158_s3 + $0x32c] sm:$0xf0] }
 0x10f   : > { %2857 = vmatpush.bf16.msrb.mxu1 %v4753_v37  ;;  %2866 = vmatpush.bf16.msrb.mxu2 %v4961_v18  ;;  %v7617_v31 = vpack.c.bf16 %v1801_v29, %v1799_v28  ;;  %v4910_v37 = vld [vmem:[%s8158_s3 + $0x270] sm:$0xf0]  ;;  %v5069_v18 = vor.u32 %v5757_v16, %v5068_v15  ;;  %v4865_v28 = vor.u32 %v5703_v25, %v4862_v26  ;;  %v5052_v29 = vld [vmem:[%s8158_s3 + $0x380] sm:$0xf]  ;;  %v4646_v15 = vld [vmem:[%s8158_s3 + $0x58] sm:$0xf0] }
 0x110   : > { %v4913_v48 = vor.u32 %v5715_v47, %v4910_v37  ;;  %v582_v47 = vperm.slane %v7324_v23, 2  ;;  %v4697_v37 = vor.u32 %v5660_v54, %v4694_v38  ;;  %v5688_v26 = vld [vmem:[%s8158_s3 + $0x18c] sm:$0xf] }
 0x111   : > { %2843 = vmatpush.bf16.msrb.mxu3 %v4625_v43  ;;  %2803 = vmatmul.bf16.vlgmr.msra.gmra.mxu1 %v7617_v31  ;;  %v4820_v43 = vld [vmem:[%s8158_s3 + $0x1a8] sm:$0xf] }
 0x112   : > { %v4821_v52 = vor.u32 %v5694_v60, %v4820_v43  ;;  %2825 = vmatpush.bf16.msra.mxu0 %v5069_v18  ;;  %v4740_v60 = vld [vmem:[%s8158_s3 + $0x108] sm:$0xf]  ;;  %v5737_v18 = vld [vmem:[%s8158_s3 + $0x30c] sm:$0xf0] }
 0x113   : > { %2858 = vmatpush.bf16.msrb.mxu1 %v4737_v0  ;;  %2867 = vmatpush.bf16.msrb.mxu2 %v4945_v30  ;;  %v1812_v12 = vpop.f32.mrf.mxu1  ;;  %v5753_v30 = vld [vmem:[%s8158_s3 + $0x38c] sm:$0xf0]  ;;  %v4741_v23 = vor.u32 %v5674_v44, %v4740_v60  ;;  %v5640_v60 = vld [vmem:[%s8158_s3 + $0xc] sm:$0xf]  ;;  %v4614_v44 = vld [vmem:[%s8158_s3 + $0x18] sm:$0xf0] }
 0x115   : > { %2844 = vmatpush.bf16.msrb.mxu3 %v4609_v59  ;;  %v4628_v59 = vld [vmem:[%s8158_s3 + $0x28] sm:$0xf] }
 0x116   : > { %v4629_v6 = vor.u32 %v5646_v61, %v4628_v59  ;;  %v7731_v50 = vpop.f32.mrf.mxu0  ;;  %v1813_v61 = vadd.f32 %v1812_v12, %v582_v47  ;;  %v5692_v12 = vld [vmem:[%s8158_s3 + $0x1ac] sm:$0xf] }
 0x117   : > { %2907 = vmatpush.bf16.msra.mxu1 %v4853_v8  ;;  %2868 = vmatpush.bf16.msrb.mxu2 %v4929_v39  ;;  %v4757_v39 = vor.u32 %v5678_v35, %v4756_v34  ;;  %v4809_v34 = vor.u32 %v5688_v26, %v4806_v27  ;;  %v5759_v35 = vld [vmem:[%s8158_s3 + $0x3c4] sm:$0xf]  ;;  %v4932_v26 = vld [vmem:[%s8158_s3 + $0x288] sm:$0xf]  ;;  %v5722_v27 = vld [vmem:[%s8158_s3 + $0x294] sm:$0xf0] }
 0x118   : > { %2845 = vmatmul.bf16.vlgmr.msrb.gmra.mxu3 %v7450_v45 }
 0x119   : > { %2893 = vmatpush.bf16.msra.mxu3 %v4725_v62  ;;  %v5711_v62 = vld [vmem:[%s8158_s3 + $0x244] sm:$0xf] }
 0x11a   : > { %v4897_v0 = vor.u32 %v5711_v62, %v4894_v63  ;;  %v5696_v63 = vld [vmem:[%s8158_s3 + $0x1cc] sm:$0xf] }
 0x11b   : > { %2908 = vmatpush.bf16.msra.mxu1 %v4837_v40  ;;  %2869 = vmatpush.bf16.msrb.mxu2 %v4913_v48  ;;  %v1826_v33 = vpop.f32.mrf.mxu3  ;;  %v5036_v40 = vld [vmem:[%s8158_s3 + $0x360] sm:$0xf]  ;;  %v1814_v43 = vpop.f32.mrf.mxu1  ;;  %v5700_v48 = vld [vmem:[%s8158_s3 + $0x1ec] sm:$0xf] }
 0x11c   : > { %v4857_v58 = vor.u32 %v5700_v48, %v4854_v49  ;;  %v1815_v5 = vadd.f32 %v1814_v43, %v582_v47  ;;  %v5755_v48 = vld [vmem:[%s8158_s3 + $0x3a4] sm:$0xf]  ;;  %v5070_v49 = vld [vmem:[%s8158_s3 + $0x3b0] sm:$0xf0] }
 0x11d   : > { %2894 = vmatpush.bf16.msra.mxu3 %v4709_v11  ;;  %v4878_v11 = vld [vmem:[%s8158_s3 + $0x230] sm:$0xf0] }
 0x11e   : > { %v4881_v14 = vor.u32 %v5707_v55, %v4878_v11  ;;  %v1842_v57 = vpop.f32.mrf.mxu0  ;;  %v1854_v1 = vpop.f32.mrf.mxu2  ;;  %v1827_v55 = vadd.f32 %v1826_v33, %v1813_v61  ;;  %v4980_v61 = vld [vmem:[%s8158_s3 + $0x2e8] sm:$0xf] }
 0x11f   : > { %2909 = vmatpush.bf16.msra.mxu1 %v4821_v52  ;;  %2870 = vmatpush.bf16.msrb.mxu2 %v4897_v0  ;;  %v4678_v52 = vld [vmem:[%s8158_s3 + $0x98] sm:$0xf0] }
 0x120   : > { %v4681_v62 = vor.u32 %v5656_v51, %v4678_v52  ;;  %v4838_v0 = vld [vmem:[%s8158_s3 + $0x1d8] sm:$0xf0]  ;;  %v1841_v24 = vadd.f32 %v7731_v50, %v1827_v55  ;;  %v4964_v55 = vld [vmem:[%s8158_s3 + $0x2c8] sm:$0xf] }
 0x121   : > { %2895 = vmatpush.bf16.msra.mxu3 %v4693_v20  ;;  %v4772_v20 = vld [vmem:[%s8158_s3 + $0x148] sm:$0xf]  ;;  %2859 = vmatmul.bf16.vlgmr.msrb.gmra.mxu1 %v7617_v31  ;;  %v4841_v9 = vor.u32 %v5696_v63, %v4838_v0  ;;  %v4630_v50 = vld [vmem:[%s8158_s3 + $0x38] sm:$0xf0] }
 0x122   : > { %v4773_v8 = vor.u32 %v5682_v21, %v4772_v20  ;;  %v5763_v21 = vld [vmem:[%s8158_s3 + $0x3e4] sm:$0xf]  ;;  %v1855_v54 = vadd.f32 %v1854_v1, %v1841_v24 }
 0x123   : > { %2910 = vmatpush.bf16.msra.mxu1 %v4805_v3  ;;  %2871 = vmatpush.bf16.msrb.mxu2 %v4881_v14  ;;  %v1828_v2 = vpop.f32.mrf.mxu3  ;;  %v5652_v3 = vld [vmem:[%s8158_s3 + $0x6c] sm:$0xf]  ;;  %v5751_v1 = vld [vmem:[%s8158_s3 + $0x384] sm:$0xf] }
 0x124   : > { %v4665_v11 = vor.u32 %v5652_v3, %v4662_v42  ;;  %v5648_v14 = vld [vmem:[%s8158_s3 + $0x4c] sm:$0xf]  ;;  %v1829_v16 = vadd.f32 %v1828_v2, %v1815_v5  ;;  %v5054_v2 = vld [vmem:[%s8158_s3 + $0x390] sm:$0xf0] }
 0x125   : > { %2896 = vmatpush.bf16.msra.mxu3 %v4677_v32  ;;  %v5053_v32 = vor.u32 %v5753_v30, %v5052_v29  ;;  %v4649_v25 = vor.u32 %v5648_v14, %v4646_v15  ;;  %v5676_v5 = vld [vmem:[%s8158_s3 + $0x12c] sm:$0xf]  ;;  %v5038_v14 = vld [vmem:[%s8158_s3 + $0x370] sm:$0xf0] }
 0x126   : > { %v1896_v29 = vpop.f32.mrf.mxu0  ;;  %v1856_v33 = vpop.f32.mrf.mxu2  ;;  %v5672_v15 = vld [vmem:[%s8158_s3 + $0x10c] sm:$0xf] }
 0x127   : > { %2911 = vmatpush.bf16.msra.mxu1 %v4789_v17  ;;  %2826 = vmatpush.bf16.msra.mxu0 %v5053_v32  ;;  %v4988_v17 = vld [vmem:[%s8158_s3 + $0x300] sm:$0xf]  ;;  %v1843_v32 = vadd.f32 %v1842_v57, %v1829_v16  ;;  %v5073_v57 = vor.u32 %v5755_v48, %v5070_v49 }
 0x128   : > { %2872 = vmatpush.bf16.msrb.mxu2 %v4865_v28  ;;  %v4989_v20 = vor.u32 %v5737_v18, %v4988_v17  ;;  %v4948_v18 = vld [vmem:[%s8158_s3 + $0x2a8] sm:$0xf] }
 0x129   : > { %2897 = vmatpush.bf16.msra.mxu3 %v4661_v41  ;;  %v5749_v41 = vld [vmem:[%s8158_s3 + $0x36c] sm:$0xf0] }
 0x12a   : > { %v5037_v46 = vor.u32 %v5749_v41, %v5036_v40  ;;  %v4790_v40 = vld [vmem:[%s8158_s3 + $0x178] sm:$0xf0] }
 0x12b   : > { %2912 = vmatpush.bf16.msra.mxu1 %v4773_v8  ;;  %v5644_v8 = vld [vmem:[%s8158_s3 + $0x2c] sm:$0xf] }
 0x12c   : > { %2827 = vmatpush.bf16.msra.mxu0 %v5037_v46  ;;  %v4633_v38 = vor.u32 %v5644_v8, %v4630_v50  ;;  %v1857_v46 = vadd.f32 %v1856_v33, %v1843_v32  ;;  %v4933_v32 = vor.u32 %v5722_v27, %v4932_v26  ;;  %v4916_v33 = vld [vmem:[%s8158_s3 + $0x268] sm:$0xf] }
 0x12d   : > { %2898 = vmatpush.bf16.msra.mxu3 %v4645_v56  ;;  %v5745_v56 = vld [vmem:[%s8158_s3 + $0x34c] sm:$0xf0] }
 0x12e   : > { %v5021_v59 = vor.u32 %v5745_v56, %v5020_v53  ;;  %v5680_v53 = vld [vmem:[%s8158_s3 + $0x14c] sm:$0xf]  ;;  %v4774_v56 = vld [vmem:[%s8158_s3 + $0x158] sm:$0xf0]  ;;  %v1898_v63 = vpop.f32.mrf.mxu0 }
 0x12f   : > { %2913 = vmatpush.bf16.msra.mxu1 %v4757_v39  ;;  %v5684_v39 = vld [vmem:[%s8158_s3 + $0x16c] sm:$0xf]  ;;  %v4777_v0 = vor.u32 %v5680_v53, %v4774_v56 }
 0x130   : > { %2828 = vmatpush.bf16.msra.mxu0 %v5021_v59  ;;  %v5732_v56 = vld [vmem:[%s8158_s3 + $0x2ec] sm:$0xf] }
 0x131   : > { %2899 = vmatpush.bf16.msra.mxu3 %v4629_v6  ;;  %v5004_v6 = vld [vmem:[%s8158_s3 + $0x320] sm:$0xf] }
 0x132   : > { %v5005_v10 = vor.u32 %v5741_v7, %v5004_v6  ;;  %v4758_v6 = vld [vmem:[%s8158_s3 + $0x138] sm:$0xf0]  ;;  %v5057_v7 = vor.u32 %v5751_v1, %v5054_v2  ;;  %v5728_v2 = vld [vmem:[%s8158_s3 + $0x2cc] sm:$0xf] }
 0x133   : > { %2914 = vmatpush.bf16.msra.mxu1 %v4741_v23  ;;  %v1868_v4 = vpop.f32.mrf.mxu1  ;;  %v4617_v23 = vor.u32 %v5640_v60, %v4614_v44 }
 0x134   : > { %2829 = vmatpush.bf16.msra.mxu0 %v5005_v10  ;;  %v1869_v47 = vadd.f32 %v1868_v4, %v1855_v54 }
 0x135   : > { %2900 = vmatpush.bf16.msra.mxu3 %v4613_v19  ;;  %v4825_v19 = vor.u32 %v5692_v12, %v4822_v13  ;;  %v4761_v12 = vor.u32 %v5676_v5, %v4758_v6  ;;  %v5747_v13 = vld [vmem:[%s8158_s3 + $0x364] sm:$0xf] }
 0x136   : > { %2915 = vmatmul.bf16.vlgmr.msra.gmra.mxu1 %v7617_v31  ;;  %v5041_v16 = vor.u32 %v5747_v13, %v5038_v14 }
 0x137   : > { %2963 = vmatpush.bf16.msrb.mxu1 %v4857_v58 }
 0x138   : > { %2901 = vmatmul.bf16.vlgmr.msra.gmra.mxu3 %v7450_v45  ;;  %2830 = vmatpush.bf16.msra.mxu0 %v4989_v20  ;;  %v5743_v20 = vld [vmem:[%s8158_s3 + $0x344] sm:$0xf] }
 0x139   : > { %2949 = vmatpush.bf16.msrb.mxu3 %v4729_v22  ;;  %v5102_v22 = vld [vmem:[%s8158_s3 + $0x3f0] sm:$0xf0] }
 0x13a   : > { %v5105_v28 = vor.u32 %v5763_v21, %v5102_v22  ;;  %v5022_v21 = vld [vmem:[%s8158_s3 + $0x350] sm:$0xf0] }
 0x13b   : > { %2964 = vmatpush.bf16.msrb.mxu1 %v4841_v9  ;;  %v1882_v30 = vpop.f32.mrf.mxu3  ;;  %v1870_v43 = vpop.f32.mrf.mxu1  ;;  %v5025_v24 = vor.u32 %v5743_v20, %v5022_v21 }
 0x13c   : > { %2879 = vmatpush.bf16.msrb.mxu0 %v5105_v28  ;;  %v1883_v51 = vadd.f32 %v1882_v30, %v1869_v47  ;;  %v1871_v52 = vadd.f32 %v1870_v43, %v1857_v46  ;;  %v5739_v28 = vld [vmem:[%s8158_s3 + $0x324] sm:$0xf]  ;;  %v1924_v30 = vpop.f32.mrf.mxu0  ;;  %v4884_v46 = vld [vmem:[%s8158_s3 + $0x228] sm:$0xf]  ;;  %v5710_v47 = vld [vmem:[%s8158_s3 + $0x234] sm:$0xf0] }
 0x13d   : > { %2950 = vmatpush.bf16.msrb.mxu3 %v4713_v36  ;;  %v5086_v36 = vld [vmem:[%s8158_s3 + $0x3d0] sm:$0xf0]  ;;  %v4885_v49 = vor.u32 %v5710_v47, %v4884_v46  ;;  %v5754_v46 = vld [vmem:[%s8158_s3 + $0x394] sm:$0xf0] }
 0x13e   : > { %v5089_v41 = vor.u32 %v5759_v35, %v5086_v36  ;;  %v1897_v3 = vadd.f32 %v1896_v29, %v1883_v51  ;;  %v7893_v10 = vpop.f32.mrf.mxu2  ;;  %v5006_v29 = vld [vmem:[%s8158_s3 + $0x330] sm:$0xf0]  ;;  %v5735_v35 = vld [vmem:[%s8158_s3 + $0x304] sm:$0xf]  ;;  %v4868_v51 = vld [vmem:[%s8158_s3 + $0x208] sm:$0xf] }
 0x13f   : > { %2965 = vmatpush.bf16.msrb.mxu1 %v4825_v19  ;;  %v5726_v19 = vld [vmem:[%s8158_s3 + $0x2b4] sm:$0xf0]  ;;  %v5009_v50 = vor.u32 %v5739_v28, %v5006_v29  ;;  %v4990_v36 = vld [vmem:[%s8158_s3 + $0x310] sm:$0xf0] }
 0x140   : > { %2880 = vmatpush.bf16.msrb.mxu0 %v5089_v41  ;;  %v4993_v54 = vor.u32 %v5735_v35, %v4990_v36 }
 0x141   : > { %2951 = vmatpush.bf16.msrb.mxu3 %v4697_v37  ;;  %v4793_v37 = vor.u32 %v5684_v39, %v4790_v40  ;;  %v5714_v39 = vld [vmem:[%s8158_s3 + $0x254] sm:$0xf0] }
 0x143   : > { %2966 = vmatpush.bf16.msrb.mxu1 %v4809_v34  ;;  %v1884_v58 = vpop.f32.mrf.mxu3  ;;  %v5718_v34 = vld [vmem:[%s8158_s3 + $0x274] sm:$0xf0] }
 0x144   : > { %v1885_v59 = vadd.f32 %v1884_v58, %v1871_v52  ;;  %2881 = vmatpush.bf16.msrb.mxu0 %v5073_v57  ;;  %v1926_v60 = vpop.f32.mrf.mxu0  ;;  %v5706_v52 = vld [vmem:[%s8158_s3 + $0x214] sm:$0xf0]  ;;  %v4982_v57 = vld [vmem:[%s8158_s3 + $0x2f8] sm:$0xf0] }
 0x145   : > { %2952 = vmatpush.bf16.msrb.mxu3 %v4681_v62  ;;  %v5734_v62 = vld [vmem:[%s8158_s3 + $0x2f4] sm:$0xf0] }
 0x146   : > { %v1899_v42 = vadd.f32 %v1898_v63, %v1885_v59  ;;  %v4981_v4 = vor.u32 %v5734_v62, %v4980_v61  ;;  %v1912_v8 = vpop.f32.mrf.mxu2  ;;  %v4869_v59 = vor.u32 %v5706_v52, %v4868_v51  ;;  %v4985_v63 = vor.u32 %v5732_v56, %v4982_v57  ;;  %v5028_v52 = vld [vmem:[%s8158_s3 + $0x348] sm:$0xf]  ;;  %v5742_v57 = vld [vmem:[%s8158_s3 + $0x334] sm:$0xf0] }
 0x147   : > { %2967 = vmatpush.bf16.msrb.mxu1 %v4793_v37  ;;  %v5890_v37 = vld [vmem:[%s8157_s2] sm:$0xf]  ;;  %v5012_v56 = vld [vmem:[%s8158_s3 + $0x328] sm:$0xf] }
 0x148   : > { %v7891_v9 = vpack.c.bf16 %v1899_v42, %v1897_v3  ;;  %2882 = vmatpush.bf16.msrb.mxu0 %v5057_v7  ;;  %v583_v48 = vperm.slane %v5890_v37, 3  ;;  %v4966_v3 = vld [vmem:[%s8158_s3 + $0x2d8] sm:$0xf0] }
 0x149   : > { %2953 = vmatpush.bf16.msrb.mxu3 %v4665_v11  ;;  %v5730_v11 = vld [vmem:[%s8158_s3 + $0x2d4] sm:$0xf0]  ;;  %v4969_v7 = vor.u32 %v5728_v2, %v4966_v3  ;;  %v5094_v2 = vld [vmem:[%s8158_s3 + $0x3d8] sm:$0xf0] }
 0x14a   : > { %2817 = vmatmul.bf16.vlgmr.msra.gmra.mxu2 %v7891_v9  ;;  %v4965_v17 = vor.u32 %v5730_v11, %v4964_v55  ;;  %v1913_v53 = vadd.f32 %v1912_v8, %v583_v48  ;;  %v5724_v55 = vld [vmem:[%s8158_s3 + $0x2ac] sm:$0xf]  ;;  %v4950_v11 = vld [vmem:[%s8158_s3 + $0x2b8] sm:$0xf0] }
 0x14b   : > { %2968 = vmatpush.bf16.msrb.mxu1 %v4777_v0  ;;  %2921 = vmatpush.bf16.msra.mxu2 %v4981_v4  ;;  %v4953_v13 = vor.u32 %v5724_v55, %v4950_v11  ;;  %v5712_v8 = vld [vmem:[%s8158_s3 + $0x24c] sm:$0xf]  ;;  %v5046_v11 = vld [vmem:[%s8158_s3 + $0x378] sm:$0xf0] }
 0x14c   : > { %2883 = vmatpush.bf16.msrb.mxu0 %v5041_v16  ;;  %v1927_v1 = vadd.f32 %v1926_v60, %v1913_v53  ;;  %v4934_v16 = vld [vmem:[%s8158_s3 + $0x298] sm:$0xf0]  ;;  %v5748_v55 = vld [vmem:[%s8158_s3 + $0x36c] sm:$0xf] }
 0x14d   : > { %2954 = vmatpush.bf16.msrb.mxu3 %v4649_v25  ;;  %v4949_v25 = vor.u32 %v5726_v19, %v4948_v18  ;;  %v5716_v19 = vld [vmem:[%s8158_s3 + $0x26c] sm:$0xf]  ;;  %v4870_v60 = vld [vmem:[%s8158_s3 + $0x218] sm:$0xf0] }
 0x14f   : > { %2969 = vmatpush.bf16.msrb.mxu1 %v4761_v12  ;;  %2922 = vmatpush.bf16.msra.mxu2 %v4965_v17 }
 0x150   : > { %2884 = vmatpush.bf16.msrb.mxu0 %v5025_v24  ;;  %v5108_v24 = vld [vmem:[%s8158_s3 + $0x3e8] sm:$0xf] }
 0x151   : > { %2955 = vmatpush.bf16.msrb.mxu3 %v4633_v38  ;;  %v4900_v38 = vld [vmem:[%s8158_s3 + $0x248] sm:$0xf] }
 0x152   : > { %v4901_v43 = vor.u32 %v5714_v39, %v4900_v38  ;;  %v5076_v38 = vld [vmem:[%s8158_s3 + $0x3a8] sm:$0xf]  ;;  %v5758_v39 = vld [vmem:[%s8158_s3 + $0x3b4] sm:$0xf0] }
 0x153   : > { %2923 = vmatpush.bf16.msra.mxu2 %v4949_v25  ;;  %v1938_v40 = vpop.f32.mrf.mxu1  ;;  %v5766_v25 = vld [vmem:[%s8158_s3 + $0x3f4] sm:$0xf0] }
 0x154   : > { %2885 = vmatpush.bf16.msrb.mxu0 %v5009_v50 }
 0x155   : > { %2956 = vmatpush.bf16.msrb.mxu3 %v4617_v23  ;;  %v1911_v23 = vadd.f32 %v7893_v10, %v583_v48  ;;  %v5044_v48 = vld [vmem:[%s8158_s3 + $0x368] sm:$0xf] }
 0x157   : > { %2924 = vmatpush.bf16.msra.mxu2 %v4933_v32  ;;  %v1925_v0 = vadd.f32 %v1924_v30, %v1911_v23  ;;  %v5109_v30 = vor.u32 %v5766_v25, %v5108_v24  ;;  %v4902_v32 = vld [vmem:[%s8158_s3 + $0x258] sm:$0xf0]  ;;  %v5746_v23 = vld [vmem:[%s8158_s3 + $0x354] sm:$0xf0]  ;;  %v5164_v25 = vld [vmem:[#allocation2 + $0x60] sm:$0xf] }
 0x158   : > { %2957 = vmatmul.bf16.vlgmr.msrb.gmra.mxu3 %v7450_v45  ;;  %v4742_v45 = vld [vmem:[%s8158_s3 + $0x118] sm:$0xf0]  ;;  %2886 = vmatpush.bf16.msrb.mxu0 %v4993_v54  ;;  %v4905_v35 = vor.u32 %v5712_v8, %v4902_v32  ;;  %v5708_v54 = vld [vmem:[%s8158_s3 + $0x22c] sm:$0xf]  ;;  %v5029_v53 = vor.u32 %v5746_v23, %v5028_v52  ;;  %v5148_v8 = vld [vmem:[#allocation2 + $0x40] sm:$0xf] }
 0x159   : > { %v4745_v22 = vor.u32 %v5672_v15, %v4742_v45  ;;  %v1939_v5 = vadd.f32 %v1938_v40, %v1925_v0  ;;  %v5720_v45 = vld [vmem:[%s8158_s3 + $0x28c] sm:$0xf]  ;;  %v5776_v32 = vld [vmem:[#allocation2 + $0x44] sm:$0xf0]  ;;  %v5212_v23 = vld [vmem:[#allocation2 + $0xc0] sm:$0xf] }
 0x15a   : > { %2873 = vmatmul.bf16.vlgmr.msrb.gmra.mxu2 %v7891_v9  ;;  %v1980_v62 = vpop.f32.mrf.mxu0  ;;  %v4937_v18 = vor.u32 %v5720_v45, %v4934_v16  ;;  %v5740_v45 = vld [vmem:[%s8158_s3 + $0x32c] sm:$0xf]  ;;  %v5014_v16 = vld [vmem:[%s8158_s3 + $0x338] sm:$0xf0]  ;;  %v5768_v52 = vld [vmem:[#allocation2 + $0x4] sm:$0xf0] }
 0x15b   : > { %2970 = vmatpush.bf16.msrb.mxu1 %v4745_v22  ;;  %v1952_v44 = vpop.f32.mrf.mxu3  ;;  %v1940_v61 = vpop.f32.mrf.mxu1  ;;  %v4918_v22 = vld [vmem:[%s8158_s3 + $0x278] sm:$0xf0] }
 0x15c   : > { %v1941_v6 = vadd.f32 %v1940_v61, %v1927_v1  ;;  %v1953_v4 = vadd.f32 %v1952_v44, %v1939_v5  ;;  %v4921_v29 = vor.u32 %v5716_v19, %v4918_v22  ;;  %v5060_v44 = vld [vmem:[%s8158_s3 + $0x388] sm:$0xf]  ;;  %v5764_v61 = vld [vmem:[%s8158_s3 + $0x3ec] sm:$0xf]  ;;  %v5078_v5 = vld [vmem:[%s8158_s3 + $0x3b8] sm:$0xf0] }
 0x15d   : > { %v5061_v37 = vor.u32 %v5754_v46, %v5060_v44  ;;  %v5760_v1 = vld [vmem:[%s8158_s3 + $0x3cc] sm:$0xf]  ;;  %v4998_v19 = vld [vmem:[%s8158_s3 + $0x318] sm:$0xf0]  ;;  %v5782_v22 = vld [vmem:[#allocation2 + $0x74] sm:$0xf0] }
 0x15e   : > { %2971 = vmatmul.bf16.vlgmr.msrb.gmra.mxu1 %v7617_v31  ;;  %v4917_v31 = vor.u32 %v5718_v34, %v4916_v33  ;;  %v1966_v41 = vpop.f32.mrf.mxu2  ;;  %v5092_v33 = vld [vmem:[%s8158_s3 + $0x3c8] sm:$0xf]  ;;  %v5762_v34 = vld [vmem:[%s8158_s3 + $0x3d4] sm:$0xf0]  ;;  %v5097_v3 = vor.u32 %v5760_v1, %v5094_v2  ;;  %v5124_v44 = vld [vmem:[#allocation2 + $0x10] sm:$0xf] }
 0x15f   : > { %v1967_v14 = vadd.f32 %v1966_v41, %v1953_v4  ;;  %v5093_v36 = vor.u32 %v5762_v34, %v5092_v33  ;;  %v5077_v41 = vor.u32 %v5758_v39, %v5076_v38  ;;  %v5062_v4 = vld [vmem:[%s8158_s3 + $0x398] sm:$0xf0]  ;;  %v5149_v33 = vor.u32 %v5776_v32, %v5148_v8  ;;  %v5140_v34 = vld [vmem:[#allocation2 + $0x30] sm:$0xf]  ;;  %v5132_v38 = vld [vmem:[#allocation2 + $0x20] sm:$0xf] }
 0x160   : > { %2925 = vmatpush.bf16.msra.mxu2 %v4917_v31  ;;  %v4886_v31 = vld [vmem:[%s8158_s3 + $0x238] sm:$0xf0]  ;;  %v5772_v39 = vld [vmem:[#allocation2 + $0x24] sm:$0xf0]  ;;  %v5770_v46 = vld [vmem:[#allocation2 + $0x14] sm:$0xf0] }
 0x161   : > { %v1981_v20 = vadd.f32 %v1980_v62, %v1967_v14  ;;  %v4889_v40 = vor.u32 %v5708_v54, %v4886_v31  ;;  %v5110_v62 = vld [vmem:[%s8158_s3 + $0x3f8] sm:$0xf0]  ;;  %v5798_v54 = vld [vmem:[#allocation2 + $0xf4] sm:$0xf0]  ;;  %v5779_v2 = vld [vmem:[#allocation2 + $0x64] sm:$0xf] }
 0x162   : > { %v1982_v17 = vpop.f32.mrf.mxu0  ;;  %v5113_v0 = vor.u32 %v5764_v61, %v5110_v62  ;;  %v5030_v14 = vld [vmem:[%s8158_s3 + $0x358] sm:$0xf0]  ;;  %v5204_v61 = vld [vmem:[#allocation2 + $0xb0] sm:$0xf]  ;;  %v5790_v62 = vld [vmem:[#allocation2 + $0xb4] sm:$0xf0] }
 0x163   : > { %v1954_v42 = vpop.f32.mrf.mxu3  ;;  %v5814_v1 = vld [vmem:[#allocation2 + $0x174] sm:$0xf0] }
 0x164   : > { %2926 = vmatpush.bf16.msra.mxu2 %v4901_v43  ;;  %v1955_v10 = vadd.f32 %v1954_v42, %v1941_v6  ;;  %v5704_v43 = vld [vmem:[%s8158_s3 + $0x20c] sm:$0xf] }
 0x165   : > { %v4873_v47 = vor.u32 %v5704_v43, %v4870_v60  ;;  %v5756_v42 = vld [vmem:[%s8158_s3 + $0x3ac] sm:$0xf]  ;;  %v5796_v43 = vld [vmem:[#allocation2 + $0xe4] sm:$0xf0] }
 0x166   : > { %v1968_v58 = vpop.f32.mrf.mxu2  ;;  %v5081_v6 = vor.u32 %v5756_v42, %v5078_v5 }
 0x167   : > { %v1969_v15 = vadd.f32 %v1968_v58, %v1955_v10  ;;  %v5013_v58 = vor.u32 %v5742_v57, %v5012_v56  ;;  %v5792_v56 = vld [vmem:[#allocation2 + $0xc4] sm:$0xf0]  ;;  %v5781_v57 = vld [vmem:[#allocation2 + $0x74] sm:$0xf] }
 0x168   : > { %2927 = vmatpush.bf16.msra.mxu2 %v4885_v49  ;;  %v5750_v49 = vld [vmem:[%s8158_s3 + $0x374] sm:$0xf0] }
 0x169   : > { %v1983_v21 = vadd.f32 %v1982_v17, %v1969_v15  ;;  %v5045_v51 = vor.u32 %v5750_v49, %v5044_v48  ;;  %v5017_v17 = vor.u32 %v5740_v45, %v5014_v16  ;;  %v5794_v48 = vld [vmem:[#allocation2 + $0xd4] sm:$0xf0]  ;;  %v5284_v16 = vld [vmem:[#allocation2 + $0x150] sm:$0xf] }
 0x16a   : > { %v5786_v45 = vld [vmem:[#allocation2 + $0x94] sm:$0xf0] }
 0x16c   : > { %2928 = vmatpush.bf16.msra.mxu2 %v4869_v59  ;;  %v4996_v59 = vld [vmem:[%s8158_s3 + $0x308] sm:$0xf] }
 0x16e   : > { %v1994_v12 = vpop.f32.mrf.mxu2 }
 0x16f   : > { %2929 = vmatmul.bf16.vlgmr.msra.gmra.mxu2 %v7891_v9  ;;  %v1995_v27 = vadd.f32 %v1994_v12, %v1981_v20  ;;  %v5049_v12 = vor.u32 %v5748_v55, %v5046_v11  ;;  %v5777_v55 = vld [vmem:[#allocation2 + $0x54] sm:$0xf]  ;;  %v5158_v11 = vld [vmem:[#allocation2 + $0x58] sm:$0xf0] }
 0x170   : > { %2977 = vmatpush.bf16.msrb.mxu2 %v4985_v63 }
 0x174   : > { %2978 = vmatpush.bf16.msrb.mxu2 %v4969_v7  ;;  %v5752_v7 = vld [vmem:[%s8158_s3 + $0x38c] sm:$0xf] }
 0x175   : > { %v5065_v10 = vor.u32 %v5752_v7, %v5062_v4  ;;  %v5788_v7 = vld [vmem:[#allocation2 + $0xa4] sm:$0xf0]  ;;  %v5292_v4 = vld [vmem:[#allocation2 + $0x160] sm:$0xf] }
 0x176   : > { %v1996_v26 = vpop.f32.mrf.mxu2 }
 0x177   : > { %v1997_v28 = vadd.f32 %v1996_v26, %v1983_v21  ;;  %v5172_v21 = vld [vmem:[#allocation2 + $0x70] sm:$0xf]  ;;  %v5780_v26 = vld [vmem:[#allocation2 + $0x64] sm:$0xf0] }
 0x178   : > { %2979 = vmatpush.bf16.msrb.mxu2 %v4953_v13  ;;  %v5744_v13 = vld [vmem:[%s8158_s3 + $0x34c] sm:$0xf]  ;;  %v5173_v24 = vor.u32 %v5782_v22, %v5172_v21 }
 0x179   : > { %v8015_v50 = vpack.c.bf16 %v1997_v28, %v1995_v27  ;;  %v5033_v15 = vor.u32 %v5744_v13, %v5030_v14  ;;  %v5165_v27 = vor.u32 %v5780_v26, %v5164_v25  ;;  %v5156_v28 = vld [vmem:[#allocation2 + $0x50] sm:$0xf]  ;;  %v5161_v14 = vor.u32 %v5777_v55, %v5158_v11  ;;  %v5784_v25 = vld [vmem:[#allocation2 + $0x84] sm:$0xf0]  ;;  %v5276_v26 = vld [vmem:[#allocation2 + $0x140] sm:$0xf] }
 0x17a   : > { %3399 = vmatpush.bf16.msra.mxu3 %v5173_v24  ;;  %v5180_v24 = vld [vmem:[#allocation2 + $0x80] sm:$0xf]  ;;  %v5830_v55 = vld [vmem:[#allocation2 + $0x1f4] sm:$0xf0]  ;;  %v5789_v11 = vld [vmem:[#allocation2 + $0xb4] sm:$0xf] }
 0x17b   : > { %2831 = vmatmul.bf16.vlgmr.msra.gmra.mxu0 %v8015_v50 }
 0x17c   : > { %2980 = vmatpush.bf16.msrb.mxu2 %v4937_v18  ;;  %2935 = vmatpush.bf16.msra.mxu0 %v5109_v30  ;;  %v5736_v18 = vld [vmem:[%s8158_s3 + $0x30c] sm:$0xf] }
 0x17d   : > { %v5001_v20 = vor.u32 %v5736_v18, %v4998_v19  ;;  %v5810_v18 = vld [vmem:[#allocation2 + $0x154] sm:$0xf0]  ;;  %v5775_v19 = vld [vmem:[#allocation2 + $0x44] sm:$0xf] }
 0x17e   : > { %3400 = vmatpush.bf16.msra.mxu3 %v5165_v27  ;;  %v5285_v21 = vor.u32 %v5810_v18, %v5284_v16  ;;  %v5181_v27 = vor.u32 %v5784_v25, %v5180_v24  ;;  %v5302_v16 = vld [vmem:[#allocation2 + $0x178] sm:$0xf0]  ;;  %v5198_v24 = vld [vmem:[#allocation2 + $0xa8] sm:$0xf0]  ;;  %v5811_v25 = vld [vmem:[#allocation2 + $0x164] sm:$0xf] }
 0x180   : > { %2981 = vmatpush.bf16.msrb.mxu2 %v4921_v29  ;;  %2936 = vmatpush.bf16.msra.mxu0 %v5093_v36  ;;  %v5778_v29 = vld [vmem:[#allocation2 + $0x54] sm:$0xf0]  ;;  %v5236_v36 = vld [vmem:[#allocation2 + $0xf0] sm:$0xf] }
 0x181   : > { %v5157_v30 = vor.u32 %v5778_v29, %v5156_v28  ;;  %v5237_v31 = vor.u32 %v5798_v54, %v5236_v36  ;;  %v5808_v28 = vld [vmem:[#allocation2 + $0x144] sm:$0xf0]  ;;  %v5773_v29 = vld [vmem:[#allocation2 + $0x34] sm:$0xf]  ;;  %v5806_v54 = vld [vmem:[#allocation2 + $0x134] sm:$0xf0] }
 0x182   : > { %v5277_v8 = vor.u32 %v5808_v28, %v5276_v26  ;;  %v5294_v28 = vld [vmem:[#allocation2 + $0x168] sm:$0xf0] }
 0x183   : > { %3401 = vmatpush.bf16.msra.mxu3 %v5157_v30  ;;  %3413 = vmatpush.bf16.msra.mxu1 %v5237_v31  ;;  %v5142_v30 = vld [vmem:[#allocation2 + $0x38] sm:$0xf0] }
 0x184   : > { %2982 = vmatpush.bf16.msrb.mxu2 %v4905_v35  ;;  %2937 = vmatpush.bf16.msra.mxu0 %v5077_v41  ;;  %v5774_v35 = vld [vmem:[#allocation2 + $0x34] sm:$0xf0]  ;;  %v5133_v41 = vor.u32 %v5772_v39, %v5132_v38  ;;  %v5145_v32 = vor.u32 %v5773_v29, %v5142_v30  ;;  %v5771_v38 = vld [vmem:[#allocation2 + $0x24] sm:$0xf]  ;;  %v5134_v39 = vld [vmem:[#allocation2 + $0x28] sm:$0xf0] }
 0x185   : > { %v5348_v29 = vld [vmem:[#allocation2 + $0x1d0] sm:$0xf]  ;;  %v5826_v30 = vld [vmem:[#allocation2 + $0x1d4] sm:$0xf0] }
 0x187   : > { %3402 = vmatpush.bf16.msra.mxu3 %v5149_v33  ;;  %v5797_v33 = vld [vmem:[#allocation2 + $0xf4] sm:$0xf] }
 0x188   : > { %2983 = vmatpush.bf16.msrb.mxu2 %v4889_v40  ;;  %2938 = vmatpush.bf16.msra.mxu0 %v5061_v37  ;;  %v5228_v40 = vld [vmem:[#allocation2 + $0xe0] sm:$0xf]  ;;  %v5125_v37 = vor.u32 %v5770_v46, %v5124_v44  ;;  %v5230_v44 = vld [vmem:[#allocation2 + $0xe8] sm:$0xf0] }
 0x189   : > { %v5229_v60 = vor.u32 %v5796_v43, %v5228_v40  ;;  %v5795_v40 = vld [vmem:[#allocation2 + $0xe4] sm:$0xf] }
 0x18a   : > { %v5233_v46 = vor.u32 %v5795_v40, %v5230_v44 }
 0x18b   : > { %2887 = vmatmul.bf16.vlgmr.msrb.gmra.mxu0 %v8015_v50  ;;  %3414 = vmatpush.bf16.msra.mxu1 %v5229_v60  ;;  %v5137_v60 = vor.u32 %v5771_v38, %v5134_v39  ;;  %v5349_v38 = vor.u32 %v5826_v30, %v5348_v29  ;;  %v5286_v39 = vld [vmem:[#allocation2 + $0x158] sm:$0xf0]  ;;  %v5246_v30 = vld [vmem:[#allocation2 + $0x108] sm:$0xf0] }
 0x18c   : > { %2984 = vmatpush.bf16.msrb.mxu2 %v4873_v47  ;;  %2939 = vmatpush.bf16.msra.mxu0 %v5045_v51  ;;  %v5220_v47 = vld [vmem:[#allocation2 + $0xd0] sm:$0xf]  ;;  %v5116_v51 = vld [vmem:[#allocation2] sm:$0xf] }
 0x18d   : > { %v5221_v49 = vor.u32 %v5794_v48, %v5220_v47  ;;  %v5260_v47 = vld [vmem:[#allocation2 + $0x120] sm:$0xf] }
 0x18e   : > { %v8127_v36 = vpop.f32.mrf.mxu1 }
 0x18f   : > { %2985 = vmatmul.bf16.vlgmr.msrb.gmra.mxu2 %v7891_v9  ;;  %v5738_v9 = vld [vmem:[%s8158_s3 + $0x314] sm:$0xf0]  ;;  %3415 = vmatpush.bf16.msra.mxu1 %v5221_v49  ;;  %v5769_v49 = vld [vmem:[#allocation2 + $0x14] sm:$0xf] }
 0x190   : > { %2940 = vmatpush.bf16.msra.mxu0 %v5029_v53  ;;  %v4997_v63 = vor.u32 %v5738_v9, %v4996_v59  ;;  %v5117_v53 = vor.u32 %v5768_v52, %v5116_v51  ;;  %v5213_v59 = vor.u32 %v5792_v56, %v5212_v23  ;;  %v5126_v51 = vld [vmem:[#allocation2 + $0x18] sm:$0xf0]  ;;  %v5793_v52 = vld [vmem:[#allocation2 + $0xd4] sm:$0xf] }
 0x191   : > { %v5129_v23 = vor.u32 %v5769_v49, %v5126_v51  ;;  %v5824_v49 = vld [vmem:[#allocation2 + $0x1c4] sm:$0xf0] }
 0x193   : > { %3416 = vmatpush.bf16.msra.mxu1 %v5213_v59 }
 0x194   : > { %2941 = vmatpush.bf16.msra.mxu0 %v5013_v58  ;;  %v5174_v58 = vld [vmem:[#allocation2 + $0x78] sm:$0xf0] }
 0x195   : > { %v5177_v9 = vor.u32 %v5781_v57, %v5174_v58  ;;  %v5252_v57 = vld [vmem:[#allocation2 + $0x110] sm:$0xf]  ;;  %v5802_v58 = vld [vmem:[#allocation2 + $0x114] sm:$0xf0] }
 0x196   : > { %v5253_v59 = vor.u32 %v5802_v58, %v5252_v57  ;;  %v5278_v58 = vld [vmem:[#allocation2 + $0x148] sm:$0xf0] }
 0x198   : > { %2942 = vmatpush.bf16.msra.mxu0 %v4997_v63  ;;  %v5300_v63 = vld [vmem:[#allocation2 + $0x170] sm:$0xf] }
 0x199   : > { %v5301_v42 = vor.u32 %v5814_v1, %v5300_v63  ;;  %v2806_v63 = vpop.f32.mrf.mxu1  ;;  %v5214_v1 = vld [vmem:[#allocation2 + $0xc8] sm:$0xf0] }
 0x19b   : > { %2943 = vmatmul.bf16.vlgmr.msra.gmra.mxu0 %v8015_v50  ;;  %3427 = vmatpush.bf16.msra.mxu2 %v5301_v42 }
 0x19c   : > { %2991 = vmatpush.bf16.msrb.mxu0 %v5113_v0  ;;  %v5205_v0 = vor.u32 %v5790_v62, %v5204_v61  ;;  %v5118_v61 = vld [vmem:[#allocation2 + $0x8] sm:$0xf0]  ;;  %v5791_v62 = vld [vmem:[#allocation2 + $0xc4] sm:$0xf] }
 0x19e   : > { %3417 = vmatpush.bf16.msra.mxu1 %v5205_v0 }
 0x1a0   : > { %2992 = vmatpush.bf16.msrb.mxu0 %v5097_v3  ;;  %v5166_v3 = vld [vmem:[#allocation2 + $0x68] sm:$0xf0] }
 0x1a1   : > { %v5169_v5 = vor.u32 %v5779_v2, %v5166_v3  ;;  %v8134_v2 = vld [vmem:[%s8159_s4] sm:$0xf]  ;;  %v5217_v3 = vor.u32 %v5791_v62, %v5214_v1 }
 0x1a2   : > { %v5324_v1 = vld [vmem:[#allocation2 + $0x1a0] sm:$0xf] }
 0x1a4   : > { %2993 = vmatpush.bf16.msrb.mxu0 %v5081_v6  ;;  %v5196_v6 = vld [vmem:[#allocation2 + $0xa0] sm:$0xf] }
 0x1a8   : > { %2994 = vmatpush.bf16.msrb.mxu0 %v5065_v10  ;;  %v5812_v10 = vld [vmem:[#allocation2 + $0x164] sm:$0xf0] }
 0x1a9   : > { %v5293_v13 = vor.u32 %v5812_v10, %v5292_v4  ;;  %v5364_v4 = vld [vmem:[#allocation2 + $0x1f0] sm:$0xf] }
 0x1ab   : > { %3428 = vmatpush.bf16.msra.mxu2 %v5293_v13  ;;  %v2133_v13 = vperm.slane %v8134_v2, 0 }
 0x1ac   : > { %2995 = vmatpush.bf16.msrb.mxu0 %v5049_v12  ;;  %v5197_v12 = vor.u32 %v5788_v7, %v5196_v6  ;;  %v5244_v6 = vld [vmem:[#allocation2 + $0x100] sm:$0xf]  ;;  %v5800_v7 = vld [vmem:[#allocation2 + $0x104] sm:$0xf0] }
 0x1ad   : > { %v5245_v10 = vor.u32 %v5800_v7, %v5244_v6  ;;  %v5820_v6 = vld [vmem:[#allocation2 + $0x1a4] sm:$0xf0]  ;;  %v2134_v7 = vperm.slane %v8134_v2, 1 }
 0x1ae   : > { %3418 = vmatpush.bf16.msra.mxu1 %v5197_v12  ;;  %v5206_v12 = vld [vmem:[#allocation2 + $0xb8] sm:$0xf0] }
 0x1af   : > { %3429 = vmatpush.bf16.msra.mxu2 %v5285_v21 }
 0x1b0   : > { %2996 = vmatpush.bf16.msrb.mxu0 %v5033_v15  ;;  %v5188_v15 = vld [vmem:[#allocation2 + $0x90] sm:$0xf] }
 0x1b3   : > { %3430 = vmatpush.bf16.msra.mxu2 %v5277_v8 }
 0x1b4   : > { %2997 = vmatpush.bf16.msrb.mxu0 %v5017_v17  ;;  %v5189_v17 = vor.u32 %v5786_v45, %v5188_v15  ;;  %v5209_v15 = vor.u32 %v5789_v11, %v5206_v12  ;;  %v5813_v45 = vld [vmem:[#allocation2 + $0x174] sm:$0xf]  ;;  %v5325_v12 = vor.u32 %v5820_v6, %v5324_v1  ;;  %v5819_v6 = vld [vmem:[#allocation2 + $0x1a4] sm:$0xf] }
 0x1b5   : > { %v5821_v1 = vld [vmem:[#allocation2 + $0x1b4] sm:$0xf] }
 0x1b6   : > { %3419 = vmatpush.bf16.msra.mxu1 %v5189_v17  ;;  %v5305_v17 = vor.u32 %v5813_v45, %v5302_v16 }
 0x1b8   : > { %2998 = vmatpush.bf16.msrb.mxu0 %v5001_v20  ;;  %v5150_v20 = vld [vmem:[#allocation2 + $0x48] sm:$0xf0] }
 0x1b9   : > { %v5153_v22 = vor.u32 %v5775_v19, %v5150_v20  ;;  %v5356_v19 = vld [vmem:[#allocation2 + $0x1e0] sm:$0xf]  ;;  %v5828_v20 = vld [vmem:[#allocation2 + $0x1e4] sm:$0xf0] }
 0x1ba   : > { %3420 = vmatpush.bf16.msra.mxu1 %v5181_v27  ;;  %v5357_v21 = vor.u32 %v5828_v20, %v5356_v19 }
 0x1bb   : > { %2999 = vmatmul.bf16.vlgmr.msrb.gmra.mxu0 %v8015_v50  ;;  %v5141_v50 = vor.u32 %v5774_v35, %v5140_v34  ;;  %v5238_v34 = vld [vmem:[#allocation2 + $0xf8] sm:$0xf0] }
 0x1bc   : > { %v5241_v35 = vor.u32 %v5797_v33, %v5238_v34  ;;  %v5785_v33 = vld [vmem:[#allocation2 + $0x94] sm:$0xf]  ;;  %v5190_v34 = vld [vmem:[#allocation2 + $0x98] sm:$0xf0] }
 0x1bd   : > { %3403 = vmatpush.bf16.msra.mxu3 %v5141_v50  ;;  %v5268_v50 = vld [vmem:[#allocation2 + $0x130] sm:$0xf] }
 0x1be   : > { %3469 = vmatpush.bf16.msrb.mxu1 %v5241_v35  ;;  %v5269_v31 = vor.u32 %v5806_v54, %v5268_v50  ;;  %v5809_v35 = vld [vmem:[#allocation2 + $0x154] sm:$0xf] }
 0x1c0   : > { %3431 = vmatpush.bf16.msra.mxu2 %v5269_v31  ;;  %v2860_v31 = vpop.f32.mrf.mxu1 }
 0x1c1   : > { %3404 = vmatpush.bf16.msra.mxu3 %v5133_v41  ;;  %v2790_v41 = vpop.f32.mrf.mxu3 }
 0x1c2   : > { %3470 = vmatpush.bf16.msrb.mxu1 %v5233_v46  ;;  %v2791_v26 = vadd.f32 %v2790_v41, %v2133_v13  ;;  %v5193_v41 = vor.u32 %v5785_v33, %v5190_v34 }
 0x1c4   : > { %v2805_v54 = vadd.f32 %v8127_v36, %v2791_v26 }
 0x1c5   : > { %3405 = vmatpush.bf16.msra.mxu3 %v5125_v37  ;;  %v5804_v37 = vld [vmem:[#allocation2 + $0x124] sm:$0xf0] }
 0x1c6   : > { %v5261_v48 = vor.u32 %v5804_v37, %v5260_v47 }
 0x1c8   : > { %3432 = vmatpush.bf16.msra.mxu2 %v5261_v48  ;;  %v5340_v48 = vld [vmem:[#allocation2 + $0x1c0] sm:$0xf] }
 0x1c9   : > { %3406 = vmatpush.bf16.msra.mxu3 %v5117_v53  ;;  %v5222_v53 = vld [vmem:[#allocation2 + $0xd8] sm:$0xf0]  ;;  %v2792_v42 = vpop.f32.mrf.mxu3  ;;  %v5341_v36 = vor.u32 %v5824_v49, %v5340_v48 }
 0x1ca   : > { %v5225_v56 = vor.u32 %v5793_v52, %v5222_v53  ;;  %v2793_v8 = vadd.f32 %v2792_v42, %v2133_v13  ;;  %v5182_v53 = vld [vmem:[#allocation2 + $0x88] sm:$0xf0]  ;;  %v2862_v42 = vpop.f32.mrf.mxu1  ;;  %v5316_v13 = vld [vmem:[#allocation2 + $0x190] sm:$0xf] }
 0x1cc   : > { %3471 = vmatpush.bf16.msrb.mxu1 %v5225_v56  ;;  %3433 = vmatpush.bf16.msra.mxu2 %v5253_v59  ;;  %v2807_v40 = vadd.f32 %v2806_v63, %v2793_v8  ;;  %v5807_v56 = vld [vmem:[#allocation2 + $0x144] sm:$0xf]  ;;  %v5805_v63 = vld [vmem:[#allocation2 + $0x134] sm:$0xf] }
 0x1cd   : > { %3455 = vmatpush.bf16.msrb.mxu3 %v5177_v9  ;;  %v8129_v43 = vpop.f32.mrf.mxu2  ;;  %v5767_v9 = vld [vmem:[#allocation2 + $0x4] sm:$0xf]  ;;  %v5829_v8 = vld [vmem:[#allocation2 + $0x1f4] sm:$0xf] }
 0x1ce   : > { %v5121_v0 = vor.u32 %v5767_v9, %v5118_v61  ;;  %v2819_v46 = vadd.f32 %v8129_v43, %v2805_v54  ;;  %v5281_v9 = vor.u32 %v5807_v56, %v5278_v58  ;;  %v5332_v61 = vld [vmem:[#allocation2 + $0x1b0] sm:$0xf]  ;;  %v5822_v43 = vld [vmem:[#allocation2 + $0x1b4] sm:$0xf0]  ;;  %v5823_v58 = vld [vmem:[#allocation2 + $0x1c4] sm:$0xf] }
 0x1cf   : > { %v5333_v62 = vor.u32 %v5822_v43, %v5332_v61 }
 0x1d0   : > { %3472 = vmatpush.bf16.msrb.mxu1 %v5217_v3  ;;  %3434 = vmatpush.bf16.msra.mxu2 %v5245_v10  ;;  %v5262_v10 = vld [vmem:[#allocation2 + $0x128] sm:$0xf0] }
 0x1d1   : > { %3456 = vmatpush.bf16.msrb.mxu3 %v5169_v5  ;;  %v2846_v50 = vpop.f32.mrf.mxu3 }
 0x1d2   : > { %v2847_v45 = vadd.f32 %v2846_v50, %v2134_v7  ;;  %v2916_v33 = vpop.f32.mrf.mxu1 }
 0x1d4   : > { %3473 = vmatpush.bf16.msrb.mxu1 %v5209_v15  ;;  %3483 = vmatpush.bf16.msrb.mxu2 %v5305_v17  ;;  %v5801_v17 = vld [vmem:[#allocation2 + $0x114] sm:$0xf]  ;;  %v2861_v20 = vadd.f32 %v2860_v31, %v2847_v45 }
 0x1d5   : > { %3457 = vmatpush.bf16.msrb.mxu3 %v5161_v14  ;;  %v2820_v5 = vpop.f32.mrf.mxu2  ;;  %v5365_v14 = vor.u32 %v5830_v55, %v5364_v4  ;;  %v5803_v4 = vld [vmem:[#allocation2 + $0x124] sm:$0xf] }
 0x1d6   : > { %v2821_v47 = vadd.f32 %v2820_v5, %v2807_v40  ;;  %v5265_v15 = vor.u32 %v5803_v4, %v5262_v10  ;;  %v5817_v10 = vld [vmem:[#allocation2 + $0x194] sm:$0xf] }
 0x1d7   : > { %3441 = vmatpush.bf16.msra.mxu0 %v5365_v14  ;;  %v5818_v14 = vld [vmem:[#allocation2 + $0x194] sm:$0xf0] }
 0x1d8   : > { %v5317_v19 = vor.u32 %v5818_v14, %v5316_v13  ;;  %v5815_v13 = vld [vmem:[#allocation2 + $0x184] sm:$0xf]  ;;  %v5310_v14 = vld [vmem:[#allocation2 + $0x188] sm:$0xf0] }
 0x1d9   : > { %3458 = vmatpush.bf16.msrb.mxu3 %v5153_v22  ;;  %v5787_v22 = vld [vmem:[#allocation2 + $0xa4] sm:$0xf]  ;;  %v2848_v3 = vpop.f32.mrf.mxu3  ;;  %v5313_v45 = vor.u32 %v5815_v13, %v5310_v14 }
 0x1da   : > { %v5201_v27 = vor.u32 %v5787_v22, %v5198_v24  ;;  %v2849_v16 = vadd.f32 %v2848_v3, %v2134_v7  ;;  %v5308_v22 = vld [vmem:[#allocation2 + $0x180] sm:$0xf]  ;;  %v5816_v24 = vld [vmem:[#allocation2 + $0x184] sm:$0xf0]  ;;  %v5334_v3 = vld [vmem:[#allocation2 + $0x1b8] sm:$0xf0] }
 0x1db   : > { %3442 = vmatpush.bf16.msra.mxu0 %v5357_v21  ;;  %v5326_v7 = vld [vmem:[#allocation2 + $0x1a8] sm:$0xf0] }
 0x1dc   : > { %3474 = vmatpush.bf16.msrb.mxu1 %v5201_v27  ;;  %v2863_v21 = vadd.f32 %v2862_v42, %v2849_v16  ;;  %v5799_v27 = vld [vmem:[#allocation2 + $0x104] sm:$0xf]  ;;  %v5337_v42 = vor.u32 %v5821_v1, %v5334_v3  ;;  %v5329_v4 = vor.u32 %v5819_v6, %v5326_v7 }
 0x1dd   : > { %3459 = vmatpush.bf16.msrb.mxu3 %v5145_v32  ;;  %v5297_v32 = vor.u32 %v5811_v25, %v5294_v28  ;;  %v2874_v44 = vpop.f32.mrf.mxu2  ;;  %v5249_v31 = vor.u32 %v5799_v27, %v5246_v30 }
 0x1de   : > { %v2875_v28 = vadd.f32 %v2874_v44, %v2861_v20 }
 0x1df   : > { %3484 = vmatpush.bf16.msrb.mxu2 %v5297_v32  ;;  %3443 = vmatpush.bf16.msra.mxu0 %v5349_v38  ;;  %v5366_v32 = vld [vmem:[#allocation2 + $0x1f8] sm:$0xf0] }
 0x1e0   : > { %3475 = vmatpush.bf16.msrb.mxu1 %v5193_v41  ;;  %v5827_v41 = vld [vmem:[#allocation2 + $0x1e4] sm:$0xf] }
 0x1e1   : > { %3460 = vmatpush.bf16.msrb.mxu3 %v5137_v60  ;;  %v5289_v60 = vor.u32 %v5809_v35, %v5286_v39  ;;  %v2902_v25 = vpop.f32.mrf.mxu3  ;;  %v5309_v35 = vor.u32 %v5816_v24, %v5308_v22  ;;  %v5369_v39 = vor.u32 %v5829_v8, %v5366_v32 }
 0x1e3   : > { %3485 = vmatpush.bf16.msrb.mxu2 %v5289_v60  ;;  %3444 = vmatpush.bf16.msra.mxu0 %v5341_v36  ;;  %v5358_v60 = vld [vmem:[#allocation2 + $0x1e8] sm:$0xf0] }
 0x1e4   : > { %v5361_v44 = vor.u32 %v5827_v41, %v5358_v60  ;;  %v5831_v41 = vld [vmem:[#allocation4] sm:$0xff] }
 0x1e5   : > { %3461 = vmatpush.bf16.msrb.mxu3 %v5129_v23  ;;  %v5783_v23 = vld [vmem:[#allocation2 + $0x84] sm:$0xf]  ;;  %v2876_v55 = vpop.f32.mrf.mxu2 }
 0x1e6   : > { %v5185_v57 = vor.u32 %v5783_v23, %v5182_v53  ;;  %v2877_v29 = vadd.f32 %v2876_v55, %v2863_v21  ;;  %v5318_v55 = vld [vmem:[#allocation2 + $0x198] sm:$0xf0]  ;;  %v5843_v60 = vld [vmem:[#allocation4 + $0x60] sm:$0xff] }
 0x1e7   : > { %3486 = vmatpush.bf16.msrb.mxu2 %v5281_v9  ;;  %3445 = vmatpush.bf16.msra.mxu0 %v5333_v62 }
 0x1e8   : > { %3476 = vmatpush.bf16.msrb.mxu1 %v5185_v57 }
 0x1e9   : > { %3462 = vmatpush.bf16.msrb.mxu3 %v5121_v0  ;;  %v5270_v0 = vld [vmem:[#allocation2 + $0x138] sm:$0xf0]  ;;  %v2904_v48 = vpop.f32.mrf.mxu3 }
 0x1ea   : > { %v5273_v5 = vor.u32 %v5805_v63, %v5270_v0 }
 0x1eb   : > { %3446 = vmatpush.bf16.msra.mxu0 %v5325_v12 }
 0x1ec   : > { %3487 = vmatpush.bf16.msrb.mxu2 %v5273_v5 }
 0x1ef   : > { %3447 = vmatpush.bf16.msra.mxu0 %v5317_v19 }
 0x1f0   : > { %3488 = vmatpush.bf16.msrb.mxu2 %v5265_v15 }
 0x1f1   : > { %v2958_v12 = vpop.f32.mrf.mxu3 }
 0x1f2   : > { %v2930_v38 = vpop.f32.mrf.mxu2 }
 0x1f3   : > { %3448 = vmatpush.bf16.msra.mxu0 %v5309_v35  ;;  %v5835_v35 = vld [vmem:[#allocation4 + $0x20] sm:$0xff] }
 0x1f7   : > { %3497 = vmatpush.bf16.msrb.mxu0 %v5369_v39  ;;  %v5832_v39 = vld [vmem:[#allocation4 + $0x8] sm:$0xff] }
 0x1f8   : > { %v2832_v18 = vpop.f32.mrf.mxu0 }
 0x1f9   : > { %v2833_v51 = vadd.f32 %v2832_v18, %v2819_v46  ;;  %v5254_v18 = vld [vmem:[#allocation2 + $0x118] sm:$0xf0]  ;;  %v2135_v46 = vperm.slane %v8134_v2, 2 }
 0x1fa   : > { %v5257_v26 = vor.u32 %v5801_v17, %v5254_v18  ;;  %v2932_v53 = vpop.f32.mrf.mxu2  ;;  %v2136_v17 = vperm.slane %v8134_v2, 3  ;;  %v2960_v18 = vpop.f32.mrf.mxu3  ;;  %v5837_v2 = vld [vmem:[#allocation4 + $0x30] sm:$0xff] }
 0x1fb   : > { %3498 = vmatpush.bf16.msrb.mxu0 %v5361_v44  ;;  %v2903_v36 = vadd.f32 %v2902_v25, %v2135_v46  ;;  %v2905_v23 = vadd.f32 %v2904_v48, %v2135_v46  ;;  %v5842_v44 = vld [vmem:[#allocation4 + $0x58] sm:$0xff]  ;;  %v5841_v46 = vld [vmem:[#allocation4 + $0x50] sm:$0xff] }
 0x1fc   : > { %3489 = vmatpush.bf16.msrb.mxu2 %v5257_v26  ;;  %v2959_v21 = vadd.f32 %v2958_v12, %v2136_v17  ;;  %v2961_v22 = vadd.f32 %v2960_v18, %v2136_v17 }
 0x1fd   : > { %v2917_v56 = vadd.f32 %v2916_v33, %v2903_v36  ;;  %v5838_v33 = vld [vmem:[#allocation4 + $0x38] sm:$0xff] }
 0x1ff   : > { %v2931_v61 = vadd.f32 %v2930_v38, %v2917_v56  ;;  %v5833_v38 = vld [vmem:[#allocation4 + $0x10] sm:$0xff] }
 0x200   : > { %v2834_v37 = vpop.f32.mrf.mxu0  ;;  %3490 = vmatpush.bf16.msrb.mxu2 %v5249_v31  ;;  %v5845_v31 = vld [vmem:[#allocation4 + $0x70] sm:$0xff] }
 0x201   : > { %v2835_v52 = vadd.f32 %v2834_v37, %v2821_v47  ;;  %v5825_v47 = vld [vmem:[#allocation2 + $0x1d4] sm:$0xf]  ;;  %v5350_v37 = vld [vmem:[#allocation2 + $0x1d8] sm:$0xf0] }
 0x203   : > { %v3005_v59 = vpack.c.bf16 %v2835_v52, %v2833_v51  ;;  %v2918_v51 = vpop.f32.mrf.mxu1  ;;  %v5353_v52 = vor.u32 %v5825_v47, %v5350_v37  ;;  %v5840_v37 = vld [vmem:[#allocation4 + $0x48] sm:$0xff] }
 0x204   : > { %v2919_v57 = vadd.f32 %v2918_v51, %v2905_v23  ;;  %v5839_v51 = vld [vmem:[#allocation4 + $0x40] sm:$0xff] }
 0x205   : > { %3407 = vmatmul.bf16.vlgmr.msra.gmra.mxu3 %v3005_v59  ;;  %3499 = vmatpush.bf16.msrb.mxu0 %v5353_v52  ;;  %v3073_v52 = vld [vmem:[%s8161_s6] sm:$0x3] }
 0x206   : > { %v2933_v43 = vadd.f32 %v2932_v53, %v2919_v57  ;;  %3645 = vmatpush.bf16.msra.mxu3 %v5838_v33  ;;  %v3075_v53 = vperm.slane %v3073_v52, 0  ;;  %v3076_v7 = vperm.slane %v3073_v52, 1 }
 0x208   : > { %v2888_v11 = vpop.f32.mrf.mxu0 }
 0x209   : > { %v2889_v50 = vadd.f32 %v2888_v11, %v2875_v28  ;;  %v5321_v11 = vor.u32 %v5817_v10, %v5318_v55 }
 0x20a   : > { %3646 = vmatpush.bf16.msra.mxu3 %v5837_v2 }
 0x20b   : > { %v2972_v15 = vpop.f32.mrf.mxu1 }
 0x20c   : > { %v2973_v25 = vadd.f32 %v2972_v15, %v2959_v21 }
 0x210   : > { %v2890_v34 = vpop.f32.mrf.mxu0 }
 0x211   : > { %v2891_v54 = vadd.f32 %v2890_v34, %v2877_v29  ;;  %v5836_v34 = vld [vmem:[#allocation4 + $0x28] sm:$0xff] }
 0x212   : > { %v2986_v16 = vpop.f32.mrf.mxu2  ;;  %3647 = vmatpush.bf16.msra.mxu3 %v5836_v34 }
 0x213   : > { %v3006_v40 = vpack.c.bf16 %v2891_v54, %v2889_v50  ;;  %v2974_v20 = vpop.f32.mrf.mxu1  ;;  %v2987_v27 = vadd.f32 %v2986_v16, %v2973_v25  ;;  %v5846_v50 = vld [vmem:[#allocation4 + $0x78] sm:$0xff] }
 0x214   : > { %v2975_v26 = vadd.f32 %v2974_v20, %v2961_v22  ;;  %v5834_v54 = vld [vmem:[#allocation4 + $0x18] sm:$0xff]  ;;  %v5881_v22 = vld [vmem:[%s8163_s8] ss:$0 sm:$0xff] }
 0x215   : > { %3421 = vmatmul.bf16.vlgmr.msra.gmra.mxu1 %v3006_v40  ;;  %3463 = vmatmul.bf16.vlgmr.msrb.gmra.mxu3 %v3005_v59  ;;  %v5342_v59 = vld [vmem:[#allocation2 + $0x1c8] sm:$0xf0] }
 0x216   : > { %v5345_v9 = vor.u32 %v5823_v58, %v5342_v59  ;;  %3648 = vmatpush.bf16.msra.mxu3 %v5835_v35  ;;  %3659 = vmatpush.bf16.msra.mxu1 %v5846_v50 }
 0x218   : > { %v2944_v49 = vpop.f32.mrf.mxu0  ;;  %3500 = vmatpush.bf16.msrb.mxu0 %v5345_v9 }
 0x219   : > { %v2945_v63 = vadd.f32 %v2944_v49, %v2931_v61 }
 0x21a   : > { %v2988_v24 = vpop.f32.mrf.mxu2  ;;  %3649 = vmatpush.bf16.msra.mxu3 %v5834_v54  ;;  %3660 = vmatpush.bf16.msra.mxu1 %v5845_v31 }
 0x21b   : > { %v2989_v28 = vadd.f32 %v2988_v24, %v2975_v26 }
 0x21c   : > { %3501 = vmatpush.bf16.msrb.mxu0 %v5337_v42 }
 0x21e   : > { %3650 = vmatpush.bf16.msra.mxu3 %v5833_v38 }
 0x220   : > { %v2946_v62 = vpop.f32.mrf.mxu0  ;;  %3502 = vmatpush.bf16.msrb.mxu0 %v5329_v4 }
 0x221   : > { %v2947_v0 = vadd.f32 %v2946_v62, %v2933_v43 }
 0x222   : > { %3651 = vmatpush.bf16.msra.mxu3 %v5832_v39 }
 0x223   : > { %v3007_v5 = vpack.c.bf16 %v2947_v0, %v2945_v63 }
 0x224   : > { %3503 = vmatpush.bf16.msrb.mxu0 %v5321_v11 }
 0x225   : > { %3435 = vmatmul.bf16.vlgmr.msra.gmra.mxu2 %v3007_v5  ;;  %3477 = vmatmul.bf16.vlgmr.msrb.gmra.mxu1 %v3006_v40  ;;  %v5844_v40 = vld [vmem:[#allocation4 + $0x68] sm:$0xff] }
 0x226   : > { %3661 = vmatpush.bf16.msra.mxu1 %v5844_v40  ;;  %3652 = vmatpush.bf16.msra.mxu3 %v5831_v41 }
 0x228   : > { %3504 = vmatpush.bf16.msrb.mxu0 %v5313_v45 }
 0x22a   : > { %3662 = vmatpush.bf16.msra.mxu1 %v5843_v60 }
 0x22e   : > { %3663 = vmatpush.bf16.msra.mxu1 %v5842_v44 }
 0x232   : > { %3664 = vmatpush.bf16.msra.mxu1 %v5841_v46 }
 0x235   : > { %3491 = vmatmul.bf16.vlgmr.msrb.gmra.mxu2 %v3007_v5 }
 0x236   : > { %3665 = vmatpush.bf16.msra.mxu1 %v5840_v37 }
 0x238   : > { %v3000_v19 = vpop.f32.mrf.mxu0 }
 0x239   : > { %v3001_v30 = vadd.f32 %v3000_v19, %v2987_v27 }
 0x23a   : > { %3666 = vmatpush.bf16.msra.mxu1 %v5839_v51 }
 0x240   : > { %v3002_v29 = vpop.f32.mrf.mxu0 }
 0x241   : > { %v3003_v8 = vadd.f32 %v3002_v29, %v2989_v28 }
 0x243   : > { %v3008_v32 = vpack.c.bf16 %v3003_v8, %v3001_v30 }
 0x245   : > { %3449 = vmatmul.bf16.vlgmr.msra.gmra.mxu0 %v3008_v32 }
 0x255   : > { %3505 = vmatmul.bf16.vlgmr.msrb.gmra.mxu0 %v3008_v32 }
 0x288   : > { %v3408_v47 = vpop.f32.mrf.mxu3 }
 0x289   : > { %v3409_v58 = vadd.f32 %v3408_v47, %v3075_v53 }
 0x290   : > { %v3410_v36 = vpop.f32.mrf.mxu3 }
 0x291   : > { %v3411_v59 = vadd.f32 %v3410_v36, %v3075_v53 }
 0x292   : > { %v3422_v48 = vpop.f32.mrf.mxu1 }
 0x293   : > { %v3423_v9 = vadd.f32 %v3422_v48, %v3409_v58 }
 0x298   : > { %v3464_v43 = vpop.f32.mrf.mxu3 }
 0x299   : > { %v3465_v11 = vadd.f32 %v3464_v43, %v3076_v7 }
 0x29a   : > { %v3424_v23 = vpop.f32.mrf.mxu1 }
 0x29b   : > { %v3425_v61 = vadd.f32 %v3424_v23, %v3411_v59 }
 0x2a0   : > { %v3466_v4 = vpop.f32.mrf.mxu3 }
 0x2a1   : > { %v3467_v12 = vadd.f32 %v3466_v4, %v3076_v7 }
 0x2a2   : > { %v3478_v0 = vpop.f32.mrf.mxu1 }
 0x2a3   : > { %v3479_v14 = vadd.f32 %v3478_v0, %v3465_v11 }
 0x2a8   : > { %v3436_v49 = vpop.f32.mrf.mxu2 }
 0x2a9   : > { %v3437_v62 = vadd.f32 %v3436_v49, %v3423_v9 }
 0x2aa   : > { %v3480_v55 = vpop.f32.mrf.mxu1 }
 0x2ab   : > { %v3481_v15 = vadd.f32 %v3480_v55, %v3467_v12 }
 0x2b0   : > { %v3438_v56 = vpop.f32.mrf.mxu2 }
 0x2b1   : > { %v3439_v63 = vadd.f32 %v3438_v56, %v3425_v61 }
 0x2b8   : > { %v3492_v5 = vpop.f32.mrf.mxu2 }
 0x2b9   : > { %v3493_v45 = vadd.f32 %v3492_v5, %v3479_v14 }
 0x2c0   : > { %v3494_v13 = vpop.f32.mrf.mxu2 }
 0x2c1   : > { %v3495_v16 = vadd.f32 %v3494_v13, %v3481_v15 }
 0x2c2   : > { %v3450_v57 = vpop.f32.mrf.mxu0 }
 0x2c3   : > { %v3451_v3 = vadd.f32 %v3450_v57, %v3437_v62 }
 0x2ca   : > { %v3452_v1 = vpop.f32.mrf.mxu0 }
 0x2cb   : > { %v3453_v42 = vadd.f32 %v3452_v1, %v3439_v63 }
 0x2cd   : > { %v3511_v6 = vpack.c.bf16 %v3453_v42, %v3451_v3 }
 0x2cf   : > { %3653 = vmatmul.bf16.vlgmr.msra.gmra.mxu3 %v3511_v6 }
 0x2d2   : > { %v3506_v10 = vpop.f32.mrf.mxu0 }
 0x2d3   : > { %v3507_v18 = vadd.f32 %v3506_v10, %v3493_v45 }
 0x2da   : > { %v3508_v17 = vpop.f32.mrf.mxu0 }
 0x2db   : > { %v3509_v19 = vadd.f32 %v3508_v17, %v3495_v16 }
 0x2dd   : > { %v3512_v20 = vpack.c.bf16 %v3509_v19, %v3507_v18 }
 0x2df   : > { %3667 = vmatmul.bf16.vlgmr.msra.gmra.mxu1 %v3512_v20 }
 0x352   : > { %v3654_v21 = vpop.f32.mrf.mxu3 }
 0x353   : > { %v3655_v24 = vadd.f32 %v5881_v22, %v3654_v21 }
 0x35a   : > { %v3656_v27 = vpop.f32.mrf.mxu3 }
 0x35b   : > { %v3657_v28 = vadd.f32 %v5881_v22, %v3656_v27 }
 0x35c   : > { %v3668_v25 = vpop.f32.mrf.mxu1 }
 0x35d   : > { %v3669_v26 = vadd.f32 %v3668_v25, %v3655_v24 }
 0x35f   : > { %3673 = vmax.xlane.f32.xlu0 %v3669_v26 }
 0x364   : > { %v3670_v29 = vpop.f32.mrf.mxu1 }
 0x365   : > { %v3671_v30 = vadd.f32 %v3670_v29, %v3657_v28 }
 0x367   : > { %3675 = vmax.xlane.f32.xlu0 %v3671_v30 }
 0x3d2   : > { %v3674_v8 = vpop.xlane.xlu0 %3673 }
 0x3d3   : > { %v3677_v32 = vsub.f32 %v3669_v26, %v3674_v8 }
 0x3d5   : > { %v3679_v33 = vmul.f32 1.442695, %v3677_v32 }
 0x3d7   : > { %5882 = vpow2.f32 %v3679_v33 }
 0x3da   : > { %v3676_v2 = vpop.xlane.xlu0 %3675 }
 0x3db   : > { %v3678_v34 = vsub.f32 %v3671_v30, %v3676_v2 }
 0x3dd   : > { %v5883_v35 = vpop.eup %5882  ;;  %v3681_v50 = vmul.f32 1.442695, %v3678_v34 }
 0x3de   : > { %3683 = vadd.xlane.f32.xlu1 %v5883_v35 }
 0x3df   : > { %5884 = vpow2.f32 %v3681_v50 }
 0x3e5   : > { %v5885_v54 = vpop.eup %5884 }
 0x3e6   : > { %3685 = vadd.xlane.f32.xlu1 %v5885_v54 }
 0x451   : > { %v3684_v38 = vpop.xlane.xlu1 %3683 }
 0x452   : > { %5886 = vlog2.f32 %v3684_v38 }
 0x458   : > { %v5887_v31 = vpop.eup %5886 }
 0x459   : > { %v3688_v39 = vmul.f32 0.6931472, %v5887_v31  ;;  %v3686_v40 = vpop.xlane.xlu1 %3685 }
 0x45a   : > { %5888 = vlog2.f32 %v3686_v40 }
 0x45b   : > { %v3691_v41 = vsub.f32 %v3677_v32, %v3688_v39 }
 0x45d   : > { %3693 = vst [vmem:[%s371_s18] sm:$0xff] %v3691_v41 }
 0x460   : > { %v5889_v60 = vpop.eup %5888 }
 0x461   : > { %v3690_v44 = vmul.f32 0.6931472, %v5889_v60 }
 0x463   : > { %v3692_v46 = vsub.f32 %v3678_v34, %v3690_v44 }
 0x465   : > { %3694 = vst [vmem:[%s371_s18 + $0x8] sm:$0xff] %v3692_v46 }
 0x466 PF: > { %s21_s30 = sadd.s32 1, %s5965_s30  }
 0x467   : > { %p18_p7 = scmp.ge.s32.totalorder %s21_s30, 6  }
 0x469   :  { %20 = sbr.rel (!%p18_p7) target bundleno = 2 (0x2), region = 95 }
 0x46e   :  { %3717 = vsyncpa [#allocation3], 1 }
 0x46f   :  { %3719 = vsyncpa [#allocation3 + $0x1], 1 }
 0x470   :  { %3720 = vsyncpa [#allocation5], 1 }

</bundles_post_ra>
